<compile_context>
chip_gen: v7x
topology: tpu7x:2x2x1
jax: 0.10.0
libtpu: 0.0.40
codegen_flags: <defaults>
</compile_context>

<pallas_src>
import functools

import jax
import jax.numpy as jnp
import numpy as np
from jax.experimental import pallas as pl
from jax.experimental.pallas import tpu as pltpu

EPS = 1e-5
LANE = 128                       # channel dims padded to a multiple of the lane width
MXU_DTYPE = jnp.bfloat16         # MXU operand dtype (accumulation / BN stay f32)
CONV_OUT_DTYPE = jnp.bfloat16    # dtype of the conv output that round-trips HBM
APPLY_TILE_M = 1024              # row-tile for the mem-bound BN-apply pass


@functools.lru_cache(maxsize=None)
def _vmem_limit_bytes():
    """Generation-aware scoped-VMEM budget (~75% of capacity, capped at 100 MiB)."""
    cap = None
    try:
        cap = getattr(pltpu.get_tpu_info(), "vmem_capacity_bytes", None)
    except Exception:
        cap = None
    if not cap:
        cap = 64 * 1024 * 1024   # conservative fallback (v7x-sized)
    return int(min(cap * 3 // 4, 100 * 1024 * 1024))


def _round_up(x, m):
    return (x + m - 1) // m * m


# --------------------------------------------------------------------------- kernels
def _conv_stats_kernel(xw_ref, w_ref, y_ref, ps_ref, *, hw, w_img):
    """Per-image 3x3 conv (3 shifted, MXU-accumulated matmuls) + partial BN stats.

    xw_ref : (1, (H+2)*W, 3*CP) bf16  width-im2col'd, spatially padded image
    w_ref  : (3, 3*CP, CP)      bf16  conv weights, w[dy, dx*CP + ci, co]
    y_ref  : (1, H*W, CP)             raw conv output for this image (bf16)
    ps_ref : (1, 2, CP)         f32   per-image [sum(y); sum(y*y)]
    """
    # conv as 3 MXU matmuls over contiguous, sublane-aligned row windows (dy = 0, 1, 2).
    # (slice starts dy*W are static; keep W a multiple of 8 for free views)
    y = jnp.dot(xw_ref[0, 0:hw, :], w_ref[0], preferred_element_type=jnp.float32)
    for dy in (1, 2):                                     # static unroll
        y = y + jnp.dot(xw_ref[0, dy * w_img: dy * w_img + hw, :], w_ref[dy],
                        preferred_element_type=jnp.float32)
    y_ref[0] = y.astype(y_ref.dtype)

    # per-channel sum / sum-of-squares on the XLU (keeps the MXU slot for the conv).
    s1 = jnp.sum(y, axis=0, keepdims=True)                # (1, CP) f32
    s2 = jnp.sum(y * y, axis=0, keepdims=True)            # (1, CP) f32
    ps_ref[0] = jnp.concatenate([s1, s2], axis=0)


def _bn_apply_kernel(*refs, with_residual):
    """out = relu(y * scale + shift [+ residual]) on one lane-dense (TILE_M, CP) tile."""
    if with_residual:
        y_ref, ss_ref, r_ref, o_ref = refs
    else:
        y_ref, ss_ref, o_ref = refs
    scale = ss_ref[0:1, :]
    shift = ss_ref[1:2, :]
    v = y_ref[...].astype(jnp.float32) * scale + shift
    if with_residual:
        v = v + r_ref[...].astype(jnp.float32)
    o_ref[...] = jnp.maximum(v, 0.0).astype(o_ref.dtype)


# --------------------------------------------------------------------- pallas wrappers
def _conv_partial_stats(xw, w_mat, n, hw, w_img):
    """Returns raw conv output y (N, H*W, CP) bf16 and per-image partial sums (N, 2, CP)."""
    hp2w, kp = xw.shape[1], xw.shape[2]
    cp = w_mat.shape[-1]
    kernel = functools.partial(_conv_stats_kernel, hw=hw, w_img=w_img)
    return pl.pallas_call(
        kernel,
        out_shape=(jax.ShapeDtypeStruct((n, hw, cp), CONV_OUT_DTYPE),
                   jax.ShapeDtypeStruct((n, 2, cp), jnp.float32)),
        grid=(n,),
        in_specs=[
            pl.BlockSpec((1, hp2w, kp), lambda b: (b, 0, 0)),
            pl.BlockSpec((3, kp, cp), lambda b: (0, 0, 0)),
        ],
        out_specs=(
            pl.BlockSpec((1, hw, cp), lambda b: (b, 0, 0)),
            pl.BlockSpec((1, 2, cp), lambda b: (b, 0, 0)),
        ),
        compiler_params=pltpu.CompilerParams(
            dimension_semantics=("parallel",),     # no cross-step state -> megacore OK
            vmem_limit_bytes=_vmem_limit_bytes()),
    )(xw, w_mat)


def _fold_bn_scale_shift(partial_sums, gamma, beta, count):
    """Fold per-image partial sums into BN (scale, shift). Tiny; plain JAX."""
    sums = jnp.sum(partial_sums.astype(jnp.float32), axis=0)     # (2, CP)
    mean = sums[0] / count
    var = jnp.maximum(sums[1] / count - mean * mean, 0.0)
    scale = gamma.reshape(-1).astype(jnp.float32) * jax.lax.rsqrt(var + EPS)
    shift = beta.reshape(-1).astype(jnp.float32) - mean * scale
    return jnp.stack([scale, shift], axis=0)                     # (2, CP) f32


def _bn_relu_apply(y_flat, scale_shift, residual=None, out_dtype=jnp.float32):
    """Lane-dense tiled y*scale+shift (+residual) -> ReLU.  M is padded to a tile multiple."""
    m, cp = y_flat.shape
    tile_m = min(APPLY_TILE_M, _round_up(m, 8))
    m_pad = _round_up(m, tile_m)
    if m_pad != m:
        pad = ((0, m_pad - m), (0, 0))
        y_flat = jnp.pad(y_flat, pad)
        if residual is not None:
            residual = jnp.pad(residual, pad)

    with_residual = residual is not None
    kernel = functools.partial(_bn_apply_kernel, with_residual=with_residual)
    in_specs = [
        pl.BlockSpec((tile_m, cp), lambda i: (i, 0)),
        pl.BlockSpec((2, cp), lambda i: (0, 0)),
    ]
    args = [y_flat, scale_shift]
    if with_residual:
        in_specs.append(pl.BlockSpec((tile_m, cp), lambda i: (i, 0)))
        args.append(residual)

    out = pl.pallas_call(
        kernel,
        out_shape=jax.ShapeDtypeStruct((m_pad, cp), out_dtype),
        grid=(m_pad // tile_m,),
        in_specs=in_specs,
        out_specs=pl.BlockSpec((tile_m, cp), lambda i: (i, 0)),
        compiler_params=pltpu.CompilerParams(
            dimension_semantics=("parallel",),
            vmem_limit_bytes=_vmem_limit_bytes()),
    )(*args)
    return out[:m] if m_pad != m else out


# ----------------------------------------------------------------------------- glue
def _pad_last(a, to):
    pad = to - a.shape[-1]
    if pad == 0:
        return a
    return jnp.pad(a, [(0, 0)] * (a.ndim - 1) + [(0, pad)])


def _width_im2col(x_nhwc):
    """(N, H, W, CP) -> (N, (H+2)*W, 3*CP).

    SAME-pads spatially, then im2col's along *width only* (3x activation inflation
    instead of 9x).  Row r = hp*W + w of image n holds
    [x_pad[n, hp, w+0, :], x_pad[n, hp, w+1, :], x_pad[n, hp, w+2, :]];
    the dy (height) taps become contiguous, sublane-aligned row slices in the kernel.
    """
    n, h, w, cp = x_nhwc.shape
    xp = jnp.pad(x_nhwc, ((0, 0), (1, 1), (1, 1), (0, 0)))      # (N, H+2, W+2, CP)
    cols = [xp[:, :, dx:dx + w, :] for dx in range(3)]          # each (N, H+2, W, CP)
    xw = jnp.concatenate(cols, axis=-1)                         # (N, H+2, W, 3*CP)
    return xw.reshape(n, (h + 2) * w, 3 * cp)


@jax.jit
def basic_block_forward(x_nchw, w1, g1, b1, w2, g2, b2):
    """BasicBlock forward (stride=1, no downsample).

    x_nchw : (N, Cin, H, W) f32
    w1, w2 : (3, 3, Cin, Cout) HWIO conv weights (PyTorch OIHW must be transposed by caller)
    g*, b* : (1, C) BN affine params
    """
    n, c, h, w = x_nchw.shape
    cout = w1.shape[-1]
    cp = ((max(c, cout) + LANE - 1) // LANE) * LANE             # lane-dense channel width
    hw = h * w
    m = n * hw
    count = float(n * hw)

    x = jnp.transpose(x_nchw, (0, 2, 3, 1)).astype(jnp.float32)  # NHWC
    xp = _pad_last(x, cp)                                        # zero-pad channels (f32)

    def pad_w(wgt):
        wp = jnp.pad(wgt, ((0, 0), (0, 0),
                           (0, cp - wgt.shape[2]), (0, cp - wgt.shape[3])))
        return wp.reshape(3, 3 * cp, cp).astype(MXU_DTYPE)       # (dy, dx*CP + ci, co)

    w1m, w2m = pad_w(w1), pad_w(w2)
    g1p, b1p = _pad_last(g1, cp), _pad_last(b1, cp)              # padded channels: gamma=0
    g2p, b2p = _pad_last(g2, cp), _pad_last(b2, cp)

    # ---- conv1 + bn1 + relu (no residual -> no residual operand at all) ----
    xw1 = _width_im2col(xp).astype(MXU_DTYPE)
    y1, ps1 = _conv_partial_stats(xw1, w1m, n, hw, w)
    ss1 = _fold_bn_scale_shift(ps1, g1p, b1p, count)
    h1 = _bn_relu_apply(y1.reshape(m, cp), ss1, out_dtype=MXU_DTYPE)   # (M, CP) bf16

    # ---- conv2 + bn2 + residual + relu  (downsample is None -> residual = x) ----
    xw2 = _width_im2col(h1.reshape(n, h, w, cp)).astype(MXU_DTYPE)
    y2, ps2 = _conv_partial_stats(xw2, w2m, n, hw, w)
    ss2 = _fold_bn_scale_shift(ps2, g2p, b2p, count)
    o = _bn_relu_apply(y2.reshape(m, cp), ss2, residual=xp.reshape(m, cp),
                       out_dtype=jnp.float32)

    o = o.reshape(n, h, w, cp)[:, :, :, :cout]
    return jnp.transpose(o, (0, 3, 1, 2))                        # back to NCHW


# ------------------------------------------------------------------- pure-JAX reference
def _reference(x_nchw, w1, g1, b1, w2, g2, b2):
    x = jnp.transpose(x_nchw, (0, 2, 3, 1)).astype(jnp.float32)

    def conv(z, wgt):
        return jax.lax.conv_general_dilated(
            z, wgt, window_strides=(1, 1), padding=((1, 1), (1, 1)),
            dimension_numbers=("NHWC", "HWIO", "NHWC"))

    def bn(y, g, b):
        mean = jnp.mean(y, axis=(0, 1, 2), keepdims=True)
        var = jnp.mean((y - mean) ** 2, axis=(0, 1, 2), keepdims=True)
        return (y - mean) * jax.lax.rsqrt(var + EPS) * g.reshape(1, 1, 1, -1) \
            + b.reshape(1, 1, 1, -1)

    hmid = jax.nn.relu(bn(conv(x, w1), g1, b1))
    o = jax.nn.relu(bn(conv(hmid, w2), g2, b2) + x)
    return jnp.transpose(o, (0, 3, 1, 2))


# -------------------------------------------------------------------------------- main
if __name__ == "__main__":
    N, C, H, W = 2, 4, 16, 16          # inplanes = planes = 4, stride = 1
    key = jax.random.PRNGKey(0)
    kx, kw1, kw2, kg1, kb1, kg2, kb2 = jax.random.split(key, 7)

    x = jax.random.normal(kx, (N, C, H, W), jnp.float32)
    # conv weights in HWIO layout (3, 3, Cin, Cout)
    w1 = 0.1 * jax.random.normal(kw1, (3, 3, C, C), jnp.float32)
    w2 = 0.1 * jax.random.normal(kw2, (3, 3, C, C), jnp.float32)
    # BN affine params (PyTorch default init is gamma=1, beta=0; perturb to exercise path)
    g1 = 1.0 + 0.1 * jax.random.normal(kg1, (1, C), jnp.float32)
    b1 = 0.1 * jax.random.normal(kb1, (1, C), jnp.float32)
    g2 = 1.0 + 0.1 * jax.random.normal(kg2, (1, C), jnp.float32)
    b2 = 0.1 * jax.random.normal(kb2, (1, C), jnp.float32)

    out = jax.block_until_ready(basic_block_forward(x, w1, g1, b1, w2, g2, b2))
    ref = jax.block_until_ready(_reference(x, w1, g1, b1, w2, g2, b2))
    # bf16 MXU operands + bf16 intermediates vs. a full-f32 reference: expected elementwise
    # error is O(1e-2); tolerance sized accordingly (structural bugs would be O(1)).
    np.testing.assert_allclose(np.asarray(out), np.asarray(ref), rtol=5e-2, atol=6e-2)

    print("KERNEL_OK")
</pallas_src>

<mosaic_0001>
module attributes {stable_mosaic.version = 11 : i64} {
  func.func @_bn_apply_kernel(%arg0: i32, %arg1: memref<512x128xbf16, #tpu.memory_space<vmem>>, %arg2: memref<2x128xf32, #tpu.memory_space<vmem>>, %arg3: memref<512x128xbf16, #tpu.memory_space<vmem>>) attributes {dimension_semantics = [#tpu.dimension_semantics<parallel>], iteration_bounds = array<i64: 1>, scalar_prefetch = 0 : i64, scratch_operands = 0 : i64, tpu.core_type = #tpu.core_type<tc>, window_params = [{transform_indices = @transform_0, window_bounds = array<i64: 512, 128>}, {pipeline_mode = #tpu.pipeline_mode<synchronous>, transform_indices = @transform_1, window_bounds = array<i64: 2, 128>}, {transform_indices = @transform_2, window_bounds = array<i64: 512, 128>}]} {
    %c0 = arith.constant 0 : index
    %c0_0 = arith.constant 0 : index
    %0 = vector.load %arg2[%c0, %c0_0] : memref<2x128xf32, #tpu.memory_space<vmem>>, vector<1x128xf32>
    %c1 = arith.constant 1 : index
    %c0_1 = arith.constant 0 : index
    %1 = vector.load %arg2[%c1, %c0_1] : memref<2x128xf32, #tpu.memory_space<vmem>>, vector<1x128xf32>
    %c0_2 = arith.constant 0 : index
    %c0_3 = arith.constant 0 : index
    %2 = vector.load %arg1[%c0_2, %c0_3] : memref<512x128xbf16, #tpu.memory_space<vmem>>, vector<512x128xbf16>
    %3 = arith.extf %2 : vector<512x128xbf16> to vector<512x128xf32>
    %4 = vector.broadcast %0 : vector<1x128xf32> to vector<512x128xf32>
    %5 = arith.mulf %3, %4 : vector<512x128xf32>
    %6 = vector.broadcast %1 : vector<1x128xf32> to vector<512x128xf32>
    %7 = arith.addf %5, %6 : vector<512x128xf32>
    %cst = arith.constant 0.000000e+00 : f32
    %8 = vector.broadcast %cst : f32 to vector<512x128xf32>
    %9 = arith.maximumf %7, %8 : vector<512x128xf32>
    %10 = arith.truncf %9 : vector<512x128xf32> to vector<512x128xbf16>
    %c0_4 = arith.constant 0 : index
    %c0_5 = arith.constant 0 : index
    %11 = vector.load %arg3[%c0_4, %c0_5] : memref<512x128xbf16, #tpu.memory_space<vmem>>, vector<512x128xbf16>
    tpu.vector_store %arg3[%c0_4, %c0_5], %10 {strides = array<i32>} : memref<512x128xbf16, #tpu.memory_space<vmem>>, vector<512x128xbf16>,
    return
  }
  func.func @transform_0(%arg0: i32) -> (i32, i32) {
    %c0_i32 = arith.constant 0 : i32
    %c0_i32_0 = arith.constant 0 : i32
    return %arg0, %c0_i32 : i32, i32
  }
  func.func @transform_1(%arg0: i32) -> (i32, i32) {
    %c0_i32 = arith.constant 0 : i32
    %c0_i32_0 = arith.constant 0 : i32
    %c0_i32_1 = arith.constant 0 : i32
    return %c0_i32, %c0_i32_0 : i32, i32
  }
  func.func @transform_2(%arg0: i32) -> (i32, i32) {
    %c0_i32 = arith.constant 0 : i32
    %c0_i32_0 = arith.constant 0 : i32
    return %arg0, %c0_i32 : i32, i32
  }
}

module attributes {stable_mosaic.version = 11 : i64} {
  func.func @_conv_stats_kernel(%arg0: i32, %arg1: memref<1x288x384xbf16, #tpu.memory_space<vmem>>, %arg2: memref<3x384x128xbf16, #tpu.memory_space<vmem>>, %arg3: memref<1x256x128xbf16, #tpu.memory_space<vmem>>, %arg4: memref<1x2x128xf32, #tpu.memory_space<vmem>>) attributes {dimension_semantics = [#tpu.dimension_semantics<parallel>], iteration_bounds = array<i64: 2>, scalar_prefetch = 0 : i64, scratch_operands = 0 : i64, tpu.core_type = #tpu.core_type<tc>, window_params = [{transform_indices = @transform_0, window_bounds = array<i64: 1, 288, 384>}, {pipeline_mode = #tpu.pipeline_mode<synchronous>, transform_indices = @transform_1, window_bounds = array<i64: 3, 384, 128>}, {transform_indices = @transform_2, window_bounds = array<i64: 1, 256, 128>}, {transform_indices = @transform_3, window_bounds = array<i64: 1, 2, 128>}]} {
    %c0 = arith.constant 0 : index
    %c0_0 = arith.constant 0 : index
    %c0_1 = arith.constant 0 : index
    %0 = vector.load %arg1[%c0, %c0_0, %c0_1] : memref<1x288x384xbf16, #tpu.memory_space<vmem>>, vector<1x256x384xbf16>
    %1 = vector.shape_cast %0 : vector<1x256x384xbf16> to vector<256x384xbf16>
    %c0_2 = arith.constant 0 : index
    %c0_3 = arith.constant 0 : index
    %c0_4 = arith.constant 0 : index
    %2 = vector.load %arg2[%c0_2, %c0_3, %c0_4] : memref<3x384x128xbf16, #tpu.memory_space<vmem>>, vector<1x384x128xbf16>
    %3 = vector.shape_cast %2 : vector<1x384x128xbf16> to vector<384x128xbf16>
    %cst = arith.constant dense<0.000000e+00> : vector<256x128xf32>
    %4 = tpu.matmul %1, %3, %cst {dimension_numbers = #tpu.dot_dimension_numbers<[1], [0], [0], [1], [0, 0, 1, 1], [], []>} : vector<256x384xbf16>, vector<384x128xbf16>, vector<256x128xf32> -> vector<256x128xf32>
    %c0_5 = arith.constant 0 : index
    %c16 = arith.constant 16 : index
    %c0_6 = arith.constant 0 : index
    %5 = vector.load %arg1[%c0_5, %c16, %c0_6] : memref<1x288x384xbf16, #tpu.memory_space<vmem>>, vector<1x256x384xbf16>
    %6 = vector.shape_cast %5 : vector<1x256x384xbf16> to vector<256x384xbf16>
    %c1 = arith.constant 1 : index
    %c0_7 = arith.constant 0 : index
    %c0_8 = arith.constant 0 : index
    %7 = vector.load %arg2[%c1, %c0_7, %c0_8] : memref<3x384x128xbf16, #tpu.memory_space<vmem>>, vector<1x384x128xbf16>
    %8 = vector.shape_cast %7 : vector<1x384x128xbf16> to vector<384x128xbf16>
    %cst_9 = arith.constant dense<0.000000e+00> : vector<256x128xf32>
    %9 = tpu.matmul %6, %8, %cst_9 {dimension_numbers = #tpu.dot_dimension_numbers<[1], [0], [0], [1], [0, 0, 1, 1], [], []>} : vector<256x384xbf16>, vector<384x128xbf16>, vector<256x128xf32> -> vector<256x128xf32>
    %10 = arith.addf %4, %9 : vector<256x128xf32>
    %c0_10 = arith.constant 0 : index
    %c32 = arith.constant 32 : index
    %c0_11 = arith.constant 0 : index
    %11 = vector.load %arg1[%c0_10, %c32, %c0_11] : memref<1x288x384xbf16, #tpu.memory_space<vmem>>, vector<1x256x384xbf16>
    %12 = vector.shape_cast %11 : vector<1x256x384xbf16> to vector<256x384xbf16>
    %c2 = arith.constant 2 : index
    %c0_12 = arith.constant 0 : index
    %c0_13 = arith.constant 0 : index
    %13 = vector.load %arg2[%c2, %c0_12, %c0_13] : memref<3x384x128xbf16, #tpu.memory_space<vmem>>, vector<1x384x128xbf16>
    %14 = vector.shape_cast %13 : vector<1x384x128xbf16> to vector<384x128xbf16>
    %cst_14 = arith.constant dense<0.000000e+00> : vector<256x128xf32>
    %15 = tpu.matmul %12, %14, %cst_14 {dimension_numbers = #tpu.dot_dimension_numbers<[1], [0], [0], [1], [0, 0, 1, 1], [], []>} : vector<256x384xbf16>, vector<384x128xbf16>, vector<256x128xf32> -> vector<256x128xf32>
    %16 = arith.addf %10, %15 : vector<256x128xf32>
    %17 = arith.truncf %16 : vector<256x128xf32> to vector<256x128xbf16>
    %c0_15 = arith.constant 0 : index
    %c0_16 = arith.constant 0 : index
    %c0_17 = arith.constant 0 : index
    %18 = vector.load %arg3[%c0_15, %c0_16, %c0_17] : memref<1x256x128xbf16, #tpu.memory_space<vmem>>, vector<1x256x128xbf16>
    %19 = vector.shape_cast %18 : vector<1x256x128xbf16> to vector<256x128xbf16>
    %20 = vector.shape_cast %17 : vector<256x128xbf16> to vector<1x256x128xbf16>
    tpu.vector_store %arg3[%c0_15, %c0_16, %c0_17], %20 {strides = array<i32>} : memref<1x256x128xbf16, #tpu.memory_space<vmem>>, vector<1x256x128xbf16>,
    %cst_18 = arith.constant dense<0.000000e+00> : vector<128xf32>
    %21 = vector.multi_reduction <add>, %16, %cst_18 [0] : vector<256x128xf32> to vector<128xf32>
    %22 = vector.shape_cast %21 : vector<128xf32> to vector<1x128xf32>
    %23 = arith.mulf %16, %16 : vector<256x128xf32>
    %cst_19 = arith.constant dense<0.000000e+00> : vector<128xf32>
    %24 = vector.multi_reduction <add>, %23, %cst_19 [0] : vector<256x128xf32> to vector<128xf32>
    %25 = vector.shape_cast %24 : vector<128xf32> to vector<1x128xf32>
    %26 = tpu.concatenate %22, %25 in 0 : vector<1x128xf32>, vector<1x128xf32> -> vector<2x128xf32>
    %c0_20 = arith.constant 0 : index
    %c0_21 = arith.constant 0 : index
    %c0_22 = arith.constant 0 : index
    %27 = vector.load %arg4[%c0_20, %c0_21, %c0_22] : memref<1x2x128xf32, #tpu.memory_space<vmem>>, vector<1x2x128xf32>
    %28 = vector.shape_cast %27 : vector<1x2x128xf32> to vector<2x128xf32>
    %29 = vector.shape_cast %26 : vector<2x128xf32> to vector<1x2x128xf32>
    tpu.vector_store %arg4[%c0_20, %c0_21, %c0_22], %29 {strides = array<i32>} : memref<1x2x128xf32, #tpu.memory_space<vmem>>, vector<1x2x128xf32>,
    return
  }
  func.func @transform_0(%arg0: i32) -> (i32, i32, i32) {
    %c0_i32 = arith.constant 0 : i32
    %c0_i32_0 = arith.constant 0 : i32
    %c0_i32_1 = arith.constant 0 : i32
    return %arg0, %c0_i32, %c0_i32_0 : i32, i32, i32
  }
  func.func @transform_1(%arg0: i32) -> (i32, i32, i32) {
    %c0_i32 = arith.constant 0 : i32
    %c0_i32_0 = arith.constant 0 : i32
    %c0_i32_1 = arith.constant 0 : i32
    %c0_i32_2 = arith.constant 0 : i32
    return %c0_i32, %c0_i32_0, %c0_i32_1 : i32, i32, i32
  }
  func.func @transform_2(%arg0: i32) -> (i32, i32, i32) {
    %c0_i32 = arith.constant 0 : i32
    %c0_i32_0 = arith.constant 0 : i32
    %c0_i32_1 = arith.constant 0 : i32
    return %arg0, %c0_i32, %c0_i32_0 : i32, i32, i32
  }
  func.func @transform_3(%arg0: i32) -> (i32, i32, i32) {
    %c0_i32 = arith.constant 0 : i32
    %c0_i32_0 = arith.constant 0 : i32
    %c0_i32_1 = arith.constant 0 : i32
    return %arg0, %c0_i32, %c0_i32_0 : i32, i32, i32
  }
}

module attributes {stable_mosaic.version = 11 : i64} {
  func.func @_bn_apply_kernel(%arg0: i32, %arg1: memref<512x128xbf16, #tpu.memory_space<vmem>>, %arg2: memref<2x128xf32, #tpu.memory_space<vmem>>, %arg3: memref<512x128xf32, #tpu.memory_space<vmem>>, %arg4: memref<512x128xf32, #tpu.memory_space<vmem>>) attributes {dimension_semantics = [#tpu.dimension_semantics<parallel>], iteration_bounds = array<i64: 1>, scalar_prefetch = 0 : i64, scratch_operands = 0 : i64, tpu.core_type = #tpu.core_type<tc>, window_params = [{transform_indices = @transform_0, window_bounds = array<i64: 512, 128>}, {pipeline_mode = #tpu.pipeline_mode<synchronous>, transform_indices = @transform_1, window_bounds = array<i64: 2, 128>}, {transform_indices = @transform_2, window_bounds = array<i64: 512, 128>}, {transform_indices = @transform_3, window_bounds = array<i64: 512, 128>}]} {
    %c0 = arith.constant 0 : index
    %c0_0 = arith.constant 0 : index
    %0 = vector.load %arg2[%c0, %c0_0] : memref<2x128xf32, #tpu.memory_space<vmem>>, vector<1x128xf32>
    %c1 = arith.constant 1 : index
    %c0_1 = arith.constant 0 : index
    %1 = vector.load %arg2[%c1, %c0_1] : memref<2x128xf32, #tpu.memory_space<vmem>>, vector<1x128xf32>
    %c0_2 = arith.constant 0 : index
    %c0_3 = arith.constant 0 : index
    %2 = vector.load %arg1[%c0_2, %c0_3] : memref<512x128xbf16, #tpu.memory_space<vmem>>, vector<512x128xbf16>
    %3 = arith.extf %2 : vector<512x128xbf16> to vector<512x128xf32>
    %4 = vector.broadcast %0 : vector<1x128xf32> to vector<512x128xf32>
    %5 = arith.mulf %3, %4 : vector<512x128xf32>
    %6 = vector.broadcast %1 : vector<1x128xf32> to vector<512x128xf32>
    %7 = arith.addf %5, %6 : vector<512x128xf32>
    %c0_4 = arith.constant 0 : index
    %c0_5 = arith.constant 0 : index
    %8 = vector.load %arg3[%c0_4, %c0_5] : memref<512x128xf32, #tpu.memory_space<vmem>>, vector<512x128xf32>
    %9 = arith.addf %7, %8 : vector<512x128xf32>
    %cst = arith.constant 0.000000e+00 : f32
    %10 = vector.broadcast %cst : f32 to vector<512x128xf32>
    %11 = arith.maximumf %9, %10 : vector<512x128xf32>
    %c0_6 = arith.constant 0 : index
    %c0_7 = arith.constant 0 : index
    %12 = vector.load %arg4[%c0_6, %c0_7] : memref<512x128xf32, #tpu.memory_space<vmem>>, vector<512x128xf32>
    tpu.vector_store %arg4[%c0_6, %c0_7], %11 {strides = array<i32>} : memref<512x128xf32, #tpu.memory_space<vmem>>, vector<512x128xf32>,
    return
  }
  func.func @transform_0(%arg0: i32) -> (i32, i32) {
    %c0_i32 = arith.constant 0 : i32
    %c0_i32_0 = arith.constant 0 : i32
    return %arg0, %c0_i32 : i32, i32
  }
  func.func @transform_1(%arg0: i32) -> (i32, i32) {
    %c0_i32 = arith.constant 0 : i32
    %c0_i32_0 = arith.constant 0 : i32
    %c0_i32_1 = arith.constant 0 : i32
    return %c0_i32, %c0_i32_0 : i32, i32
  }
  func.func @transform_2(%arg0: i32) -> (i32, i32) {
    %c0_i32 = arith.constant 0 : i32
    %c0_i32_0 = arith.constant 0 : i32
    return %arg0, %c0_i32 : i32, i32
  }
  func.func @transform_3(%arg0: i32) -> (i32, i32) {
    %c0_i32 = arith.constant 0 : i32
    %c0_i32_0 = arith.constant 0 : i32
    return %arg0, %c0_i32 : i32, i32
  }
}

</mosaic_0001>

<bundles_post_ra>
// kernel: basic_block_forward.7
= control target key start
LH: loop header
LB: loop body
LE: loop exit
PB: predicated region body
PF: predicated region fallthrough
CT: control target
= control target key end

     0   :  { %s1339_s0 = inlined_call_operand.vmem [shape: bf16[512,128], index: 0, kind: input, shape index: {}]   ;;  %s1340_s1 = inlined_call_operand.vmem [shape: f32[2,128], index: 1, kind: input, shape index: {}]   ;;  %s1341_s2 = inlined_call_operand.vmem [shape: f32[512,128], index: 2, kind: input, shape index: {}]   ;;  %s1342_s3 = inlined_call_operand.vmem [shape: f32[512,128], index: 3, kind: output, shape index: {}]  }
   0x1   :  { %v724_v0 = vld [vmem:[%s1340_s1] ss:$0 sm:$0xff]  ;;  %v670_v4 = vld [vmem:[%s1339_s0 + $0x8] sm:$0xff]   ;;  %v735_v5 = vld [vmem:[%s1340_s1 + $0x1] ss:$0 sm:$0xff] }
   0x2   :  { %v543_v1 = vld [vmem:[%s1339_s0] sm:$0xff]   ;;  %v548_v6 = vunpack.c.l.bf16 %v670_v4  ;;  %v549_v7 = vunpack.c.h.bf16 %v670_v4  ;;  %v671_v8 = vld [vmem:[%s1339_s0 + $0x10] sm:$0xff]   ;;  %v672_v13 = vld [vmem:[%s1339_s0 + $0x18] sm:$0xff]  }
   0x3   :  { %v544_v2 = vunpack.c.l.bf16 %v543_v1  ;;  %v545_v3 = vunpack.c.h.bf16 %v543_v1  ;;  %v552_v11 = vunpack.c.l.bf16 %v671_v8  ;;  %v553_v12 = vunpack.c.h.bf16 %v671_v8  ;;  %v280_v14 = vld [vmem:[%s1341_s2] sm:$0xff]  ;;  %v281_v15 = vld [vmem:[%s1341_s2 + $0x8] sm:$0xff]  ;;  %v282_v22 = vld [vmem:[%s1341_s2 + $0x10] sm:$0xff] }
   0x4   :  { %v150_v16 = vmul.f32 %v548_v6, %v724_v0  ;;  %v151_v17 = vmul.f32 %v549_v7, %v724_v0  ;;  %v556_v18 = vunpack.c.l.bf16 %v672_v13  ;;  %v557_v19 = vunpack.c.h.bf16 %v672_v13  ;;  %v283_v23 = vld [vmem:[%s1341_s2 + $0x18] sm:$0xff]  ;;  %v284_v28 = vld [vmem:[%s1341_s2 + $0x20] sm:$0xff]  ;;  %v285_v29 = vld [vmem:[%s1341_s2 + $0x28] sm:$0xff] }
   0x5   :  { %v148_v9 = vmul.f32 %v544_v2, %v724_v0  ;;  %v149_v10 = vmul.f32 %v545_v3, %v724_v0  ;;  %v152_v24 = vmul.f32 %v552_v11, %v724_v0  ;;  %v153_v25 = vmul.f32 %v553_v12, %v724_v0  ;;  %v286_v36 = vld [vmem:[%s1341_s2 + $0x30] sm:$0xff]  ;;  %v287_v37 = vld [vmem:[%s1341_s2 + $0x38] sm:$0xff]  ;;  %v673_v42 = vld [vmem:[%s1339_s0 + $0x20] sm:$0xff]  }
   0x6   :  { %v218_v26 = vadd.f32 %v735_v5, %v150_v16  ;;  %v219_v27 = vadd.f32 %v735_v5, %v151_v17  ;;  %v154_v30 = vmul.f32 %v556_v18, %v724_v0  ;;  %v155_v31 = vmul.f32 %v557_v19, %v724_v0  ;;  %v674_v47 = vld [vmem:[%s1339_s0 + $0x28] sm:$0xff]   ;;  %v675_v52 = vld [vmem:[%s1339_s0 + $0x30] sm:$0xff]   ;;  %v676_v57 = vld [vmem:[%s1339_s0 + $0x38] sm:$0xff]  }
   0x7   :  { %v216_v20 = vadd.f32 %v735_v5, %v148_v9  ;;  %v217_v21 = vadd.f32 %v735_v5, %v149_v10  ;;  %v220_v34 = vadd.f32 %v735_v5, %v152_v24  ;;  %v221_v35 = vadd.f32 %v735_v5, %v153_v25  ;;  %v288_v3 = vld [vmem:[%s1341_s2 + $0x40] sm:$0xff]  ;;  %v289_v4 = vld [vmem:[%s1341_s2 + $0x48] sm:$0xff]  ;;  %v290_v12 = vld [vmem:[%s1341_s2 + $0x50] sm:$0xff] }
   0x8   :  { %v346_v38 = vadd.f32 %v282_v22, %v218_v26  ;;  %v347_v39 = vadd.f32 %v283_v23, %v219_v27  ;;  %v222_v40 = vadd.f32 %v735_v5, %v154_v30  ;;  %v223_v41 = vadd.f32 %v735_v5, %v155_v31  ;;  %v291_v13 = vld [vmem:[%s1341_s2 + $0x58] sm:$0xff]  ;;  %v292_v18 = vld [vmem:[%s1341_s2 + $0x60] sm:$0xff]  ;;  %v293_v19 = vld [vmem:[%s1341_s2 + $0x68] sm:$0xff] }
   0x9   :  { %v344_v32 = vadd.f32 %v280_v14, %v216_v20  ;;  %v345_v33 = vadd.f32 %v281_v15, %v217_v21  ;;  %v348_v45 = vadd.f32 %v284_v28, %v220_v34  ;;  %v349_v46 = vadd.f32 %v285_v29, %v221_v35  ;;  %v294_v26 = vld [vmem:[%s1341_s2 + $0x70] sm:$0xff]  ;;  %v295_v27 = vld [vmem:[%s1341_s2 + $0x78] sm:$0xff] }
   0xa   :  { %v410_v48 = vmax.f32 %v346_v38, 0.0  ;;  %v411_v49 = vmax.f32 %v347_v39, 0.0  ;;  %v350_v50 = vadd.f32 %v286_v36, %v222_v40  ;;  %v351_v51 = vadd.f32 %v287_v37, %v223_v41  ;;  %v678_v37 = vld [vmem:[%s1339_s0 + $0x48] sm:$0xff]  }
   0xb   :  { %v408_v43 = vmax.f32 %v344_v32, 0.0  ;;  %v409_v44 = vmax.f32 %v345_v33, 0.0  ;;  %v412_v53 = vmax.f32 %v348_v45, 0.0  ;;  %v413_v54 = vmax.f32 %v349_v46, 0.0  ;;  %v677_v32 = vld [vmem:[%s1339_s0 + $0x40] sm:$0xff]  }
   0xc   :  { %v560_v55 = vunpack.c.l.bf16 %v673_v42  ;;  %v561_v56 = vunpack.c.h.bf16 %v673_v42  ;;  %474 = vst [vmem:[%s1342_s3 + $0x10] sm:$0xff] %v410_v48  ;;  %475 = vst [vmem:[%s1342_s3 + $0x18] sm:$0xff] %v411_v49  ;;  %v414_v58 = vmax.f32 %v350_v50, 0.0  ;;  %v415_v59 = vmax.f32 %v351_v51, 0.0  ;;  %v679_v42 = vld [vmem:[%s1339_s0 + $0x50] sm:$0xff]  }
   0xd   :  { %472 = vst [vmem:[%s1342_s3] sm:$0xff] %v408_v43  ;;  %473 = vst [vmem:[%s1342_s3 + $0x8] sm:$0xff] %v409_v44  ;;  %v564_v60 = vunpack.c.l.bf16 %v674_v47  ;;  %v565_v61 = vunpack.c.h.bf16 %v674_v47  ;;  %v568_v1 = vunpack.c.l.bf16 %v675_v52  ;;  %v569_v2 = vunpack.c.h.bf16 %v675_v52  ;;  %v680_v47 = vld [vmem:[%s1339_s0 + $0x58] sm:$0xff]  }
   0xe   :  { %476 = vst [vmem:[%s1342_s3 + $0x20] sm:$0xff] %v412_v53  ;;  %477 = vst [vmem:[%s1342_s3 + $0x28] sm:$0xff] %v413_v54  ;;  %v156_v62 = vmul.f32 %v560_v55, %v724_v0  ;;  %v157_v63 = vmul.f32 %v561_v56, %v724_v0  ;;  %v572_v8 = vunpack.c.l.bf16 %v676_v57  ;;  %v573_v9 = vunpack.c.h.bf16 %v676_v57  ;;  %v296_v56 = vld [vmem:[%s1341_s2 + $0x80] sm:$0xff]  ;;  %v297_v57 = vld [vmem:[%s1341_s2 + $0x88] sm:$0xff] }
   0xf   :  { %478 = vst [vmem:[%s1342_s3 + $0x30] sm:$0xff] %v414_v58  ;;  %479 = vst [vmem:[%s1342_s3 + $0x38] sm:$0xff] %v415_v59  ;;  %v158_v6 = vmul.f32 %v564_v60, %v724_v0  ;;  %v159_v7 = vmul.f32 %v565_v61, %v724_v0  ;;  %v160_v14 = vmul.f32 %v568_v1, %v724_v0  ;;  %v576_v45 = vunpack.c.l.bf16 %v677_v32  ;;  %v298_v1 = vld [vmem:[%s1341_s2 + $0x90] sm:$0xff] }
  0x10   :  { %v224_v10 = vadd.f32 %v735_v5, %v156_v62  ;;  %v225_v11 = vadd.f32 %v735_v5, %v157_v63  ;;  %v161_v15 = vmul.f32 %v569_v2, %v724_v0  ;;  %v162_v20 = vmul.f32 %v572_v8, %v724_v0  ;;  %v299_v2 = vld [vmem:[%s1341_s2 + $0x98] sm:$0xff]  ;;  %v300_v8 = vld [vmem:[%s1341_s2 + $0xa0] sm:$0xff] }
  0x11   :  { %v226_v16 = vadd.f32 %v735_v5, %v158_v6  ;;  %v227_v17 = vadd.f32 %v735_v5, %v159_v7  ;;  %v163_v21 = vmul.f32 %v573_v9, %v724_v0  ;;  %v228_v24 = vadd.f32 %v735_v5, %v160_v14  ;;  %v301_v9 = vld [vmem:[%s1341_s2 + $0xa8] sm:$0xff] }
  0x12   :  { %v352_v22 = vadd.f32 %v288_v3, %v224_v10  ;;  %v353_v23 = vadd.f32 %v289_v4, %v225_v11  ;;  %v229_v25 = vadd.f32 %v735_v5, %v161_v15  ;;  %v230_v30 = vadd.f32 %v735_v5, %v162_v20 }
  0x13   :  { %v354_v28 = vadd.f32 %v290_v12, %v226_v16  ;;  %v355_v29 = vadd.f32 %v291_v13, %v227_v17  ;;  %v231_v31 = vadd.f32 %v735_v5, %v163_v21  ;;  %v356_v35 = vadd.f32 %v292_v18, %v228_v24  ;;  %v302_v16 = vld [vmem:[%s1341_s2 + $0xb0] sm:$0xff]  ;;  %v303_v17 = vld [vmem:[%s1341_s2 + $0xb8] sm:$0xff] }
  0x14   :  { %v416_v33 = vmax.f32 %v352_v22, 0.0  ;;  %v417_v34 = vmax.f32 %v353_v23, 0.0  ;;  %v357_v36 = vadd.f32 %v293_v19, %v229_v25  ;;  %v358_v40 = vadd.f32 %v294_v26, %v230_v30  ;;  %v681_v22 = vld [vmem:[%s1339_s0 + $0x60] sm:$0xff]  }
  0x15   :  { %v418_v38 = vmax.f32 %v354_v28, 0.0  ;;  %v419_v39 = vmax.f32 %v355_v29, 0.0  ;;  %v359_v41 = vadd.f32 %v295_v27, %v231_v31  ;;  %v420_v43 = vmax.f32 %v356_v35, 0.0  ;;  %v682_v27 = vld [vmem:[%s1339_s0 + $0x68] sm:$0xff]  }
  0x16   :  { %480 = vst [vmem:[%s1342_s3 + $0x40] sm:$0xff] %v416_v33  ;;  %481 = vst [vmem:[%s1342_s3 + $0x48] sm:$0xff] %v417_v34  ;;  %v421_v44 = vmax.f32 %v357_v36, 0.0  ;;  %v577_v46 = vunpack.c.h.bf16 %v677_v32  ;;  %v422_v48 = vmax.f32 %v358_v40, 0.0  ;;  %v580_v50 = vunpack.c.l.bf16 %v678_v37  ;;  %v683_v32 = vld [vmem:[%s1339_s0 + $0x70] sm:$0xff]  }
  0x17   :  { %482 = vst [vmem:[%s1342_s3 + $0x50] sm:$0xff] %v418_v38  ;;  %483 = vst [vmem:[%s1342_s3 + $0x58] sm:$0xff] %v419_v39  ;;  %v423_v49 = vmax.f32 %v359_v41, 0.0  ;;  %v581_v51 = vunpack.c.h.bf16 %v678_v37  ;;  %v164_v52 = vmul.f32 %v576_v45, %v724_v0  ;;  %v584_v54 = vunpack.c.l.bf16 %v679_v42  ;;  %v684_v37 = vld [vmem:[%s1339_s0 + $0x78] sm:$0xff]  }
  0x18   :  { %484 = vst [vmem:[%s1342_s3 + $0x60] sm:$0xff] %v420_v43  ;;  %485 = vst [vmem:[%s1342_s3 + $0x68] sm:$0xff] %v421_v44  ;;  %v165_v53 = vmul.f32 %v577_v46, %v724_v0  ;;  %v585_v55 = vunpack.c.h.bf16 %v679_v42  ;;  %v166_v58 = vmul.f32 %v580_v50, %v724_v0  ;;  %v588_v60 = vunpack.c.l.bf16 %v680_v47  ;;  %v304_v46 = vld [vmem:[%s1341_s2 + $0xc0] sm:$0xff] }
  0x19   :  { %486 = vst [vmem:[%s1342_s3 + $0x70] sm:$0xff] %v422_v48  ;;  %487 = vst [vmem:[%s1342_s3 + $0x78] sm:$0xff] %v423_v49  ;;  %v167_v59 = vmul.f32 %v581_v51, %v724_v0  ;;  %v589_v61 = vunpack.c.h.bf16 %v680_v47  ;;  %v232_v62 = vadd.f32 %v735_v5, %v164_v52  ;;  %v168_v3 = vmul.f32 %v584_v54, %v724_v0  ;;  %v305_v47 = vld [vmem:[%s1341_s2 + $0xc8] sm:$0xff]  ;;  %v306_v54 = vld [vmem:[%s1341_s2 + $0xd0] sm:$0xff] }
  0x1a   :  { %v233_v63 = vadd.f32 %v735_v5, %v165_v53  ;;  %v169_v4 = vmul.f32 %v585_v55, %v724_v0  ;;  %v234_v6 = vadd.f32 %v735_v5, %v166_v58  ;;  %v170_v10 = vmul.f32 %v588_v60, %v724_v0  ;;  %v307_v55 = vld [vmem:[%s1341_s2 + $0xd8] sm:$0xff]  ;;  %v308_v60 = vld [vmem:[%s1341_s2 + $0xe0] sm:$0xff] }
  0x1b   :  { %v235_v7 = vadd.f32 %v735_v5, %v167_v59  ;;  %v171_v11 = vmul.f32 %v589_v61, %v724_v0  ;;  %v360_v12 = vadd.f32 %v296_v56, %v232_v62  ;;  %v236_v14 = vadd.f32 %v735_v5, %v168_v3  ;;  %v309_v61 = vld [vmem:[%s1341_s2 + $0xe8] sm:$0xff] }
  0x1c   :  { %v361_v13 = vadd.f32 %v297_v57, %v233_v63  ;;  %v237_v15 = vadd.f32 %v735_v5, %v169_v4  ;;  %v362_v18 = vadd.f32 %v298_v1, %v234_v6  ;;  %v238_v20 = vadd.f32 %v735_v5, %v170_v10  ;;  %v310_v6 = vld [vmem:[%s1341_s2 + $0xf0] sm:$0xff] }
  0x1d   :  { %v363_v19 = vadd.f32 %v299_v2, %v235_v7  ;;  %v239_v21 = vadd.f32 %v735_v5, %v171_v11  ;;  %v424_v23 = vmax.f32 %v360_v12, 0.0  ;;  %v364_v25 = vadd.f32 %v300_v8, %v236_v14  ;;  %v311_v7 = vld [vmem:[%s1341_s2 + $0xf8] sm:$0xff]  ;;  %v685_v12 = vld [vmem:[%s1339_s0 + $0x80] sm:$0xff]  }
  0x1e   :  { %v425_v24 = vmax.f32 %v361_v13, 0.0  ;;  %v365_v26 = vadd.f32 %v301_v9, %v237_v15  ;;  %v426_v28 = vmax.f32 %v362_v18, 0.0  ;;  %v366_v30 = vadd.f32 %v302_v16, %v238_v20 }
  0x1f   :  { %v427_v29 = vmax.f32 %v363_v19, 0.0  ;;  %v367_v31 = vadd.f32 %v303_v17, %v239_v21  ;;  %488 = vst [vmem:[%s1342_s3 + $0x80] sm:$0xff] %v424_v23  ;;  %v428_v33 = vmax.f32 %v364_v25, 0.0  ;;  %v592_v35 = vunpack.c.l.bf16 %v681_v22  ;;  %v686_v17 = vld [vmem:[%s1339_s0 + $0x88] sm:$0xff]  }
  0x20   :  { %489 = vst [vmem:[%s1342_s3 + $0x88] sm:$0xff] %v425_v24  ;;  %v429_v34 = vmax.f32 %v365_v26, 0.0  ;;  %v593_v36 = vunpack.c.h.bf16 %v681_v22  ;;  %490 = vst [vmem:[%s1342_s3 + $0x90] sm:$0xff] %v426_v28  ;;  %v430_v38 = vmax.f32 %v366_v30, 0.0  ;;  %v596_v40 = vunpack.c.l.bf16 %v682_v27  ;;  %v687_v22 = vld [vmem:[%s1339_s0 + $0x90] sm:$0xff]  }
  0x21   :  { %491 = vst [vmem:[%s1342_s3 + $0x98] sm:$0xff] %v427_v29  ;;  %v431_v39 = vmax.f32 %v367_v31, 0.0  ;;  %v597_v41 = vunpack.c.h.bf16 %v682_v27  ;;  %492 = vst [vmem:[%s1342_s3 + $0xa0] sm:$0xff] %v428_v33  ;;  %v172_v42 = vmul.f32 %v592_v35, %v724_v0  ;;  %v600_v44 = vunpack.c.l.bf16 %v683_v32  ;;  %v688_v27 = vld [vmem:[%s1339_s0 + $0x98] sm:$0xff]  }
  0x22   :  { %493 = vst [vmem:[%s1342_s3 + $0xa8] sm:$0xff] %v429_v34  ;;  %v173_v43 = vmul.f32 %v593_v36, %v724_v0  ;;  %v601_v45 = vunpack.c.h.bf16 %v683_v32  ;;  %494 = vst [vmem:[%s1342_s3 + $0xb0] sm:$0xff] %v430_v38  ;;  %v174_v48 = vmul.f32 %v596_v40, %v724_v0  ;;  %v604_v50 = vunpack.c.l.bf16 %v684_v37  ;;  %v312_v36 = vld [vmem:[%s1341_s2 + $0x100] sm:$0xff] }
  0x23   :  { %495 = vst [vmem:[%s1342_s3 + $0xb8] sm:$0xff] %v431_v39  ;;  %v175_v49 = vmul.f32 %v597_v41, %v724_v0  ;;  %v605_v51 = vunpack.c.h.bf16 %v684_v37  ;;  %v240_v52 = vadd.f32 %v735_v5, %v172_v42  ;;  %v176_v56 = vmul.f32 %v600_v44, %v724_v0  ;;  %v313_v37 = vld [vmem:[%s1341_s2 + $0x108] sm:$0xff]  ;;  %v314_v44 = vld [vmem:[%s1341_s2 + $0x110] sm:$0xff] }
  0x24   :  { %v241_v53 = vadd.f32 %v735_v5, %v173_v43  ;;  %v177_v57 = vmul.f32 %v601_v45, %v724_v0  ;;  %v242_v58 = vadd.f32 %v735_v5, %v174_v48  ;;  %v178_v62 = vmul.f32 %v604_v50, %v724_v0  ;;  %v315_v45 = vld [vmem:[%s1341_s2 + $0x118] sm:$0xff]  ;;  %v316_v50 = vld [vmem:[%s1341_s2 + $0x120] sm:$0xff] }
  0x25   :  { %v243_v59 = vadd.f32 %v735_v5, %v175_v49  ;;  %v179_v63 = vmul.f32 %v605_v51, %v724_v0  ;;  %v368_v1 = vadd.f32 %v304_v46, %v240_v52  ;;  %v244_v3 = vadd.f32 %v735_v5, %v176_v56  ;;  %v317_v51 = vld [vmem:[%s1341_s2 + $0x128] sm:$0xff] }
  0x26   :  { %v369_v2 = vadd.f32 %v305_v47, %v241_v53  ;;  %v245_v4 = vadd.f32 %v735_v5, %v177_v57  ;;  %v370_v8 = vadd.f32 %v306_v54, %v242_v58  ;;  %v246_v10 = vadd.f32 %v735_v5, %v178_v62  ;;  %v318_v58 = vld [vmem:[%s1341_s2 + $0x130] sm:$0xff] }
  0x27   :  { %v371_v9 = vadd.f32 %v307_v55, %v243_v59  ;;  %v247_v11 = vadd.f32 %v735_v5, %v179_v63  ;;  %v432_v13 = vmax.f32 %v368_v1, 0.0  ;;  %v372_v15 = vadd.f32 %v308_v60, %v244_v3  ;;  %v319_v59 = vld [vmem:[%s1341_s2 + $0x138] sm:$0xff]  ;;  %v689_v1 = vld [vmem:[%s1339_s0 + $0xa0] sm:$0xff]  }
  0x28   :  { %v433_v14 = vmax.f32 %v369_v2, 0.0  ;;  %v373_v16 = vadd.f32 %v309_v61, %v245_v4  ;;  %v434_v18 = vmax.f32 %v370_v8, 0.0  ;;  %v374_v20 = vadd.f32 %v310_v6, %v246_v10 }
  0x29   :  { %v435_v19 = vmax.f32 %v371_v9, 0.0  ;;  %v375_v21 = vadd.f32 %v311_v7, %v247_v11  ;;  %496 = vst [vmem:[%s1342_s3 + $0xc0] sm:$0xff] %v432_v13  ;;  %v436_v23 = vmax.f32 %v372_v15, 0.0  ;;  %v608_v25 = vunpack.c.l.bf16 %v685_v12  ;;  %v690_v7 = vld [vmem:[%s1339_s0 + $0xa8] sm:$0xff]  }
  0x2a   :  { %497 = vst [vmem:[%s1342_s3 + $0xc8] sm:$0xff] %v433_v14  ;;  %v437_v24 = vmax.f32 %v373_v16, 0.0  ;;  %v609_v26 = vunpack.c.h.bf16 %v685_v12  ;;  %498 = vst [vmem:[%s1342_s3 + $0xd0] sm:$0xff] %v434_v18  ;;  %v438_v28 = vmax.f32 %v374_v20, 0.0  ;;  %v612_v30 = vunpack.c.l.bf16 %v686_v17  ;;  %v691_v12 = vld [vmem:[%s1339_s0 + $0xb0] sm:$0xff]  }
  0x2b   :  { %499 = vst [vmem:[%s1342_s3 + $0xd8] sm:$0xff] %v435_v19  ;;  %v439_v29 = vmax.f32 %v375_v21, 0.0  ;;  %v613_v31 = vunpack.c.h.bf16 %v686_v17  ;;  %500 = vst [vmem:[%s1342_s3 + $0xe0] sm:$0xff] %v436_v23  ;;  %v180_v32 = vmul.f32 %v608_v25, %v724_v0  ;;  %v616_v34 = vunpack.c.l.bf16 %v687_v22  ;;  %v692_v17 = vld [vmem:[%s1339_s0 + $0xb8] sm:$0xff]  }
  0x2c   :  { %501 = vst [vmem:[%s1342_s3 + $0xe8] sm:$0xff] %v437_v24  ;;  %v181_v33 = vmul.f32 %v609_v26, %v724_v0  ;;  %v617_v35 = vunpack.c.h.bf16 %v687_v22  ;;  %502 = vst [vmem:[%s1342_s3 + $0xf0] sm:$0xff] %v438_v28  ;;  %v182_v38 = vmul.f32 %v612_v30, %v724_v0  ;;  %v620_v40 = vunpack.c.l.bf16 %v688_v27  ;;  %v320_v26 = vld [vmem:[%s1341_s2 + $0x140] sm:$0xff] }
  0x2d   :  { %503 = vst [vmem:[%s1342_s3 + $0xf8] sm:$0xff] %v439_v29  ;;  %v183_v39 = vmul.f32 %v613_v31, %v724_v0  ;;  %v621_v41 = vunpack.c.h.bf16 %v688_v27  ;;  %v248_v42 = vadd.f32 %v735_v5, %v180_v32  ;;  %v184_v46 = vmul.f32 %v616_v34, %v724_v0  ;;  %v321_v27 = vld [vmem:[%s1341_s2 + $0x148] sm:$0xff]  ;;  %v322_v34 = vld [vmem:[%s1341_s2 + $0x150] sm:$0xff] }
  0x2e   :  { %v249_v43 = vadd.f32 %v735_v5, %v181_v33  ;;  %v185_v47 = vmul.f32 %v617_v35, %v724_v0  ;;  %v250_v48 = vadd.f32 %v735_v5, %v182_v38  ;;  %v186_v52 = vmul.f32 %v620_v40, %v724_v0  ;;  %v323_v35 = vld [vmem:[%s1341_s2 + $0x158] sm:$0xff]  ;;  %v324_v40 = vld [vmem:[%s1341_s2 + $0x160] sm:$0xff] }
  0x2f   :  { %v251_v49 = vadd.f32 %v735_v5, %v183_v39  ;;  %v187_v53 = vmul.f32 %v621_v41, %v724_v0  ;;  %v376_v54 = vadd.f32 %v312_v36, %v248_v42  ;;  %v252_v56 = vadd.f32 %v735_v5, %v184_v46  ;;  %v325_v41 = vld [vmem:[%s1341_s2 + $0x168] sm:$0xff] }
  0x30   :  { %v377_v55 = vadd.f32 %v313_v37, %v249_v43  ;;  %v253_v57 = vadd.f32 %v735_v5, %v185_v47  ;;  %v378_v60 = vadd.f32 %v314_v44, %v250_v48  ;;  %v254_v62 = vadd.f32 %v735_v5, %v186_v52  ;;  %v326_v48 = vld [vmem:[%s1341_s2 + $0x170] sm:$0xff] }
  0x31   :  { %v379_v61 = vadd.f32 %v315_v45, %v251_v49  ;;  %v255_v63 = vadd.f32 %v735_v5, %v187_v53  ;;  %v440_v2 = vmax.f32 %v376_v54, 0.0  ;;  %v380_v4 = vadd.f32 %v316_v50, %v252_v56  ;;  %v327_v49 = vld [vmem:[%s1341_s2 + $0x178] sm:$0xff]  ;;  %v693_v54 = vld [vmem:[%s1339_s0 + $0xc0] sm:$0xff]  }
  0x32   :  { %v441_v3 = vmax.f32 %v377_v55, 0.0  ;;  %v381_v6 = vadd.f32 %v317_v51, %v253_v57  ;;  %v442_v8 = vmax.f32 %v378_v60, 0.0  ;;  %v382_v10 = vadd.f32 %v318_v58, %v254_v62 }
  0x33   :  { %v443_v9 = vmax.f32 %v379_v61, 0.0  ;;  %v383_v11 = vadd.f32 %v319_v59, %v255_v63  ;;  %504 = vst [vmem:[%s1342_s3 + $0x100] sm:$0xff] %v440_v2  ;;  %v444_v13 = vmax.f32 %v380_v4, 0.0  ;;  %v624_v15 = vunpack.c.l.bf16 %v689_v1  ;;  %v694_v59 = vld [vmem:[%s1339_s0 + $0xc8] sm:$0xff]  }
  0x34   :  { %505 = vst [vmem:[%s1342_s3 + $0x108] sm:$0xff] %v441_v3  ;;  %v445_v14 = vmax.f32 %v381_v6, 0.0  ;;  %v625_v16 = vunpack.c.h.bf16 %v689_v1  ;;  %506 = vst [vmem:[%s1342_s3 + $0x110] sm:$0xff] %v442_v8  ;;  %v446_v18 = vmax.f32 %v382_v10, 0.0  ;;  %v628_v20 = vunpack.c.l.bf16 %v690_v7  ;;  %v695_v1 = vld [vmem:[%s1339_s0 + $0xd0] sm:$0xff]  }
  0x35   :  { %507 = vst [vmem:[%s1342_s3 + $0x118] sm:$0xff] %v443_v9  ;;  %v447_v19 = vmax.f32 %v383_v11, 0.0  ;;  %v629_v21 = vunpack.c.h.bf16 %v690_v7  ;;  %508 = vst [vmem:[%s1342_s3 + $0x120] sm:$0xff] %v444_v13  ;;  %v188_v22 = vmul.f32 %v624_v15, %v724_v0  ;;  %v632_v24 = vunpack.c.l.bf16 %v691_v12  ;;  %v696_v7 = vld [vmem:[%s1339_s0 + $0xd8] sm:$0xff]  }
  0x36   :  { %509 = vst [vmem:[%s1342_s3 + $0x128] sm:$0xff] %v445_v14  ;;  %v189_v23 = vmul.f32 %v625_v16, %v724_v0  ;;  %v633_v25 = vunpack.c.h.bf16 %v691_v12  ;;  %510 = vst [vmem:[%s1342_s3 + $0x130] sm:$0xff] %v446_v18  ;;  %v190_v28 = vmul.f32 %v628_v20, %v724_v0  ;;  %v636_v30 = vunpack.c.l.bf16 %v692_v17  ;;  %v328_v16 = vld [vmem:[%s1341_s2 + $0x180] sm:$0xff] }
  0x37   :  { %511 = vst [vmem:[%s1342_s3 + $0x138] sm:$0xff] %v447_v19  ;;  %v191_v29 = vmul.f32 %v629_v21, %v724_v0  ;;  %v637_v31 = vunpack.c.h.bf16 %v692_v17  ;;  %v256_v32 = vadd.f32 %v735_v5, %v188_v22  ;;  %v192_v36 = vmul.f32 %v632_v24, %v724_v0  ;;  %v329_v17 = vld [vmem:[%s1341_s2 + $0x188] sm:$0xff]  ;;  %v330_v24 = vld [vmem:[%s1341_s2 + $0x190] sm:$0xff] }
  0x38   :  { %v257_v33 = vadd.f32 %v735_v5, %v189_v23  ;;  %v193_v37 = vmul.f32 %v633_v25, %v724_v0  ;;  %v258_v38 = vadd.f32 %v735_v5, %v190_v28  ;;  %v194_v42 = vmul.f32 %v636_v30, %v724_v0  ;;  %v331_v25 = vld [vmem:[%s1341_s2 + $0x198] sm:$0xff]  ;;  %v332_v30 = vld [vmem:[%s1341_s2 + $0x1a0] sm:$0xff] }
  0x39   :  { %v259_v39 = vadd.f32 %v735_v5, %v191_v29  ;;  %v195_v43 = vmul.f32 %v637_v31, %v724_v0  ;;  %v384_v44 = vadd.f32 %v320_v26, %v256_v32  ;;  %v260_v46 = vadd.f32 %v735_v5, %v192_v36  ;;  %v333_v31 = vld [vmem:[%s1341_s2 + $0x1a8] sm:$0xff] }
  0x3a   :  { %v385_v45 = vadd.f32 %v321_v27, %v257_v33  ;;  %v261_v47 = vadd.f32 %v735_v5, %v193_v37  ;;  %v386_v50 = vadd.f32 %v322_v34, %v258_v38  ;;  %v262_v52 = vadd.f32 %v735_v5, %v194_v42  ;;  %v334_v38 = vld [vmem:[%s1341_s2 + $0x1b0] sm:$0xff] }
  0x3b   :  { %v387_v51 = vadd.f32 %v323_v35, %v259_v39  ;;  %v263_v53 = vadd.f32 %v735_v5, %v195_v43  ;;  %v448_v55 = vmax.f32 %v384_v44, 0.0  ;;  %v388_v57 = vadd.f32 %v324_v40, %v260_v46  ;;  %v335_v39 = vld [vmem:[%s1341_s2 + $0x1b8] sm:$0xff]  ;;  %v697_v44 = vld [vmem:[%s1339_s0 + $0xe0] sm:$0xff]  }
  0x3c   :  { %v449_v56 = vmax.f32 %v385_v45, 0.0  ;;  %v389_v58 = vadd.f32 %v325_v41, %v261_v47  ;;  %v450_v60 = vmax.f32 %v386_v50, 0.0  ;;  %v390_v62 = vadd.f32 %v326_v48, %v262_v52 }
  0x3d   :  { %v451_v61 = vmax.f32 %v387_v51, 0.0  ;;  %v391_v63 = vadd.f32 %v327_v49, %v263_v53  ;;  %512 = vst [vmem:[%s1342_s3 + $0x140] sm:$0xff] %v448_v55  ;;  %v452_v2 = vmax.f32 %v388_v57, 0.0  ;;  %v640_v4 = vunpack.c.l.bf16 %v693_v54  ;;  %v698_v49 = vld [vmem:[%s1339_s0 + $0xe8] sm:$0xff]  }
  0x3e   :  { %513 = vst [vmem:[%s1342_s3 + $0x148] sm:$0xff] %v449_v56  ;;  %v453_v3 = vmax.f32 %v389_v58, 0.0  ;;  %v641_v6 = vunpack.c.h.bf16 %v693_v54  ;;  %514 = vst [vmem:[%s1342_s3 + $0x150] sm:$0xff] %v450_v60  ;;  %v454_v8 = vmax.f32 %v390_v62, 0.0  ;;  %v644_v10 = vunpack.c.l.bf16 %v694_v59  ;;  %v699_v54 = vld [vmem:[%s1339_s0 + $0xf0] sm:$0xff]  }
  0x3f   :  { %515 = vst [vmem:[%s1342_s3 + $0x158] sm:$0xff] %v451_v61  ;;  %v455_v9 = vmax.f32 %v391_v63, 0.0  ;;  %v645_v11 = vunpack.c.h.bf16 %v694_v59  ;;  %516 = vst [vmem:[%s1342_s3 + $0x160] sm:$0xff] %v452_v2  ;;  %v196_v12 = vmul.f32 %v640_v4, %v724_v0  ;;  %v648_v14 = vunpack.c.l.bf16 %v695_v1  ;;  %v700_v59 = vld [vmem:[%s1339_s0 + $0xf8] sm:$0xff]  }
  0x40   :  { %517 = vst [vmem:[%s1342_s3 + $0x168] sm:$0xff] %v453_v3  ;;  %v197_v13 = vmul.f32 %v641_v6, %v724_v0  ;;  %v649_v15 = vunpack.c.h.bf16 %v695_v1  ;;  %518 = vst [vmem:[%s1342_s3 + $0x170] sm:$0xff] %v454_v8  ;;  %v198_v18 = vmul.f32 %v644_v10, %v724_v0  ;;  %v652_v20 = vunpack.c.l.bf16 %v696_v7  ;;  %v336_v6 = vld [vmem:[%s1341_s2 + $0x1c0] sm:$0xff] }
  0x41   :  { %519 = vst [vmem:[%s1342_s3 + $0x178] sm:$0xff] %v455_v9  ;;  %v199_v19 = vmul.f32 %v645_v11, %v724_v0  ;;  %v653_v21 = vunpack.c.h.bf16 %v696_v7  ;;  %v264_v22 = vadd.f32 %v735_v5, %v196_v12  ;;  %v200_v26 = vmul.f32 %v648_v14, %v724_v0  ;;  %v337_v7 = vld [vmem:[%s1341_s2 + $0x1c8] sm:$0xff]  ;;  %v338_v14 = vld [vmem:[%s1341_s2 + $0x1d0] sm:$0xff] }
  0x42   :  { %v265_v23 = vadd.f32 %v735_v5, %v197_v13  ;;  %v201_v27 = vmul.f32 %v649_v15, %v724_v0  ;;  %v266_v28 = vadd.f32 %v735_v5, %v198_v18  ;;  %v202_v32 = vmul.f32 %v652_v20, %v724_v0  ;;  %v339_v15 = vld [vmem:[%s1341_s2 + $0x1d8] sm:$0xff]  ;;  %v340_v20 = vld [vmem:[%s1341_s2 + $0x1e0] sm:$0xff] }
  0x43   :  { %v267_v29 = vadd.f32 %v735_v5, %v199_v19  ;;  %v203_v33 = vmul.f32 %v653_v21, %v724_v0  ;;  %v392_v34 = vadd.f32 %v328_v16, %v264_v22  ;;  %v268_v36 = vadd.f32 %v735_v5, %v200_v26  ;;  %v341_v21 = vld [vmem:[%s1341_s2 + $0x1e8] sm:$0xff] }
  0x44   :  { %v393_v35 = vadd.f32 %v329_v17, %v265_v23  ;;  %v269_v37 = vadd.f32 %v735_v5, %v201_v27  ;;  %v394_v40 = vadd.f32 %v330_v24, %v266_v28  ;;  %v270_v42 = vadd.f32 %v735_v5, %v202_v32  ;;  %v342_v28 = vld [vmem:[%s1341_s2 + $0x1f0] sm:$0xff] }
  0x45   :  { %v395_v41 = vadd.f32 %v331_v25, %v267_v29  ;;  %v271_v43 = vadd.f32 %v735_v5, %v203_v33  ;;  %v456_v45 = vmax.f32 %v392_v34, 0.0  ;;  %v396_v47 = vadd.f32 %v332_v30, %v268_v36  ;;  %v343_v29 = vld [vmem:[%s1341_s2 + $0x1f8] sm:$0xff] }
  0x46   :  { %v457_v46 = vmax.f32 %v393_v35, 0.0  ;;  %v397_v48 = vadd.f32 %v333_v31, %v269_v37  ;;  %v458_v50 = vmax.f32 %v394_v40, 0.0  ;;  %v398_v52 = vadd.f32 %v334_v38, %v270_v42 }
  0x47   :  { %v459_v51 = vmax.f32 %v395_v41, 0.0  ;;  %v399_v53 = vadd.f32 %v335_v39, %v271_v43  ;;  %520 = vst [vmem:[%s1342_s3 + $0x180] sm:$0xff] %v456_v45  ;;  %v460_v55 = vmax.f32 %v396_v47, 0.0  ;;  %v656_v57 = vunpack.c.l.bf16 %v697_v44 }
  0x48   :  { %521 = vst [vmem:[%s1342_s3 + $0x188] sm:$0xff] %v457_v46  ;;  %v461_v56 = vmax.f32 %v397_v48, 0.0  ;;  %v657_v58 = vunpack.c.h.bf16 %v697_v44  ;;  %522 = vst [vmem:[%s1342_s3 + $0x190] sm:$0xff] %v458_v50  ;;  %v462_v60 = vmax.f32 %v398_v52, 0.0  ;;  %v660_v62 = vunpack.c.l.bf16 %v698_v49 }
  0x49   :  { %523 = vst [vmem:[%s1342_s3 + $0x198] sm:$0xff] %v459_v51  ;;  %v463_v61 = vmax.f32 %v399_v53, 0.0  ;;  %v661_v63 = vunpack.c.h.bf16 %v698_v49  ;;  %524 = vst [vmem:[%s1342_s3 + $0x1a0] sm:$0xff] %v460_v55  ;;  %v204_v1 = vmul.f32 %v656_v57, %v724_v0  ;;  %v664_v3 = vunpack.c.l.bf16 %v699_v54 }
  0x4a   :  { %525 = vst [vmem:[%s1342_s3 + $0x1a8] sm:$0xff] %v461_v56  ;;  %v205_v2 = vmul.f32 %v657_v58, %v724_v0  ;;  %v665_v4 = vunpack.c.h.bf16 %v699_v54  ;;  %526 = vst [vmem:[%s1342_s3 + $0x1b0] sm:$0xff] %v462_v60  ;;  %v206_v8 = vmul.f32 %v660_v62, %v724_v0  ;;  %v668_v10 = vunpack.c.l.bf16 %v700_v59 }
  0x4b   :  { %527 = vst [vmem:[%s1342_s3 + $0x1b8] sm:$0xff] %v463_v61  ;;  %v207_v9 = vmul.f32 %v661_v63, %v724_v0  ;;  %v669_v11 = vunpack.c.h.bf16 %v700_v59  ;;  %v272_v12 = vadd.f32 %v735_v5, %v204_v1  ;;  %v208_v16 = vmul.f32 %v664_v3, %v724_v0 }
  0x4c   :  { %v273_v13 = vadd.f32 %v735_v5, %v205_v2  ;;  %v209_v17 = vmul.f32 %v665_v4, %v724_v0  ;;  %v274_v18 = vadd.f32 %v735_v5, %v206_v8  ;;  %v210_v22 = vmul.f32 %v668_v10, %v724_v0 }
  0x4d   :  { %v275_v19 = vadd.f32 %v735_v5, %v207_v9  ;;  %v211_v23 = vmul.f32 %v669_v11, %v724_v0  ;;  %v400_v24 = vadd.f32 %v336_v6, %v272_v12  ;;  %v276_v26 = vadd.f32 %v735_v5, %v208_v16 }
  0x4e   :  { %v401_v25 = vadd.f32 %v337_v7, %v273_v13  ;;  %v277_v27 = vadd.f32 %v735_v5, %v209_v17  ;;  %v402_v30 = vadd.f32 %v338_v14, %v274_v18  ;;  %v278_v32 = vadd.f32 %v735_v5, %v210_v22 }
  0x4f   :  { %v403_v31 = vadd.f32 %v339_v15, %v275_v19  ;;  %v279_v0 = vadd.f32 %v735_v5, %v211_v23  ;;  %v464_v33 = vmax.f32 %v400_v24, 0.0  ;;  %v404_v35 = vadd.f32 %v340_v20, %v276_v26 }
  0x50   :  { %v465_v34 = vmax.f32 %v401_v25, 0.0  ;;  %v405_v36 = vadd.f32 %v341_v21, %v277_v27  ;;  %v466_v37 = vmax.f32 %v402_v30, 0.0  ;;  %v406_v39 = vadd.f32 %v342_v28, %v278_v32 }
  0x51   :  { %v467_v38 = vmax.f32 %v403_v31, 0.0  ;;  %v407_v40 = vadd.f32 %v343_v29, %v279_v0  ;;  %528 = vst [vmem:[%s1342_s3 + $0x1c0] sm:$0xff] %v464_v33  ;;  %v468_v41 = vmax.f32 %v404_v35, 0.0 }
  0x52   :  { %529 = vst [vmem:[%s1342_s3 + $0x1c8] sm:$0xff] %v465_v34  ;;  %v469_v42 = vmax.f32 %v405_v36, 0.0  ;;  %530 = vst [vmem:[%s1342_s3 + $0x1d0] sm:$0xff] %v466_v37  ;;  %v470_v5 = vmax.f32 %v406_v39, 0.0 }
  0x53   :  { %531 = vst [vmem:[%s1342_s3 + $0x1d8] sm:$0xff] %v467_v38  ;;  %v471_v43 = vmax.f32 %v407_v40, 0.0  ;;  %532 = vst [vmem:[%s1342_s3 + $0x1e0] sm:$0xff] %v468_v41 }
  0x54   :  { %533 = vst [vmem:[%s1342_s3 + $0x1e8] sm:$0xff] %v469_v42  ;;  %534 = vst [vmem:[%s1342_s3 + $0x1f0] sm:$0xff] %v470_v5 }
  0x55   :  { %535 = vst [vmem:[%s1342_s3 + $0x1f8] sm:$0xff] %v471_v43 }

// kernel: basic_block_forward.5
= control target key start
LH: loop header
LB: loop body
LE: loop exit
PB: predicated region body
PF: predicated region fallthrough
CT: control target
= control target key end

     0   :  { %s1490_s0 = inlined_call_operand.vmem [shape: bf16[512,128], index: 0, kind: input, shape index: {}]   ;;  %s1491_s1 = inlined_call_operand.vmem [shape: f32[2,128], index: 1, kind: input, shape index: {}]   ;;  %s1492_s2 = inlined_call_operand.vmem [shape: bf16[512,128], index: 2, kind: output, shape index: {}]  }
   0x1   :  { %v1163_v0 = vld [vmem:[%s1491_s1] ss:$0 sm:$0xff]  ;;  %v1083_v4 = vld [vmem:[%s1490_s0 + $0x8] sm:$0xff]   ;;  %v1084_v5 = vld [vmem:[%s1490_s0 + $0x10] sm:$0xff]  }
   0x2   :  { %v796_v1 = vld [vmem:[%s1490_s0] sm:$0xff]   ;;  %v1085_v6 = vld [vmem:[%s1490_s0 + $0x18] sm:$0xff]   ;;  %v801_v8 = vunpack.c.l.bf16 %v1083_v4  ;;  %v802_v9 = vunpack.c.h.bf16 %v1083_v4  ;;  %v805_v10 = vunpack.c.l.bf16 %v1084_v5  ;;  %v806_v11 = vunpack.c.h.bf16 %v1084_v5  ;;  %v1087_v33 = vld [vmem:[%s1490_s0 + $0x28] sm:$0xff]  }
   0x3   :  { %v797_v2 = vunpack.c.l.bf16 %v796_v1  ;;  %v798_v3 = vunpack.c.h.bf16 %v796_v1  ;;  %v1180_v7 = vld [vmem:[%s1491_s1 + $0x1] ss:$0 sm:$0xff]  ;;  %v809_v14 = vunpack.c.l.bf16 %v1085_v6  ;;  %v810_v15 = vunpack.c.h.bf16 %v1085_v6  ;;  %v1088_v38 = vld [vmem:[%s1490_s0 + $0x30] sm:$0xff]   ;;  %v1089_v43 = vld [vmem:[%s1490_s0 + $0x38] sm:$0xff]  }
   0x4   :  { %v147_v16 = vmul.f32 %v801_v8, %v1163_v0  ;;  %v148_v17 = vmul.f32 %v802_v9, %v1163_v0  ;;  %v149_v18 = vmul.f32 %v805_v10, %v1163_v0  ;;  %v150_v19 = vmul.f32 %v806_v11, %v1163_v0  ;;  %v1086_v28 = vld [vmem:[%s1490_s0 + $0x20] sm:$0xff]   ;;  %v1091_v11 = vld [vmem:[%s1490_s0 + $0x48] sm:$0xff]  }
   0x5   :  { %v145_v12 = vmul.f32 %v797_v2, %v1163_v0  ;;  %v146_v13 = vmul.f32 %v798_v3, %v1163_v0  ;;  %v151_v22 = vmul.f32 %v809_v14, %v1163_v0  ;;  %v152_v23 = vmul.f32 %v810_v15, %v1163_v0  ;;  %v1090_v1 = vld [vmem:[%s1490_s0 + $0x40] sm:$0xff]  }
   0x6   :  { %v215_v24 = vadd.f32 %v1180_v7, %v147_v16  ;;  %v216_v25 = vadd.f32 %v1180_v7, %v148_v17  ;;  %v217_v26 = vadd.f32 %v1180_v7, %v149_v18  ;;  %v218_v27 = vadd.f32 %v1180_v7, %v150_v19  ;;  %v1092_v16 = vld [vmem:[%s1490_s0 + $0x50] sm:$0xff]  }
   0x7   :  { %v213_v20 = vadd.f32 %v1180_v7, %v145_v12  ;;  %v214_v21 = vadd.f32 %v1180_v7, %v146_v13  ;;  %v219_v31 = vadd.f32 %v1180_v7, %v151_v22  ;;  %v220_v32 = vadd.f32 %v1180_v7, %v152_v23 }
   0x8   :  { %v279_v34 = vmax.f32 %v215_v24, 0.0  ;;  %v280_v35 = vmax.f32 %v216_v25, 0.0  ;;  %v281_v36 = vmax.f32 %v217_v26, 0.0  ;;  %v282_v37 = vmax.f32 %v218_v27, 0.0  ;;  %v1093_v25 = vld [vmem:[%s1490_s0 + $0x58] sm:$0xff]  }
   0x9   :  { %v277_v29 = vmax.f32 %v213_v20, 0.0  ;;  %v278_v30 = vmax.f32 %v214_v21, 0.0  ;;  %v283_v40 = vmax.f32 %v219_v31, 0.0  ;;  %v284_v41 = vmax.f32 %v220_v32, 0.0 }
   0xa   :  { %v813_v42 = vunpack.c.l.bf16 %v1086_v28  ;;  %v931_v44 = vpack.c.bf16 %v280_v35, %v279_v34  ;;  %v936_v45 = vpack.c.bf16 %v282_v37, %v281_v36  ;;  %v814_v46 = vunpack.c.h.bf16 %v1086_v28 }
   0xb   :  { %v926_v39 = vpack.c.bf16 %v278_v30, %v277_v29  ;;  %v817_v47 = vunpack.c.l.bf16 %v1087_v33  ;;  %v941_v48 = vpack.c.bf16 %v284_v41, %v283_v40  ;;  %v818_v50 = vunpack.c.h.bf16 %v1087_v33 }
   0xc   :  { %v153_v49 = vmul.f32 %v813_v42, %v1163_v0  ;;  %v821_v51 = vunpack.c.l.bf16 %v1088_v38  ;;  %1114 = vst [vmem:[%s1492_s2 + $0x8] sm:$0xff] %v931_v44   ;;  %1115 = vst [vmem:[%s1492_s2 + $0x10] sm:$0xff] %v936_v45   ;;  %v154_v52 = vmul.f32 %v814_v46, %v1163_v0  ;;  %v822_v54 = vunpack.c.h.bf16 %v1088_v38  ;;  %v1094_v38 = vld [vmem:[%s1490_s0 + $0x60] sm:$0xff]  }
   0xd   :  { %927 = vst [vmem:[%s1492_s2] sm:$0xff] %v926_v39   ;;  %v155_v53 = vmul.f32 %v817_v47, %v1163_v0  ;;  %v825_v55 = vunpack.c.l.bf16 %v1089_v43  ;;  %1116 = vst [vmem:[%s1492_s2 + $0x18] sm:$0xff] %v941_v48   ;;  %v156_v57 = vmul.f32 %v818_v50, %v1163_v0  ;;  %v826_v59 = vunpack.c.h.bf16 %v1089_v43 }
   0xe   :  { %v221_v56 = vadd.f32 %v1180_v7, %v153_v49  ;;  %v157_v58 = vmul.f32 %v821_v51, %v1163_v0  ;;  %v222_v60 = vadd.f32 %v1180_v7, %v154_v52  ;;  %v158_v62 = vmul.f32 %v822_v54, %v1163_v0  ;;  %v1095_v51 = vld [vmem:[%s1490_s0 + $0x68] sm:$0xff]  }
   0xf   :  { %v223_v61 = vadd.f32 %v1180_v7, %v155_v53  ;;  %v159_v63 = vmul.f32 %v825_v55, %v1163_v0  ;;  %v224_v3 = vadd.f32 %v1180_v7, %v156_v57  ;;  %v160_v5 = vmul.f32 %v826_v59, %v1163_v0 }
  0x10   :  { %v285_v2 = vmax.f32 %v221_v56, 0.0  ;;  %v225_v4 = vadd.f32 %v1180_v7, %v157_v58  ;;  %v286_v6 = vmax.f32 %v222_v60, 0.0  ;;  %v226_v9 = vadd.f32 %v1180_v7, %v158_v62  ;;  %v1096_v60 = vld [vmem:[%s1490_s0 + $0x70] sm:$0xff]  }
  0x11   :  { %v287_v8 = vmax.f32 %v223_v61, 0.0  ;;  %v227_v10 = vadd.f32 %v1180_v7, %v159_v63  ;;  %v288_v12 = vmax.f32 %v224_v3, 0.0  ;;  %v228_v14 = vadd.f32 %v1180_v7, %v160_v5 }
  0x12   :  { %v289_v13 = vmax.f32 %v225_v4, 0.0  ;;  %v829_v15 = vunpack.c.l.bf16 %v1090_v1  ;;  %v946_v17 = vpack.c.bf16 %v286_v6, %v285_v2  ;;  %v290_v18 = vmax.f32 %v226_v9, 0.0  ;;  %v1097_v2 = vld [vmem:[%s1490_s0 + $0x78] sm:$0xff]  }
  0x13   :  { %v291_v19 = vmax.f32 %v227_v10, 0.0  ;;  %v830_v20 = vunpack.c.h.bf16 %v1090_v1  ;;  %v951_v21 = vpack.c.bf16 %v288_v12, %v287_v8  ;;  %v292_v22 = vmax.f32 %v228_v14, 0.0  ;;  %v1098_v12 = vld [vmem:[%s1490_s0 + $0x80] sm:$0xff]  }
  0x14   :  { %v161_v23 = vmul.f32 %v829_v15, %v1163_v0  ;;  %v833_v24 = vunpack.c.l.bf16 %v1091_v11  ;;  %1117 = vst [vmem:[%s1492_s2 + $0x20] sm:$0xff] %v946_v17   ;;  %v956_v26 = vpack.c.bf16 %v290_v18, %v289_v13  ;;  %v834_v28 = vunpack.c.h.bf16 %v1091_v11 }
  0x15   :  { %v162_v27 = vmul.f32 %v830_v20, %v1163_v0  ;;  %v837_v29 = vunpack.c.l.bf16 %v1092_v16  ;;  %1118 = vst [vmem:[%s1492_s2 + $0x28] sm:$0xff] %v951_v21   ;;  %v961_v30 = vpack.c.bf16 %v292_v22, %v291_v19  ;;  %v838_v33 = vunpack.c.h.bf16 %v1092_v16 }
  0x16   :  { %v229_v31 = vadd.f32 %v1180_v7, %v161_v23  ;;  %v163_v32 = vmul.f32 %v833_v24, %v1163_v0  ;;  %1119 = vst [vmem:[%s1492_s2 + $0x30] sm:$0xff] %v956_v26   ;;  %v164_v35 = vmul.f32 %v834_v28, %v1163_v0  ;;  %v841_v37 = vunpack.c.l.bf16 %v1093_v25 }
  0x17   :  { %v230_v34 = vadd.f32 %v1180_v7, %v162_v27  ;;  %v165_v36 = vmul.f32 %v837_v29, %v1163_v0  ;;  %1120 = vst [vmem:[%s1492_s2 + $0x38] sm:$0xff] %v961_v30   ;;  %v166_v41 = vmul.f32 %v838_v33, %v1163_v0  ;;  %v842_v42 = vunpack.c.h.bf16 %v1093_v25  ;;  %v1099_v29 = vld [vmem:[%s1490_s0 + $0x88] sm:$0xff]  }
  0x18   :  { %v293_v39 = vmax.f32 %v229_v31, 0.0  ;;  %v231_v40 = vadd.f32 %v1180_v7, %v163_v32  ;;  %v232_v44 = vadd.f32 %v1180_v7, %v164_v35  ;;  %v167_v46 = vmul.f32 %v841_v37, %v1163_v0 }
  0x19   :  { %v294_v43 = vmax.f32 %v230_v34, 0.0  ;;  %v233_v45 = vadd.f32 %v1180_v7, %v165_v36  ;;  %v234_v48 = vadd.f32 %v1180_v7, %v166_v41  ;;  %v168_v49 = vmul.f32 %v842_v42, %v1163_v0  ;;  %v1100_v34 = vld [vmem:[%s1490_s0 + $0x90] sm:$0xff]  }
  0x1a   :  { %v295_v47 = vmax.f32 %v231_v40, 0.0  ;;  %v845_v50 = vunpack.c.l.bf16 %v1094_v38  ;;  %v296_v53 = vmax.f32 %v232_v44, 0.0  ;;  %v235_v55 = vadd.f32 %v1180_v7, %v167_v46 }
  0x1b   :  { %v966_v52 = vpack.c.bf16 %v294_v43, %v293_v39  ;;  %v297_v54 = vmax.f32 %v233_v45, 0.0  ;;  %v298_v56 = vmax.f32 %v234_v48, 0.0  ;;  %v236_v57 = vadd.f32 %v1180_v7, %v168_v49  ;;  %v1101_v43 = vld [vmem:[%s1490_s0 + $0x98] sm:$0xff]  }
  0x1c   :  { %v846_v58 = vunpack.c.h.bf16 %v1094_v38  ;;  %v169_v59 = vmul.f32 %v845_v50, %v1163_v0  ;;  %v971_v61 = vpack.c.bf16 %v296_v53, %v295_v47  ;;  %v299_v62 = vmax.f32 %v235_v55, 0.0 }
  0x1d   :  { %1121 = vst [vmem:[%s1492_s2 + $0x40] sm:$0xff] %v966_v52   ;;  %v849_v63 = vunpack.c.l.bf16 %v1095_v51  ;;  %v850_v1 = vunpack.c.h.bf16 %v1095_v51  ;;  %v976_v3 = vpack.c.bf16 %v298_v56, %v297_v54  ;;  %v300_v4 = vmax.f32 %v236_v57, 0.0  ;;  %v1102_v56 = vld [vmem:[%s1490_s0 + $0xa0] sm:$0xff]  }
  0x1e   :  { %v170_v5 = vmul.f32 %v846_v58, %v1163_v0  ;;  %v237_v6 = vadd.f32 %v1180_v7, %v169_v59  ;;  %1122 = vst [vmem:[%s1492_s2 + $0x48] sm:$0xff] %v971_v61   ;;  %v853_v10 = vunpack.c.l.bf16 %v1096_v60  ;;  %v854_v11 = vunpack.c.h.bf16 %v1096_v60 }
  0x1f   :  { %v171_v8 = vmul.f32 %v849_v63, %v1163_v0  ;;  %v172_v9 = vmul.f32 %v850_v1, %v1163_v0  ;;  %1123 = vst [vmem:[%s1492_s2 + $0x50] sm:$0xff] %v976_v3   ;;  %v981_v13 = vpack.c.bf16 %v300_v4, %v299_v62  ;;  %v857_v16 = vunpack.c.l.bf16 %v1097_v2 }
  0x20   :  { %v238_v14 = vadd.f32 %v1180_v7, %v170_v5  ;;  %v301_v15 = vmax.f32 %v237_v6, 0.0  ;;  %v173_v19 = vmul.f32 %v853_v10, %v1163_v0  ;;  %v174_v20 = vmul.f32 %v854_v11, %v1163_v0 }
  0x21   :  { %v239_v17 = vadd.f32 %v1180_v7, %v171_v8  ;;  %v240_v18 = vadd.f32 %v1180_v7, %v172_v9  ;;  %1124 = vst [vmem:[%s1492_s2 + $0x58] sm:$0xff] %v981_v13   ;;  %v858_v22 = vunpack.c.h.bf16 %v1097_v2  ;;  %v175_v23 = vmul.f32 %v857_v16, %v1163_v0  ;;  %v1103_v2 = vld [vmem:[%s1490_s0 + $0xa8] sm:$0xff]   ;;  %v1104_v16 = vld [vmem:[%s1490_s0 + $0xb0] sm:$0xff]  }
  0x22   :  { %v302_v21 = vmax.f32 %v238_v14, 0.0  ;;  %v861_v24 = vunpack.c.l.bf16 %v1098_v12  ;;  %v241_v27 = vadd.f32 %v1180_v7, %v173_v19  ;;  %v242_v28 = vadd.f32 %v1180_v7, %v174_v20 }
  0x23   :  { %v303_v25 = vmax.f32 %v239_v17, 0.0  ;;  %v304_v26 = vmax.f32 %v240_v18, 0.0  ;;  %v176_v31 = vmul.f32 %v858_v22, %v1163_v0  ;;  %v243_v32 = vadd.f32 %v1180_v7, %v175_v23 }
  0x24   :  { %v986_v30 = vpack.c.bf16 %v302_v21, %v301_v15  ;;  %v862_v33 = vunpack.c.h.bf16 %v1098_v12  ;;  %v305_v36 = vmax.f32 %v241_v27, 0.0  ;;  %v306_v37 = vmax.f32 %v242_v28, 0.0  ;;  %v1105_v21 = vld [vmem:[%s1490_s0 + $0xb8] sm:$0xff]  }
  0x25   :  { %v991_v35 = vpack.c.bf16 %v304_v26, %v303_v25  ;;  %v177_v38 = vmul.f32 %v861_v24, %v1163_v0  ;;  %v244_v39 = vadd.f32 %v1180_v7, %v176_v31  ;;  %v307_v40 = vmax.f32 %v243_v32, 0.0 }
  0x26   :  { %1125 = vst [vmem:[%s1492_s2 + $0x60] sm:$0xff] %v986_v30   ;;  %v178_v41 = vmul.f32 %v862_v33, %v1163_v0  ;;  %v865_v42 = vunpack.c.l.bf16 %v1099_v29  ;;  %v996_v44 = vpack.c.bf16 %v306_v37, %v305_v36  ;;  %v866_v46 = vunpack.c.h.bf16 %v1099_v29 }
  0x27   :  { %1126 = vst [vmem:[%s1492_s2 + $0x68] sm:$0xff] %v991_v35   ;;  %v245_v45 = vadd.f32 %v1180_v7, %v177_v38  ;;  %v869_v47 = vunpack.c.l.bf16 %v1100_v34  ;;  %v308_v48 = vmax.f32 %v244_v39, 0.0  ;;  %v870_v51 = vunpack.c.h.bf16 %v1100_v34  ;;  %v1106_v34 = vld [vmem:[%s1490_s0 + $0xc0] sm:$0xff]  }
  0x28   :  { %v246_v49 = vadd.f32 %v1180_v7, %v178_v41  ;;  %v179_v50 = vmul.f32 %v865_v42, %v1163_v0  ;;  %1127 = vst [vmem:[%s1492_s2 + $0x70] sm:$0xff] %v996_v44   ;;  %v180_v53 = vmul.f32 %v866_v46, %v1163_v0  ;;  %v873_v55 = vunpack.c.l.bf16 %v1101_v43 }
  0x29   :  { %v309_v52 = vmax.f32 %v245_v45, 0.0  ;;  %v181_v54 = vmul.f32 %v869_v47, %v1163_v0  ;;  %v1001_v57 = vpack.c.bf16 %v308_v48, %v307_v40  ;;  %v182_v60 = vmul.f32 %v870_v51, %v1163_v0  ;;  %v1107_v47 = vld [vmem:[%s1490_s0 + $0xc8] sm:$0xff]  }
  0x2a   :  { %v310_v58 = vmax.f32 %v246_v49, 0.0  ;;  %v247_v59 = vadd.f32 %v1180_v7, %v179_v50  ;;  %v248_v61 = vadd.f32 %v1180_v7, %v180_v53  ;;  %v874_v63 = vunpack.c.h.bf16 %v1101_v43 }
  0x2b   :  { %v249_v62 = vadd.f32 %v1180_v7, %v181_v54  ;;  %v183_v1 = vmul.f32 %v873_v55, %v1163_v0  ;;  %1128 = vst [vmem:[%s1492_s2 + $0x78] sm:$0xff] %v1001_v57   ;;  %v250_v5 = vadd.f32 %v1180_v7, %v182_v60  ;;  %v877_v6 = vunpack.c.l.bf16 %v1102_v56 }
  0x2c   :  { %v1006_v3 = vpack.c.bf16 %v310_v58, %v309_v52  ;;  %v311_v4 = vmax.f32 %v247_v59, 0.0  ;;  %v312_v8 = vmax.f32 %v248_v61, 0.0  ;;  %v184_v10 = vmul.f32 %v874_v63, %v1163_v0  ;;  %v1108_v52 = vld [vmem:[%s1490_s0 + $0xd0] sm:$0xff]   ;;  %v1109_v61 = vld [vmem:[%s1490_s0 + $0xd8] sm:$0xff]  }
  0x2d   :  { %v313_v9 = vmax.f32 %v249_v62, 0.0  ;;  %v251_v11 = vadd.f32 %v1180_v7, %v183_v1  ;;  %v314_v12 = vmax.f32 %v250_v5, 0.0  ;;  %v878_v13 = vunpack.c.h.bf16 %v1102_v56 }
  0x2e   :  { %1129 = vst [vmem:[%s1492_s2 + $0x80] sm:$0xff] %v1006_v3   ;;  %v185_v14 = vmul.f32 %v877_v6, %v1163_v0  ;;  %v881_v15 = vunpack.c.l.bf16 %v1103_v2  ;;  %v1011_v17 = vpack.c.bf16 %v312_v8, %v311_v4  ;;  %v252_v18 = vadd.f32 %v1180_v7, %v184_v10 }
  0x2f   :  { %v315_v19 = vmax.f32 %v251_v11, 0.0  ;;  %v882_v20 = vunpack.c.h.bf16 %v1103_v2  ;;  %v1016_v22 = vpack.c.bf16 %v314_v12, %v313_v9  ;;  %v186_v23 = vmul.f32 %v878_v13, %v1163_v0  ;;  %v1110_v12 = vld [vmem:[%s1490_s0 + $0xe0] sm:$0xff]  }
  0x30   :  { %v253_v24 = vadd.f32 %v1180_v7, %v185_v14  ;;  %v187_v25 = vmul.f32 %v881_v15, %v1163_v0  ;;  %1130 = vst [vmem:[%s1492_s2 + $0x88] sm:$0xff] %v1011_v17   ;;  %v316_v26 = vmax.f32 %v252_v18, 0.0  ;;  %v885_v28 = vunpack.c.l.bf16 %v1104_v16 }
  0x31   :  { %v188_v27 = vmul.f32 %v882_v20, %v1163_v0  ;;  %v886_v29 = vunpack.c.h.bf16 %v1104_v16  ;;  %1131 = vst [vmem:[%s1492_s2 + $0x90] sm:$0xff] %v1016_v22   ;;  %v254_v30 = vadd.f32 %v1180_v7, %v186_v23  ;;  %v889_v33 = vunpack.c.l.bf16 %v1105_v21 }
  0x32   :  { %v317_v31 = vmax.f32 %v253_v24, 0.0  ;;  %v255_v32 = vadd.f32 %v1180_v7, %v187_v25  ;;  %v1021_v35 = vpack.c.bf16 %v316_v26, %v315_v19  ;;  %v189_v37 = vmul.f32 %v885_v28, %v1163_v0 }
  0x33   :  { %v256_v36 = vadd.f32 %v1180_v7, %v188_v27  ;;  %v190_v38 = vmul.f32 %v886_v29, %v1163_v0  ;;  %v318_v39 = vmax.f32 %v254_v30, 0.0  ;;  %v890_v41 = vunpack.c.h.bf16 %v1105_v21  ;;  %v1111_v21 = vld [vmem:[%s1490_s0 + $0xe8] sm:$0xff]  }
  0x34   :  { %v319_v40 = vmax.f32 %v255_v32, 0.0  ;;  %v191_v42 = vmul.f32 %v889_v33, %v1163_v0  ;;  %1132 = vst [vmem:[%s1492_s2 + $0x98] sm:$0xff] %v1021_v35   ;;  %v257_v44 = vadd.f32 %v1180_v7, %v189_v37  ;;  %v893_v46 = vunpack.c.l.bf16 %v1106_v34 }
  0x35   :  { %v320_v43 = vmax.f32 %v256_v36, 0.0  ;;  %v258_v45 = vadd.f32 %v1180_v7, %v190_v38  ;;  %v1026_v48 = vpack.c.bf16 %v318_v39, %v317_v31  ;;  %v192_v49 = vmul.f32 %v890_v41, %v1163_v0  ;;  %v1113_v39 = vld [vmem:[%s1490_s0 + $0xf8] sm:$0xff]  }
  0x36   :  { %v259_v50 = vadd.f32 %v1180_v7, %v191_v42  ;;  %v894_v51 = vunpack.c.h.bf16 %v1106_v34  ;;  %v321_v54 = vmax.f32 %v257_v44, 0.0  ;;  %v193_v56 = vmul.f32 %v893_v46, %v1163_v0  ;;  %v1112_v34 = vld [vmem:[%s1490_s0 + $0xf0] sm:$0xff]  }
  0x37   :  { %v1031_v53 = vpack.c.bf16 %v320_v43, %v319_v40  ;;  %v322_v55 = vmax.f32 %v258_v45, 0.0  ;;  %1133 = vst [vmem:[%s1492_s2 + $0xa0] sm:$0xff] %v1026_v48   ;;  %v260_v57 = vadd.f32 %v1180_v7, %v192_v49  ;;  %v897_v60 = vunpack.c.l.bf16 %v1107_v47 }
  0x38   :  { %v323_v58 = vmax.f32 %v259_v50, 0.0  ;;  %v194_v59 = vmul.f32 %v894_v51, %v1163_v0  ;;  %v261_v63 = vadd.f32 %v1180_v7, %v193_v56  ;;  %v898_v1 = vunpack.c.h.bf16 %v1107_v47 }
  0x39   :  { %1134 = vst [vmem:[%s1492_s2 + $0xa8] sm:$0xff] %v1031_v53   ;;  %v1036_v62 = vpack.c.bf16 %v322_v55, %v321_v54  ;;  %v901_v2 = vunpack.c.l.bf16 %v1108_v52  ;;  %v324_v3 = vmax.f32 %v260_v57, 0.0  ;;  %v195_v5 = vmul.f32 %v897_v60, %v1163_v0 }
  0x3a   :  { %v262_v4 = vadd.f32 %v1180_v7, %v194_v59  ;;  %v902_v6 = vunpack.c.h.bf16 %v1108_v52  ;;  %v325_v8 = vmax.f32 %v261_v63, 0.0  ;;  %v196_v9 = vmul.f32 %v898_v1, %v1163_v0 }
  0x3b   :  { %1135 = vst [vmem:[%s1492_s2 + $0xb0] sm:$0xff] %v1036_v62   ;;  %v197_v10 = vmul.f32 %v901_v2, %v1163_v0  ;;  %v905_v11 = vunpack.c.l.bf16 %v1109_v61  ;;  %v1041_v13 = vpack.c.bf16 %v324_v3, %v323_v58  ;;  %v263_v15 = vadd.f32 %v1180_v7, %v195_v5 }
  0x3c   :  { %v326_v14 = vmax.f32 %v262_v4, 0.0  ;;  %v198_v16 = vmul.f32 %v902_v6, %v1163_v0  ;;  %v264_v17 = vadd.f32 %v1180_v7, %v196_v9  ;;  %v906_v19 = vunpack.c.h.bf16 %v1109_v61 }
  0x3d   :  { %v265_v18 = vadd.f32 %v1180_v7, %v197_v10  ;;  %v199_v20 = vmul.f32 %v905_v11, %v1163_v0  ;;  %1136 = vst [vmem:[%s1492_s2 + $0xb8] sm:$0xff] %v1041_v13   ;;  %v327_v23 = vmax.f32 %v263_v15, 0.0  ;;  %v909_v25 = vunpack.c.l.bf16 %v1110_v12 }
  0x3e   :  { %v1046_v22 = vpack.c.bf16 %v326_v14, %v325_v8  ;;  %v266_v24 = vadd.f32 %v1180_v7, %v198_v16  ;;  %v328_v26 = vmax.f32 %v264_v17, 0.0  ;;  %v200_v28 = vmul.f32 %v906_v19, %v1163_v0 }
  0x3f   :  { %v329_v27 = vmax.f32 %v265_v18, 0.0  ;;  %v267_v29 = vadd.f32 %v1180_v7, %v199_v20  ;;  %v910_v31 = vunpack.c.h.bf16 %v1110_v12  ;;  %v201_v32 = vmul.f32 %v909_v25, %v1163_v0 }
  0x40   :  { %1137 = vst [vmem:[%s1492_s2 + $0xc0] sm:$0xff] %v1046_v22   ;;  %v330_v30 = vmax.f32 %v266_v24, 0.0  ;;  %v913_v33 = vunpack.c.l.bf16 %v1111_v21  ;;  %v1051_v35 = vpack.c.bf16 %v328_v26, %v327_v23  ;;  %v268_v36 = vadd.f32 %v1180_v7, %v200_v28 }
  0x41   :  { %v331_v37 = vmax.f32 %v267_v29, 0.0  ;;  %v914_v38 = vunpack.c.h.bf16 %v1111_v21  ;;  %v202_v41 = vmul.f32 %v910_v31, %v1163_v0  ;;  %v269_v42 = vadd.f32 %v1180_v7, %v201_v32 }
  0x42   :  { %v1056_v40 = vpack.c.bf16 %v330_v30, %v329_v27  ;;  %v203_v43 = vmul.f32 %v913_v33, %v1163_v0  ;;  %1138 = vst [vmem:[%s1492_s2 + $0xc8] sm:$0xff] %v1051_v35   ;;  %v332_v44 = vmax.f32 %v268_v36, 0.0  ;;  %v917_v46 = vunpack.c.l.bf16 %v1112_v34 }
  0x43   :  { %v204_v45 = vmul.f32 %v914_v38, %v1163_v0  ;;  %v918_v47 = vunpack.c.h.bf16 %v1112_v34  ;;  %v270_v48 = vadd.f32 %v1180_v7, %v202_v41  ;;  %v333_v49 = vmax.f32 %v269_v42, 0.0 }
  0x44   :  { %1139 = vst [vmem:[%s1492_s2 + $0xd0] sm:$0xff] %v1056_v40   ;;  %v271_v50 = vadd.f32 %v1180_v7, %v203_v43  ;;  %v921_v51 = vunpack.c.l.bf16 %v1113_v39  ;;  %v1061_v52 = vpack.c.bf16 %v332_v44, %v331_v37  ;;  %v205_v54 = vmul.f32 %v917_v46, %v1163_v0 }
  0x45   :  { %v272_v53 = vadd.f32 %v1180_v7, %v204_v45  ;;  %v206_v55 = vmul.f32 %v918_v47, %v1163_v0  ;;  %v334_v56 = vmax.f32 %v270_v48, 0.0  ;;  %v922_v58 = vunpack.c.h.bf16 %v1113_v39 }
  0x46   :  { %v335_v57 = vmax.f32 %v271_v50, 0.0  ;;  %v207_v59 = vmul.f32 %v921_v51, %v1163_v0  ;;  %1140 = vst [vmem:[%s1492_s2 + $0xd8] sm:$0xff] %v1061_v52   ;;  %v273_v61 = vadd.f32 %v1180_v7, %v205_v54 }
  0x47   :  { %v336_v60 = vmax.f32 %v272_v53, 0.0  ;;  %v274_v62 = vadd.f32 %v1180_v7, %v206_v55  ;;  %v1066_v63 = vpack.c.bf16 %v334_v56, %v333_v49  ;;  %v208_v1 = vmul.f32 %v922_v58, %v1163_v0 }
  0x48   :  { %v275_v2 = vadd.f32 %v1180_v7, %v207_v59  ;;  %v337_v4 = vmax.f32 %v273_v61, 0.0 }
  0x49   :  { %v1071_v3 = vpack.c.bf16 %v336_v60, %v335_v57  ;;  %v338_v5 = vmax.f32 %v274_v62, 0.0  ;;  %1141 = vst [vmem:[%s1492_s2 + $0xe0] sm:$0xff] %v1066_v63   ;;  %v276_v6 = vadd.f32 %v1180_v7, %v208_v1 }
  0x4a   :  { %v339_v8 = vmax.f32 %v275_v2, 0.0 }
  0x4b   :  { %1142 = vst [vmem:[%s1492_s2 + $0xe8] sm:$0xff] %v1071_v3   ;;  %v1076_v9 = vpack.c.bf16 %v338_v5, %v337_v4  ;;  %v340_v10 = vmax.f32 %v276_v6, 0.0 }
  0x4d   :  { %1143 = vst [vmem:[%s1492_s2 + $0xf0] sm:$0xff] %v1076_v9   ;;  %v1081_v0 = vpack.c.bf16 %v340_v10, %v339_v8 }
  0x4f   :  { %1144 = vst [vmem:[%s1492_s2 + $0xf8] sm:$0xff] %v1081_v0  }

// kernel: basic_block_forward.4
= control target key start
LH: loop header
LB: loop body
LE: loop exit
PB: predicated region body
PF: predicated region fallthrough
CT: control target
= control target key end

     0   :  { %s4136_s12 = smov 0   ;;  %s4973_s0 = inlined_call_operand.vmem [shape: bf16[2,288,384], index: 0, kind: input, shape index: {}]   ;;  %s4974_s1 = inlined_call_operand.vmem [shape: bf16[3,384,128], index: 1, kind: input, shape index: {}]   ;;  %s4975_s2 = inlined_call_operand.vmem [shape: bf16[2,256,128], index: 2, kind: output, shape index: {0}]   ;;  %s4976_s3 = inlined_call_operand.vmem [shape: f32[2,2,128], index: 3, kind: output, shape index: {1}]  }
   0x1 LB: > { %s2774_s13 = sadd.s32 4294967295, %s4114_s12   ;;  %p2778_p0 = scmp.ge.s32.totalorder %s4114_s12, 1  ;;  %s4114_s12 = sphi %s4136_s12, %s14_s12  }
   0x2   : > { %p140_p1 = scmp.lt.s32.totalorder %s4114_s12, 3 }
   0x4   : > { %p141_p2 = pnand %p2778_p0, %p140_p1 }
   0x6   : > { %144 = sbr.rel (%p141_p2) target bundleno = 567 (0x237), region = 28 }
   0xd   : > { %v3949_v0 = vld [vmem:[%s4974_s1 + $0x100] sm:$0xff]   ;;  %v3952_v3 = vld [vmem:[%s4974_s1 + $0x108] sm:$0xff]   ;;  %v3955_v6 = vld [vmem:[%s4974_s1 + $0x110] sm:$0xff]   ;;  %p168_p3 = scmp.lt.s32.totalorder %s2774_s13, 1  ;;  %vm2685_vm0 = vcmask 1040384  }
   0xe   : > { %v4150_v1 = vld [vmem:[%s4974_s1 + $0x140] sm:$0xff]   ;;  %3212 = vmatprep.subr.bf16.mxu0 %v3949_v0  ;;  %v4163_v4 = vld [vmem:[%s4974_s1 + $0x148] sm:$0xff]   ;;  %v4175_v7 = vld [vmem:[%s4974_s1 + $0x150] sm:$0xff]  }
   0xf   : > { %v3951_v2 = vld [vmem:[%s4974_s1 + $0xc0] sm:$0xff]   ;;  %3764 = vmatprep.subr.bf16.mxu1 %v4150_v1  ;;  %v3954_v5 = vld [vmem:[%s4974_s1 + $0xc8] sm:$0xff]   ;;  %v3957_v8 = vld [vmem:[%s4974_s1 + $0xd0] sm:$0xff]   ;;  %s4982_s13 = smov (!%p168_p3, %s2774_s13), 1 }
  0x10   : > { %3213 = vmatpush3.bf16.msra.mxu0 %v3951_v2  ;;  %3772 = vmatpush3.bf16.msra.mxu1 %v4150_v1  ;;  %v3958_v9 = vld [vmem:[%s4974_s1 + $0x118] sm:$0xff]   ;;  %v3961_v12 = vld [vmem:[%s4974_s1 + $0x120] sm:$0xff]   ;;  %v3964_v15 = vld [vmem:[%s4974_s1 + $0x128] sm:$0xff]   ;;  %s3940_s23 = smul.u32 432, %s4982_s13  ;;  %s2782_s19 = sshll.u32 %s4982_s13, 1 }
  0x11   : > { %3214 = vmatprep.subr.bf16.mxu0 %v3952_v3  ;;  %3765 = vmatprep.subr.bf16.mxu1 %v4163_v4  ;;  %v4188_v10 = vld [vmem:[%s4974_s1 + $0x158] sm:$0xff]   ;;  %v4203_v13 = vld [vmem:[%s4974_s1 + $0x160] sm:$0xff]   ;;  %v4220_v16 = vld [vmem:[%s4974_s1 + $0x168] sm:$0xff]   ;;  %s181_s22 = scalar_lea.vmem %s4976_s3, %s2782_s19 }
  0x12   : > { %v3960_v11 = vld [vmem:[%s4974_s1 + $0xd8] sm:$0xff]   ;;  %v3963_v14 = vld [vmem:[%s4974_s1 + $0xe0] sm:$0xff]   ;;  %v3966_v17 = vld [vmem:[%s4974_s1 + $0xe8] sm:$0xff]   ;;  %s4242_s7 = scalar_lea.vmem %s4973_s0, %s3940_s23 }
  0x13   : > { %v3967_v18 = vld [vmem:[%s4974_s1 + $0x130] sm:$0xff]   ;;  %v3970_v21 = vld [vmem:[%s4974_s1 + $0x138] sm:$0xff]   ;;  %v4258_v24 = vld [vmem:[%s4242_s7 + $0xe0] ss:$12 sps:$4 sm:$0xff]  }
  0x14   : > { %3215 = vmatpush3.bf16.msra.mxu0 %v3954_v5  ;;  %3773 = vmatpush3.bf16.msra.mxu1 %v4163_v4  ;;  %v4234_v19 = vld [vmem:[%s4974_s1 + $0x170] sm:$0xff]   ;;  %v4251_v22 = vld [vmem:[%s4974_s1 + $0x178] sm:$0xff]   ;;  %v3978_v26 = vld [vmem:[%s4974_s1 + $0x40] sm:$0xff]  }
  0x15   : > { %3216 = vmatprep.subr.bf16.mxu0 %v3955_v6  ;;  %3766 = vmatprep.subr.bf16.mxu1 %v4175_v7  ;;  %v3969_v20 = vld [vmem:[%s4974_s1 + $0xf0] sm:$0xff]   ;;  %v4255_v23 = vld [vmem:[%s4242_s7 + $0x1c] ss:$12 sps:$4 sm:$0xff]   ;;  %v4270_v27 = vld [vmem:[%s4242_s7 + $0x18] ss:$12 sps:$4 sm:$0xff]  }
  0x16   : > { %780 = vmatprep.mubr.bf16.mxu0 %v4255_v23  ;;  %v3972_v25 = vld [vmem:[%s4974_s1 + $0xf8] sm:$0xff]   ;;  %3652 = vmatprep.mubr.bf16.mxu1 %v4258_v24  ;;  %v3979_v29 = vld [vmem:[%s4974_s1] sm:$0xff]   ;;  %v3980_v30 = vld [vmem:[%s4974_s1 + $0x48] sm:$0xff]  }
  0x17   : > { %v4274_v28 = vld [vmem:[%s4242_s7 + $0xf8] ss:$12 sps:$4 sm:$0xff]   ;;  %v4285_v31 = vld [vmem:[%s4242_s7 + $0x34] ss:$12 sps:$4 sm:$0xff]   ;;  %v4288_v32 = vld [vmem:[%s4242_s7 + $0x110] ss:$12 sps:$4 sm:$0xff]  }
  0x18   : > { %3217 = vmatpush3.bf16.msra.mxu0 %v3957_v8  ;;  %3774 = vmatpush3.bf16.msra.mxu1 %v4175_v7  ;;  %v3981_v33 = vld [vmem:[%s4974_s1 + $0x8] sm:$0xff]   ;;  %v4298_v34 = vld [vmem:[%s4242_s7 + $0x30] ss:$12 sps:$4 sm:$0xff]   ;;  %v4333_v43 = vld [vmem:[%s4242_s7 + $0x158] ss:$12 sps:$4 sm:$0xff]  }
  0x19   : > { %3218 = vmatprep.subr.bf16.mxu0 %v3958_v9  ;;  %3767 = vmatprep.subr.bf16.mxu1 %v4188_v10  ;;  %v3987_v35 = vld [vmem:[%s4974_s1 + $0x50] sm:$0xff]   ;;  %v3989_v38 = vld [vmem:[%s4974_s1 + $0x58] sm:$0xff]   ;;  %v4319_v40 = vld [vmem:[%s4242_s7 + $0x140] ss:$12 sps:$4 sm:$0xff]  }
  0x1a   : > { %v4305_v36 = vld [vmem:[%s4242_s7 + $0x128] ss:$12 sps:$4 sm:$0xff]   ;;  %v4315_v39 = vld [vmem:[%s4242_s7 + $0x4c] ss:$12 sps:$4 sm:$0xff]   ;;  %v3996_v44 = vld [vmem:[%s4974_s1 + $0x60] sm:$0xff]  }
  0x1b   : > { %v3988_v37 = vld [vmem:[%s4974_s1 + $0x10] sm:$0xff]   ;;  %v3990_v41 = vld [vmem:[%s4974_s1 + $0x18] sm:$0xff]   ;;  %v3997_v45 = vld [vmem:[%s4974_s1 + $0x20] sm:$0xff]  }
  0x1c   : > { %3219 = vmatpush3.bf16.msra.mxu0 %v3960_v11  ;;  %3775 = vmatpush3.bf16.msra.mxu1 %v4188_v10  ;;  %v4330_v42 = vld [vmem:[%s4242_s7 + $0x48] ss:$12 sps:$4 sm:$0xff]   ;;  %v4347_v47 = vld [vmem:[%s4242_s7 + $0x64] ss:$12 sps:$4 sm:$0xff]   ;;  %v4364_v51 = vld [vmem:[%s4242_s7 + $0x60] ss:$12 sps:$4 sm:$0xff]  }
  0x1d   : > { %3220 = vmatprep.subr.bf16.mxu0 %v3961_v12  ;;  %3768 = vmatprep.subr.bf16.mxu1 %v4203_v13  ;;  %v3998_v46 = vld [vmem:[%s4974_s1 + $0x68] sm:$0xff]   ;;  %v4350_v48 = vld [vmem:[%s4242_s7 + $0x170] ss:$12 sps:$4 sm:$0xff]   ;;  %v4015_v58 = vld [vmem:[%s4974_s1 + $0x80] sm:$0xff]  }
  0x1e   : > { %v3999_v49 = vld [vmem:[%s4974_s1 + $0x28] sm:$0xff]   ;;  %v4005_v50 = vld [vmem:[%s4974_s1 + $0x70] sm:$0xff]   ;;  %v4007_v54 = vld [vmem:[%s4974_s1 + $0x78] sm:$0xff]  }
  0x1f   : > { %v4004_v52 = vld [vmem:[%s4242_s7 + $0x188] ss:$12 sps:$4 sm:$0xff]   ;;  %v4013_v56 = vld [vmem:[%s4242_s7 + $0x4] ss:$12 sps:$4 sm:$0xff]   ;;  %v4008_v57 = vld [vmem:[%s4974_s1 + $0x38] sm:$0xff]  }
  0x20   : > { %3221 = vmatpush3.bf16.msra.mxu0 %v3963_v14  ;;  %3776 = vmatpush3.bf16.msra.mxu1 %v4203_v13  ;;  %v4006_v53 = vld [vmem:[%s4974_s1 + $0x30] sm:$0xff]   ;;  %v4376_v55 = vld [vmem:[%s4242_s7 + $0x7c] ss:$12 sps:$4 sm:$0xff]   ;;  %v4011_v59 = vld [vmem:[%s4242_s7] ss:$12 sps:$4 sm:$0xff]  }
  0x21   : > { %3222 = vmatprep.subr.bf16.mxu0 %v3964_v15  ;;  %3769 = vmatprep.subr.bf16.mxu1 %v4220_v16  ;;  %v4391_v60 = vld [vmem:[%s4242_s7 + $0x78] ss:$12 sps:$4 sm:$0xff]   ;;  %v4395_v61 = vld [vmem:[%s4242_s7 + $0x94] ss:$12 sps:$4 sm:$0xff]   ;;  %v4022_v62 = vld [vmem:[%s4974_s1 + $0x88] sm:$0xff]  }
  0x22   : > { %v4029_v63 = vld [vmem:[%s4974_s1 + $0x90] sm:$0xff]   ;;  %v4036_v2 = vld [vmem:[%s4974_s1 + $0x98] sm:$0xff]   ;;  %v4057_v6 = vld [vmem:[%s4974_s1 + $0x1c0] sm:$0xff]  }
  0x23   : > { %v4409_v0 = vld [vmem:[%s4242_s7 + $0x90] ss:$12 sps:$4 sm:$0xff]   ;;  %v4423_v3 = vld [vmem:[%s4242_s7 + $0xa8] ss:$12 sps:$4 sm:$0xff]   ;;  %v4445_v9 = vld [vmem:[%s4242_s7 + $0xc0] ss:$12 sps:$4 sm:$0xff]  }
  0x24   : > { %3223 = vmatpush3.bf16.msra.mxu0 %v3966_v17  ;;  %3777 = vmatpush3.bf16.msra.mxu1 %v4220_v16  ;;  %v4429_v5 = vld [vmem:[%s4242_s7 + $0xc4] ss:$12 sps:$4 sm:$0xff]   ;;  %v4069_v11 = vld [vmem:[%s4974_s1 + $0xb8] sm:$0xff]   ;;  %v4484_v17 = vld [vmem:[%s4242_s7 + $0x108] ss:$12 sps:$4 sm:$0xff]  }
  0x25   : > { %3224 = vmatprep.subr.bf16.mxu0 %v3967_v18  ;;  %3770 = vmatprep.subr.bf16.mxu1 %v4234_v19  ;;  %v4056_v8 = vld [vmem:[%s4974_s1 + $0xb0] sm:$0xff]   ;;  %v4458_v12 = vld [vmem:[%s4242_s7 + $0xd8] ss:$12 sps:$4 sm:$0xff]  }
  0x26   : > { %v4468_v14 = vld [vmem:[%s4242_s7 + $0xf0] ss:$12 sps:$4 sm:$0xff]   ;;  %v4471_v15 = vld [vmem:[%s4242_s7 + $0x10c] ss:$12 sps:$4 sm:$0xff]  }
  0x27   : > { %v4487_v18 = vld [vmem:[%s4242_s7 + $0x124] ss:$12 sps:$4 sm:$0xff]  }
  0x28   : > { %3225 = vmatpush3.bf16.msra.mxu0 %v3969_v20  ;;  %3778 = vmatpush3.bf16.msra.mxu1 %v4234_v19  ;;  %v4497_v20 = vld [vmem:[%s4242_s7 + $0x13c] ss:$12 sps:$4 sm:$0xff]  }
  0x29   : > { %3226 = vmatprep.subr.bf16.mxu0 %v3970_v21  ;;  %3771 = vmatprep.subr.bf16.mxu1 %v4251_v22  ;;  %v4504_v21 = vld [vmem:[%s4242_s7 + $0x138] ss:$12 sps:$4 sm:$0xff]  }
  0x2c   : > { %3227 = vmatpush3.bf16.msra.mxu0 %v3972_v25  ;;  %3779 = vmatpush3.bf16.msra.mxu1 %v4251_v22  ;;  %v4517_v25 = vld [vmem:[%s4242_s7 + $0x16c] ss:$12 sps:$4 sm:$0xff]  }
  0x2d   : > { %3620 = vmatprep.subr.bf16.mxu0 %v4150_v1  ;;  %3348 = vmatprep.subr.bf16.mxu1 %v3978_v26  ;;  %v4524_v26 = vld [vmem:[%s4242_s7 + $0x168] ss:$12 sps:$4 sm:$0xff]  }
  0x2f   : > { %781 = vmatmul.mubr.bf16.vlgmr.msra.gmra.mrb[0].mxu0 %v4270_v27  ;;  %3653 = vmatmul.mubr.bf16.vlgmr.msra.gmra.mrb[0].mxu1 %v4274_v28 }
  0x30   : > { %3621 = vmatpush3.bf16.msra.mxu0 %v4150_v1  ;;  %3349 = vmatpush3.bf16.msra.mxu1 %v3979_v29  ;;  %v4413_v1 = vld [vmem:[%s4242_s7 + $0xac] ss:$12 sps:$4 sm:$0xff]  }
  0x31   : > { %3350 = vmatprep.subr.bf16.mxu1 %v3980_v30  ;;  %788 = vmatprep.mubr.bf16.mxu0 %v4285_v31  ;;  %v4534_v29 = vld [vmem:[%s4242_s7 + $0x180] ss:$12 sps:$4 sm:$0xff]  }
  0x32   : > { %3656 = vmatprep.mubr.bf16.mxu1 %v4288_v32  ;;  %3622 = vmatprep.subr.bf16.mxu0 %v4163_v4  ;;  %v4054_v30 = vld [vmem:[%s4242_s7 + $0x20] ss:$12 sps:$4 sm:$0xff]  }
  0x34   : > { %3351 = vmatpush3.bf16.msra.mxu1 %v3981_v33  ;;  %3623 = vmatpush3.bf16.msra.mxu0 %v4163_v4  ;;  %v4043_v4 = vld [vmem:[%s4974_s1 + $0xa0] sm:$0xff]  }
  0x35   : > { %3352 = vmatprep.subr.bf16.mxu1 %v3987_v35  ;;  %3624 = vmatprep.subr.bf16.mxu0 %v4175_v7  ;;  %v4055_v33 = vld [vmem:[%s4242_s7 + $0x38] ss:$12 sps:$4 sm:$0xff]  }
  0x36   : > { %v4058_v35 = vld [vmem:[%s4974_s1 + $0x180] sm:$0xff]  }
  0x37   : > { %789 = vmatmul.mubr.bf16.gmra.mrb[4].mxu0 %v4298_v34  ;;  %3657 = vmatmul.mubr.bf16.gmra.mrb[4].mxu1 %v4305_v36 }
  0x38   : > { %3353 = vmatpush3.bf16.msra.mxu1 %v3988_v37  ;;  %796 = vmatprep.mubr.bf16.mxu0 %v4315_v39  ;;  %v4061_v37 = vld [vmem:[%s4242_s7 + $0x50] ss:$12 sps:$4 sm:$0xff]  }
  0x39   : > { %3354 = vmatprep.subr.bf16.mxu1 %v3989_v38  ;;  %3660 = vmatprep.mubr.bf16.mxu1 %v4319_v40  ;;  %v4059_v38 = vld [vmem:[%s4974_s1 + $0x1c8] sm:$0xff]  }
  0x3a   : > { %3625 = vmatpush3.bf16.msra.mxu0 %v4175_v7  ;;  %v4050_v7 = vld [vmem:[%s4974_s1 + $0xa8] sm:$0xff]  }
  0x3b   : > { %3626 = vmatprep.subr.bf16.mxu0 %v4188_v10 }
  0x3c   : > { %3355 = vmatpush3.bf16.msra.mxu1 %v3990_v41  ;;  %v4060_v41 = vld [vmem:[%s4974_s1 + $0x188] sm:$0xff]  }
  0x3d   : > { %3356 = vmatprep.subr.bf16.mxu1 %v3996_v44  ;;  %v4063_v44 = vld [vmem:[%s4974_s1 + $0x1d0] sm:$0xff]  }
  0x3e   : > { %3627 = vmatpush3.bf16.msra.mxu0 %v4188_v10  ;;  %v4448_v10 = vld [vmem:[%s4242_s7 + $0xdc] ss:$12 sps:$4 sm:$0xff]  }
  0x3f   : > { %797 = vmatmul.mubr.bf16.gmra.mrb[8].mxu0 %v4330_v42  ;;  %3661 = vmatmul.mubr.bf16.gmra.mrb[8].mxu1 %v4333_v43 }
  0x40   : > { %3357 = vmatpush3.bf16.msra.mxu1 %v3997_v45  ;;  %804 = vmatprep.mubr.bf16.mxu0 %v4347_v47  ;;  %v4062_v45 = vld [vmem:[%s4242_s7 + $0x68] ss:$12 sps:$4 sm:$0xff]  }
  0x41   : > { %3358 = vmatprep.subr.bf16.mxu1 %v3998_v46  ;;  %3664 = vmatprep.mubr.bf16.mxu1 %v4350_v48  ;;  %v4064_v46 = vld [vmem:[%s4974_s1 + $0x190] sm:$0xff]  }
  0x42   : > { %3628 = vmatprep.subr.bf16.mxu0 %v4203_v13 }
  0x43   : > { %3629 = vmatpush3.bf16.msra.mxu0 %v4203_v13  ;;  %v4461_v13 = vld [vmem:[%s4242_s7 + $0xf4] ss:$12 sps:$4 sm:$0xff]  }
  0x44   : > { %3359 = vmatpush3.bf16.msra.mxu1 %v3999_v49  ;;  %3630 = vmatprep.subr.bf16.mxu0 %v4220_v16  ;;  %v4067_v49 = vld [vmem:[%s4242_s7 + $0x80] ss:$12 sps:$4 sm:$0xff]  }
  0x45   : > { %3360 = vmatprep.subr.bf16.mxu1 %v4005_v50  ;;  %v4065_v50 = vld [vmem:[%s4974_s1 + $0x1d8] sm:$0xff]  }
  0x47   : > { %805 = vmatmul.mubr.bf16.gmra.mrb[12].mxu0 %v4364_v51  ;;  %3665 = vmatmul.mubr.bf16.gmra.mrb[12].mxu1 %v4004_v52  ;;  %v4066_v52 = vld [vmem:[%s4974_s1 + $0x198] sm:$0xff]  }
  0x48   : > { %3361 = vmatpush3.bf16.msra.mxu1 %v4006_v53  ;;  %812 = vmatprep.mubr.bf16.mxu0 %v4376_v55  ;;  %v4070_v53 = vld [vmem:[%s4974_s1 + $0x1e0] sm:$0xff]  }
  0x49   : > { %3362 = vmatprep.subr.bf16.mxu1 %v4007_v54  ;;  %1262 = vmatprep.mubr.bf16.mxu1 %v4013_v56  ;;  %v4068_v54 = vld [vmem:[%s4242_s7 + $0x98] ss:$12 sps:$4 sm:$0xff]  }
  0x4a   : > { %3631 = vmatpush3.bf16.msra.mxu0 %v4220_v16  ;;  %v4476_v16 = vld [vmem:[%s4974_s1 + $0x200] sm:$0xff]  }
  0x4b   : > { %3632 = vmatprep.subr.bf16.mxu0 %v4234_v19  ;;  %v4071_v56 = vld [vmem:[%s4974_s1 + $0x1a0] sm:$0xff]  }
  0x4c   : > { %3363 = vmatpush3.bf16.msra.mxu1 %v4008_v57  ;;  %v4074_v57 = vld [vmem:[%s4242_s7 + $0xb0] ss:$12 sps:$4 sm:$0xff]  }
  0x4d   : > { %3668 = vmatprep.subr.bf16.mxu1 %v4015_v58 }
  0x4e   : > { %3633 = vmatpush3.bf16.msra.mxu0 %v4234_v19  ;;  %v4494_v19 = vld [vmem:[%s4242_s7 + $0x120] ss:$12 sps:$4 sm:$0xff]  }
  0x4f   : > { %813 = vmatmul.mubr.bf16.gmra.mrb[16].mxu0 %v4391_v60  ;;  %1263 = vmatmul.mubr.bf16.vlgmr.msra.gmra.mrb[16].mxu1 %v4011_v59  ;;  %v4073_v59 = vld [vmem:[%s4974_s1 + $0x1a8] sm:$0xff]  }
  0x50   : > { %3669 = vmatpush3.bf16.msra.mxu1 %v4015_v58  ;;  %820 = vmatprep.mubr.bf16.mxu0 %v4395_v61  ;;  %v4072_v58 = vld [vmem:[%s4974_s1 + $0x1e8] sm:$0xff]  }
  0x51   : > { %1270 = vmatprep.mubr.bf16.mxu1 %v4255_v23  ;;  %3670 = vmatprep.subr.bf16.mxu1 %v4022_v62  ;;  %v4514_v23 = vld [vmem:[%s4242_s7 + $0x150] ss:$12 sps:$4 sm:$0xff]  }
  0x52   : > { %3634 = vmatprep.subr.bf16.mxu0 %v4251_v22 }
  0x53   : > { %3635 = vmatpush3.bf16.msra.mxu0 %v4251_v22  ;;  %v4507_v22 = vld [vmem:[%s4242_s7 + $0x154] ss:$12 sps:$4 sm:$0xff]  }
  0x54   : > { %3671 = vmatpush3.bf16.msra.mxu1 %v4022_v62  ;;  %3484 = vmatprep.subr.bf16.mxu0 %v4057_v6  ;;  %v4076_v62 = vld [vmem:[%s4974_s1 + $0x1f0] sm:$0xff]   ;;  %v4078_v6 = vld [vmem:[%s4974_s1 + $0x1f8] sm:$0xff]  }
  0x55   : > { %3672 = vmatprep.subr.bf16.mxu1 %v4029_v63 }
  0x57   : > { %821 = vmatmul.mubr.bf16.gmra.mrb[20].mxu0 %v4409_v0  ;;  %1271 = vmatmul.mubr.bf16.gmra.mrb[20].mxu1 %v4270_v27  ;;  %v4527_v27 = vld [vmem:[%s4242_s7 + $0x184] ss:$12 sps:$4 sm:$0xff]  }
  0x58   : > { %828 = vmatprep.mubr.bf16.mxu0 %v4413_v1  ;;  %1278 = vmatprep.mubr.bf16.mxu1 %v4285_v31 }
  0x59   : > { %3673 = vmatpush3.bf16.msra.mxu1 %v4029_v63  ;;  %v4075_v63 = vld [vmem:[%s4242_s7 + $0xc8] ss:$12 sps:$4 sm:$0xff]  }
  0x5a   : > { %3674 = vmatprep.subr.bf16.mxu1 %v4036_v2 }
  0x5d   : > { %3675 = vmatpush3.bf16.msra.mxu1 %v4036_v2  ;;  %v4077_v2 = vld [vmem:[%s4974_s1 + $0x1b0] sm:$0xff]  }
  0x5e   : > { %3676 = vmatprep.subr.bf16.mxu1 %v4043_v4 }
  0x5f   : > { %829 = vmatmul.mubr.bf16.gmra.mrb[24].mxu0 %v4423_v3  ;;  %1279 = vmatmul.mubr.bf16.gmra.mrb[24].mxu1 %v4298_v34 }
  0x60   : > { %836 = vmatprep.mubr.bf16.mxu0 %v4429_v5  ;;  %1286 = vmatprep.mubr.bf16.mxu1 %v4315_v39 }
  0x61   : > { %3677 = vmatpush3.bf16.msra.mxu1 %v4043_v4  ;;  %v4080_v4 = vld [vmem:[%s4242_s7 + $0x8] ss:$12 sps:$4 sm:$0xff]  }
  0x62   : > { %3678 = vmatprep.subr.bf16.mxu1 %v4050_v7 }
  0x65   : > { %3679 = vmatpush3.bf16.msra.mxu1 %v4050_v7  ;;  %v4079_v7 = vld [vmem:[%s4974_s1 + $0x1b8] sm:$0xff]  }
  0x66   : > { %3680 = vmatprep.subr.bf16.mxu1 %v4056_v8 }
  0x67   : > { %837 = vmatmul.mubr.bf16.gmra.mrb[28].mxu0 %v4445_v9  ;;  %1287 = vmatmul.mubr.bf16.gmra.mrb[28].mxu1 %v4330_v42 }
  0x68   : > { %844 = vmatprep.mubr.bf16.mxu0 %v4448_v10  ;;  %1294 = vmatprep.mubr.bf16.mxu1 %v4347_v47 }
  0x69   : > { %3681 = vmatpush3.bf16.msra.mxu1 %v4056_v8  ;;  %v4082_v8 = vld [vmem:[%s4974_s1 + $0x208] sm:$0xff]  }
  0x6a   : > { %3682 = vmatprep.subr.bf16.mxu1 %v4069_v11 }
  0x6d   : > { %3683 = vmatpush3.bf16.msra.mxu1 %v4069_v11  ;;  %v4083_v11 = vld [vmem:[%s4974_s1 + $0x210] sm:$0xff]  }
  0x6e   : > { %3716 = vmatprep.subr.bf16.mxu1 %v4476_v16 }
  0x6f   : > { %845 = vmatmul.mubr.bf16.gmra.mrb[32].mxu0 %v4458_v12  ;;  %1295 = vmatmul.mubr.bf16.gmra.mrb[32].mxu1 %v4364_v51 }
  0x70   : > { %852 = vmatprep.mubr.bf16.mxu0 %v4461_v13  ;;  %1302 = vmatprep.mubr.bf16.mxu1 %v4376_v55 }
  0x77   : > { %853 = vmatmul.mubr.bf16.gmra.mrb[36].mxu0 %v4468_v14  ;;  %1303 = vmatmul.mubr.bf16.gmra.mrb[36].mxu1 %v4391_v60 }
  0x78   : > { %860 = vmatprep.mubr.bf16.mxu0 %v4471_v15  ;;  %1310 = vmatprep.mubr.bf16.mxu1 %v4395_v61 }
  0x7f   : > { %861 = vmatmul.mubr.bf16.gmra.mrb[40].mxu0 %v4484_v17  ;;  %1311 = vmatmul.mubr.bf16.gmra.mrb[40].mxu1 %v4409_v0 }
  0x80   : > { %868 = vmatprep.mubr.bf16.mxu0 %v4487_v18  ;;  %1318 = vmatprep.mubr.bf16.mxu1 %v4413_v1 }
  0x87   : > { %869 = vmatmul.mubr.bf16.gmra.mrb[44].mxu0 %v4494_v19  ;;  %1319 = vmatmul.mubr.bf16.gmra.mrb[44].mxu1 %v4423_v3 }
  0x88   : > { %876 = vmatprep.mubr.bf16.mxu0 %v4497_v20  ;;  %1326 = vmatprep.mubr.bf16.mxu1 %v4429_v5 }
  0x8f   : > { %877 = vmatmul.mubr.bf16.gmra.mrb[48].mxu0 %v4504_v21  ;;  %1327 = vmatmul.mubr.bf16.gmra.mrb[48].mxu1 %v4445_v9 }
  0x90   : > { %884 = vmatprep.mubr.bf16.mxu0 %v4507_v22  ;;  %1334 = vmatprep.mubr.bf16.mxu1 %v4448_v10 }
  0x97   : > { %885 = vmatmul.mubr.bf16.gmra.mrb[52].mxu0 %v4514_v23  ;;  %1335 = vmatmul.mubr.bf16.gmra.mrb[52].mxu1 %v4458_v12 }
  0x98   : > { %892 = vmatprep.mubr.bf16.mxu0 %v4517_v25  ;;  %1342 = vmatprep.mubr.bf16.mxu1 %v4461_v13 }
  0x9f   : > { %893 = vmatmul.mubr.bf16.gmra.mrb[56].mxu0 %v4524_v26  ;;  %1343 = vmatmul.mubr.bf16.gmra.mrb[56].mxu1 %v4468_v14 }
  0xa0   : > { %900 = vmatprep.mubr.bf16.mxu0 %v4527_v27  ;;  %1350 = vmatprep.mubr.bf16.mxu1 %v4471_v15 }
  0xa7   : > { %901 = vmatmul.mubr.bf16.gmra.mrb[60].mxu0 %v4534_v29  ;;  %1351 = vmatmul.mubr.bf16.gmra.mrb[60].mxu1 %v4484_v17 }
  0xa8   : > { %3636 = vmatprep.mubr.bf16.mxu0 %v4054_v30  ;;  %1358 = vmatprep.mubr.bf16.mxu1 %v4487_v18 }
  0xaf   : > { %3637 = vmatmul.mubr.bf16.vlgmr.msra.gmra.mrb[64].mxu0 %v4055_v33  ;;  %1359 = vmatmul.mubr.bf16.gmra.mrb[64].mxu1 %v4494_v19 }
  0xb0   : > { %3485 = vmatpush3.bf16.msra.mxu0 %v4058_v35  ;;  %3640 = vmatprep.mubr.bf16.mxu0 %v4061_v37 }
  0xb1   : > { %3486 = vmatprep.subr.bf16.mxu0 %v4059_v38  ;;  %1366 = vmatprep.mubr.bf16.mxu1 %v4497_v20 }
  0xb4   : > { %3487 = vmatpush3.bf16.msra.mxu0 %v4060_v41 }
  0xb5   : > { %3488 = vmatprep.subr.bf16.mxu0 %v4063_v44  ;;  %v4095_v44 = vld [vmem:[%s4242_s7 + $0xc8] ss:$12 sps:$4 sm:$0xff]  }
  0xb7   : > { %3641 = vmatmul.mubr.bf16.gmra.mrb[68].mxu0 %v4062_v45  ;;  %1367 = vmatmul.mubr.bf16.gmra.mrb[68].mxu1 %v4504_v21 }
  0xb8   : > { %3489 = vmatpush3.bf16.msra.mxu0 %v4064_v46  ;;  %3644 = vmatprep.mubr.bf16.mxu0 %v4067_v49 }
  0xb9   : > { %3490 = vmatprep.subr.bf16.mxu0 %v4065_v50  ;;  %1374 = vmatprep.mubr.bf16.mxu1 %v4507_v22 }
  0xbc   : > { %3491 = vmatpush3.bf16.msra.mxu0 %v4066_v52  ;;  %v4096_v52 = vld [vmem:[%s4242_s7 + $0xe0] ss:$12 sps:$4 sm:$0xff]  }
  0xbd   : > { %3492 = vmatprep.subr.bf16.mxu0 %v4070_v53 }
  0xbf   : > { %3645 = vmatmul.mubr.bf16.gmra.mrb[72].mxu0 %v4068_v54  ;;  %1375 = vmatmul.mubr.bf16.gmra.mrb[72].mxu1 %v4514_v23 }
  0xc0   : > { %3493 = vmatpush3.bf16.msra.mxu0 %v4071_v56  ;;  %3648 = vmatprep.mubr.bf16.mxu0 %v4074_v57 }
  0xc1   : > { %3494 = vmatprep.subr.bf16.mxu0 %v4072_v58  ;;  %1382 = vmatprep.mubr.bf16.mxu1 %v4517_v25  ;;  %v4097_v58 = vld [vmem:[%s4242_s7 + $0xf8] ss:$12 sps:$4 sm:$0xff]  }
  0xc4   : > { %3495 = vmatpush3.bf16.msra.mxu0 %v4073_v59 }
  0xc5   : > { %3496 = vmatprep.subr.bf16.mxu0 %v4076_v62 }
  0xc7   : > { %3649 = vmatmul.mubr.bf16.gmra.mrb[76].mxu0 %v4075_v63  ;;  %1383 = vmatmul.mubr.bf16.gmra.mrb[76].mxu1 %v4524_v26 }
  0xc8   : > { %3497 = vmatpush3.bf16.msra.mxu0 %v4077_v2  ;;  %3684 = vmatprep.mubr.bf16.mxu1 %v4080_v4 }
  0xc9   : > { %3498 = vmatprep.subr.bf16.mxu0 %v4078_v6  ;;  %2097 = vmatprep.mubr.bf16.mxu0 %v4285_v31  ;;  %v4084_v31 = vld [vmem:[%s4974_s1 + $0x218] sm:$0xff]  }
  0xcc   : > { %3499 = vmatpush3.bf16.msra.mxu0 %v4079_v7  ;;  %v4098_v7 = vld [vmem:[%s4242_s7 + $0x110] ss:$12 sps:$4 sm:$0xff]  }
  0xcf   : > { %3685 = vmatmul.mubr.bf16.vlgmr.msra.gmra.mrb[80].mxu1 %v4054_v30  ;;  %2098 = vmatmul.mubr.bf16.vlgmr.msra.gmra.mrb[80].mxu0 %v4298_v34  ;;  %v4085_v34 = vld [vmem:[%s4974_s1 + $0x220] sm:$0xff]  }
  0xd0   : > { %3717 = vmatpush3.bf16.msra.mxu1 %v4476_v16  ;;  %3688 = vmatprep.mubr.bf16.mxu1 %v4055_v33  ;;  %v4093_v30 = vld [vmem:[%s4242_s7 + $0x98] ss:$12 sps:$4 sm:$0xff]  }
  0xd1   : > { %2105 = vmatprep.mubr.bf16.mxu0 %v4315_v39  ;;  %3718 = vmatprep.subr.bf16.mxu1 %v4082_v8  ;;  %v4086_v39 = vld [vmem:[%s4974_s1 + $0x228] sm:$0xff]  }
  0xd4   : > { %3719 = vmatpush3.bf16.msra.mxu1 %v4082_v8 }
  0xd5   : > { %3720 = vmatprep.subr.bf16.mxu1 %v4083_v11 }
  0xd7   : > { %3689 = vmatmul.mubr.bf16.gmra.mrb[84].mxu1 %v4061_v37  ;;  %2106 = vmatmul.mubr.bf16.gmra.mrb[84].mxu0 %v4330_v42  ;;  %v4087_v42 = vld [vmem:[%s4974_s1 + $0x230] sm:$0xff]  }
  0xd8   : > { %3692 = vmatprep.mubr.bf16.mxu1 %v4062_v45  ;;  %2113 = vmatprep.mubr.bf16.mxu0 %v4347_v47  ;;  %v4088_v47 = vld [vmem:[%s4974_s1 + $0x238] sm:$0xff]  }
  0xd9   : > { %3721 = vmatpush3.bf16.msra.mxu1 %v4083_v11  ;;  %v4094_v37 = vld [vmem:[%s4242_s7 + $0xb0] ss:$12 sps:$4 sm:$0xff]  }
  0xda   : > { %3722 = vmatprep.subr.bf16.mxu1 %v4084_v31 }
  0xdd   : > { %3723 = vmatpush3.bf16.msra.mxu1 %v4084_v31 }
  0xde   : > { %3724 = vmatprep.subr.bf16.mxu1 %v4085_v34 }
  0xdf   : > { %3693 = vmatmul.mubr.bf16.gmra.mrb[88].mxu1 %v4067_v49  ;;  %2114 = vmatmul.mubr.bf16.gmra.mrb[88].mxu0 %v4364_v51 }
  0xe0   : > { %3696 = vmatprep.mubr.bf16.mxu1 %v4068_v54  ;;  %2121 = vmatprep.mubr.bf16.mxu0 %v4376_v55  ;;  %v4089_v55 = vld [vmem:[%s4242_s7 + $0x38] ss:$12 sps:$4 sm:$0xff]  }
  0xe1   : > { %3725 = vmatpush3.bf16.msra.mxu1 %v4085_v34 }
  0xe2   : > { %3726 = vmatprep.subr.bf16.mxu1 %v4086_v39 }
  0xe5   : > { %3727 = vmatpush3.bf16.msra.mxu1 %v4086_v39  ;;  %v4099_v39 = vld [vmem:[%s4242_s7 + $0x128] ss:$12 sps:$4 sm:$0xff]  }
  0xe6   : > { %3728 = vmatprep.subr.bf16.mxu1 %v4087_v42 }
  0xe7   : > { %3697 = vmatmul.mubr.bf16.gmra.mrb[92].mxu1 %v4074_v57  ;;  %2122 = vmatmul.mubr.bf16.gmra.mrb[92].mxu0 %v4391_v60 }
  0xe8   : > { %3700 = vmatprep.mubr.bf16.mxu1 %v4075_v63  ;;  %2129 = vmatprep.mubr.bf16.mxu0 %v4395_v61  ;;  %v4090_v61 = vld [vmem:[%s4242_s7 + $0x50] ss:$12 sps:$4 sm:$0xff]  }
  0xe9   : > { %3729 = vmatpush3.bf16.msra.mxu1 %v4087_v42 }
  0xea   : > { %3730 = vmatprep.subr.bf16.mxu1 %v4088_v47 }
  0xed   : > { %3731 = vmatpush3.bf16.msra.mxu1 %v4088_v47 }
  0xef   : > { %3701 = vmatmul.mubr.bf16.gmra.mrb[0].mxu1 %v4258_v24  ;;  %2130 = vmatmul.mubr.bf16.gmra.mrb[96].mxu0 %v4409_v0 }
  0xf0   : > { %3704 = vmatprep.mubr.bf16.mxu1 %v4274_v28  ;;  %2137 = vmatprep.mubr.bf16.mxu0 %v4413_v1 }
  0xf7   : > { %3705 = vmatmul.mubr.bf16.gmra.mrb[4].mxu1 %v4288_v32  ;;  %2138 = vmatmul.mubr.bf16.gmra.mrb[100].mxu0 %v4423_v3  ;;  %v4091_v3 = vld [vmem:[%s4242_s7 + $0x68] ss:$12 sps:$4 sm:$0xff]  }
  0xf8   : > { %3708 = vmatprep.mubr.bf16.mxu1 %v4305_v36  ;;  %2145 = vmatprep.mubr.bf16.mxu0 %v4429_v5 }
  0xff   : > { %3709 = vmatmul.mubr.bf16.gmra.mrb[8].mxu1 %v4319_v40  ;;  %2146 = vmatmul.mubr.bf16.gmra.mrb[104].mxu0 %v4445_v9 }
 0x100   : > { %3712 = vmatprep.mubr.bf16.mxu1 %v4333_v43  ;;  %2153 = vmatprep.mubr.bf16.mxu0 %v4448_v10 }
 0x102   : > { %v3228_v24 = vpop.f32.mrb[0].mxu0 }
 0x103   : > { %v3229_v28 = vpop.f32.mrb[1].mxu0 }
 0x104   : > { %v4643_v51 = vadd.f32 %v3229_v28, %v3228_v24  ;;  %v3231_v32 = vpop.f32.mrb[2].mxu0 }
 0x105   : > { %v3232_v60 = vpop.f32.mrb[3].mxu0 }
 0x106   : > { %v4646_v36 = vadd.f32 %v3232_v60, %v3231_v32  ;;  %v4100_v60 = vld [vmem:[%s4242_s7 + $0x140] ss:$12 sps:$4 sm:$0xff]  }
 0x107   : > { %3713 = vmatmul.mubr.bf16.gmra.mrb[12].mxu1 %v4350_v48  ;;  %2154 = vmatmul.mubr.bf16.gmra.mrb[108].mxu0 %v4458_v12  ;;  %v4092_v12 = vld [vmem:[%s4242_s7 + $0x80] ss:$12 sps:$4 sm:$0xff]  }
 0x108   : > { %2161 = vmatprep.mubr.bf16.mxu0 %v4461_v13  ;;  %3732 = vmatprep.mubr.bf16.mxu1 %v4089_v55 }
 0x10a   : > { %v3234_v40 = vpop.f32.mrb[4].mxu0 }
 0x10b   : > { %v3235_v43 = vpop.f32.mrb[5].mxu0 }
 0x10c   : > { %v4652_v0 = vadd.f32 %v3235_v43, %v3234_v40  ;;  %v3237_v1 = vpop.f32.mrb[6].mxu0 }
 0x10d   : > { %v3238_v5 = vpop.f32.mrb[7].mxu0 }
 0x10e   : > { %v4655_v9 = vadd.f32 %v3238_v5, %v3237_v1 }
 0x10f   : > { %2162 = vmatmul.mubr.bf16.gmra.mrb[112].mxu0 %v4468_v14  ;;  %3733 = vmatmul.mubr.bf16.vlgmr.msra.gmra.mrb[80].mxu1 %v4090_v61 }
 0x110   : > { %2169 = vmatprep.mubr.bf16.mxu0 %v4471_v15  ;;  %3736 = vmatprep.mubr.bf16.mxu1 %v4091_v3  ;;  %v4101_v3 = vld [vmem:[%s4242_s7 + $0x158] ss:$12 sps:$4 sm:$0xff]  }
 0x112   : > { %v3240_v48 = vpop.f32.mrb[8].mxu0 }
 0x113   : > { %v3241_v10 = vpop.f32.mrb[9].mxu0 }
 0x114   : > { %v4660_v13 = vadd.f32 %v3241_v10, %v3240_v48  ;;  %v3243_v16 = vpop.f32.mrb[10].mxu0 }
 0x115   : > { %v3244_v33 = vpop.f32.mrb[11].mxu0 }
 0x116   : > { %v4663_v35 = vadd.f32 %v3244_v33, %v3243_v16  ;;  %v4102_v33 = vld [vmem:[%s4242_s7 + $0x170] ss:$12 sps:$4 sm:$0xff]  }
 0x117   : > { %2170 = vmatmul.mubr.bf16.gmra.mrb[116].mxu0 %v4484_v17  ;;  %3737 = vmatmul.mubr.bf16.gmra.mrb[84].mxu1 %v4092_v12 }
 0x118   : > { %2177 = vmatprep.mubr.bf16.mxu0 %v4487_v18  ;;  %3740 = vmatprep.mubr.bf16.mxu1 %v4093_v30 }
 0x11a   : > { %v3246_v14 = vpop.f32.mrb[12].mxu0 }
 0x11b   : > { %v3247_v15 = vpop.f32.mrb[13].mxu0 }
 0x11c   : > { %v4668_v38 = vadd.f32 %v3247_v15, %v3246_v14  ;;  %v3249_v41 = vpop.f32.mrb[14].mxu0 }
 0x11d   : > { %v3250_v45 = vpop.f32.mrb[15].mxu0 }
 0x11e   : > { %v4671_v46 = vadd.f32 %v3250_v45, %v3249_v41  ;;  %v4105_v45 = vld [vmem:[%s4242_s7 + $0x188] ss:$12 sps:$4 sm:$0xff]  }
 0x11f   : > { %2178 = vmatmul.mubr.bf16.gmra.mrb[120].mxu0 %v4494_v19  ;;  %3741 = vmatmul.mubr.bf16.gmra.mrb[88].mxu1 %v4094_v37 }
 0x120   : > { %2185 = vmatprep.mubr.bf16.mxu0 %v4497_v20  ;;  %3744 = vmatprep.mubr.bf16.mxu1 %v4095_v44  ;;  %v4103_v44 = vld [vmem:[%s4242_s7 + $0x19c] ss:$12 sps:$4 sm:$0xff]  }
 0x122   : > { %v3252_v17 = vpop.f32.mrb[16].mxu0  ;;  %v3364_v18 = vpop.f32.mrb[16].mxu1 }
 0x123   : > { %v3253_v49 = vpop.f32.mrb[17].mxu0  ;;  %v3365_v50 = vpop.f32.mrb[17].mxu1 }
 0x124   : > { %v4676_v53 = vadd.f32 %v3253_v49, %v3252_v17  ;;  %v4678_v54 = vadd.f32 %v3365_v50, %v3364_v18  ;;  %v3255_v56 = vpop.f32.mrb[18].mxu0  ;;  %v3367_v57 = vpop.f32.mrb[18].mxu1 }
 0x125   : > { %v3256_v59 = vpop.f32.mrb[19].mxu0  ;;  %v3368_v62 = vpop.f32.mrb[19].mxu1 }
 0x126   : > { %v4681_v19 = vadd.f32 %v3256_v59, %v3255_v56  ;;  %v4683_v20 = vadd.f32 %v3368_v62, %v3367_v57  ;;  %v4106_v57 = vld [vmem:[%s4242_s7 + $0x198] ss:$12 sps:$4 sm:$0xff]  }
 0x127   : > { %2186 = vmatmul.mubr.bf16.gmra.mrb[124].mxu0 %v4504_v21  ;;  %3745 = vmatmul.mubr.bf16.gmra.mrb[92].mxu1 %v4096_v52 }
 0x128   : > { %2193 = vmatprep.mubr.bf16.mxu0 %v4507_v22  ;;  %3748 = vmatprep.mubr.bf16.mxu1 %v4097_v58  ;;  %v4107_v58 = vld [vmem:[%s4242_s7 + $0x1a0] ss:$12 sps:$4 sm:$0xff]   ;;  %s3084_s7 = sshll.u32 %s4982_s13, 7 }
 0x129   : > { %s4901_s18 = scalar_lea.vmem %s4975_s2, %s3084_s7 }
 0x12a   : > { %v3258_v63 = vpop.f32.mrb[20].mxu0  ;;  %v3370_v2 = vpop.f32.mrb[20].mxu1 }
 0x12b   : > { %v3259_v4 = vpop.f32.mrb[21].mxu0  ;;  %v3371_v6 = vpop.f32.mrb[21].mxu1 }
 0x12c   : > { %v4688_v8 = vadd.f32 %v3259_v4, %v3258_v63  ;;  %v4690_v11 = vadd.f32 %v3371_v6, %v3370_v2  ;;  %v3261_v31 = vpop.f32.mrb[22].mxu0  ;;  %v3373_v34 = vpop.f32.mrb[22].mxu1 }
 0x12d   : > { %v3262_v42 = vpop.f32.mrb[23].mxu0  ;;  %v3374_v47 = vpop.f32.mrb[23].mxu1 }
 0x12e   : > { %v4693_v21 = vadd.f32 %v3262_v42, %v3261_v31  ;;  %v4695_v22 = vadd.f32 %v3374_v47, %v3373_v34 }
 0x12f   : > { %2194 = vmatmul.mubr.bf16.gmra.mrb[128].mxu0 %v4514_v23  ;;  %3749 = vmatmul.mubr.bf16.gmra.mrb[0].mxu1 %v4098_v7 }
 0x130   : > { %2201 = vmatprep.mubr.bf16.mxu0 %v4517_v25  ;;  %3752 = vmatprep.mubr.bf16.mxu1 %v4099_v39 }
 0x132   : > { %v3264_v24 = vpop.f32.mrb[24].mxu0  ;;  %v3376_v28 = vpop.f32.mrb[24].mxu1 }
 0x133   : > { %v3265_v32 = vpop.f32.mrb[25].mxu0  ;;  %v3377_v55 = vpop.f32.mrb[25].mxu1 }
 0x134   : > { %v4700_v40 = vadd.f32 %v3265_v32, %v3264_v24  ;;  %v4702_v43 = vadd.f32 %v3377_v55, %v3376_v28  ;;  %v3267_v61 = vpop.f32.mrb[26].mxu0  ;;  %v3379_v1 = vpop.f32.mrb[26].mxu1 }
 0x135   : > { %v3268_v5 = vpop.f32.mrb[27].mxu0  ;;  %v3380_v48 = vpop.f32.mrb[27].mxu1 }
 0x136   : > { %v4705_v23 = vadd.f32 %v3268_v5, %v3267_v61  ;;  %v4707_v25 = vadd.f32 %v3380_v48, %v3379_v1 }
 0x137   : > { %2202 = vmatmul.mubr.bf16.gmra.mrb[132].mxu0 %v4524_v26  ;;  %3753 = vmatmul.mubr.bf16.gmra.mrb[4].mxu1 %v4100_v60 }
 0x138   : > { %2209 = vmatprep.mubr.bf16.mxu0 %v4527_v27  ;;  %3756 = vmatprep.mubr.bf16.mxu1 %v4101_v3 }
 0x13a   : > { %v3270_v10 = vpop.f32.mrb[28].mxu0  ;;  %v3382_v12 = vpop.f32.mrb[28].mxu1 }
 0x13b   : > { %v3271_v16 = vpop.f32.mrb[29].mxu0  ;;  %v3383_v30 = vpop.f32.mrb[29].mxu1 }
 0x13c   : > { %v4712_v14 = vadd.f32 %v3271_v16, %v3270_v10  ;;  %v4714_v15 = vadd.f32 %v3383_v30, %v3382_v12  ;;  %v3273_v37 = vpop.f32.mrb[30].mxu0  ;;  %v3385_v41 = vpop.f32.mrb[30].mxu1 }
 0x13d   : > { %v3274_v26 = vpop.f32.mrb[31].mxu0  ;;  %v3386_v17 = vpop.f32.mrb[31].mxu1 }
 0x13e   : > { %v4718_v18 = vadd.f32 %v3274_v26, %v3273_v37  ;;  %v4720_v27 = vadd.f32 %v3386_v17, %v3385_v41 }
 0x13f   : > { %2210 = vmatmul.mubr.bf16.gmra.mrb[136].mxu0 %v4534_v29  ;;  %3757 = vmatmul.mubr.bf16.gmra.mrb[8].mxu1 %v4102_v33 }
 0x140   : > { %2217 = vmatprep.mubr.bf16.mxu0 %v4103_v44  ;;  %3760 = vmatprep.mubr.bf16.mxu1 %v4105_v45 }
 0x142   : > { %v3276_v49 = vpop.f32.mrb[32].mxu0  ;;  %v3388_v50 = vpop.f32.mrb[32].mxu1 }
 0x143   : > { %v3277_v52 = vpop.f32.mrb[33].mxu0  ;;  %v3389_v56 = vpop.f32.mrb[33].mxu1 }
 0x144   : > { %v3278_v59 = vadd.f32 %v3277_v52, %v3276_v49  ;;  %v4725_v62 = vadd.f32 %v3389_v56, %v3388_v50  ;;  %v3279_v63 = vpop.f32.mrb[34].mxu0  ;;  %v3391_v2 = vpop.f32.mrb[34].mxu1 }
 0x145   : > { %v3280_v4 = vpop.f32.mrb[35].mxu0  ;;  %v3392_v6 = vpop.f32.mrb[35].mxu1 }
 0x146   : > { %v3281_v7 = vadd.f32 %v3280_v4, %v3279_v63  ;;  %v4727_v31 = vadd.f32 %v3392_v6, %v3391_v2 }
 0x147   : > { %2218 = vmatmul.mubr.bf16.gmra.mrb[140].mxu0 %v4106_v57  ;;  %3761 = vmatmul.mubr.bf16.gmra.mrb[12].mxu1 %v4107_v58 }
 0x14a   : > { %v3282_v29 = vpop.f32.mrb[36].mxu0  ;;  %v3394_v34 = vpop.f32.mrb[36].mxu1 }
 0x14b   : > { %v3283_v39 = vpop.f32.mrb[37].mxu0  ;;  %v3395_v42 = vpop.f32.mrb[37].mxu1 }
 0x14c   : > { %v3284_v47 = vadd.f32 %v3283_v39, %v3282_v29  ;;  %v4729_v24 = vadd.f32 %v3395_v42, %v3394_v34  ;;  %v3285_v28 = vpop.f32.mrb[38].mxu0  ;;  %v3397_v32 = vpop.f32.mrb[38].mxu1 }
 0x14d   : > { %v3286_v55 = vpop.f32.mrb[39].mxu0  ;;  %v3398_v60 = vpop.f32.mrb[39].mxu1 }
 0x14e   : > { %v3287_v61 = vadd.f32 %v3286_v55, %v3285_v28  ;;  %v4731_v1 = vadd.f32 %v3398_v60, %v3397_v32 }
 0x152   : > { %v3288_v3 = vpop.f32.mrb[40].mxu0  ;;  %v3400_v5 = vpop.f32.mrb[40].mxu1 }
 0x153   : > { %v3289_v48 = vpop.f32.mrb[41].mxu0  ;;  %v3401_v10 = vpop.f32.mrb[41].mxu1 }
 0x154   : > { %v3290_v12 = vadd.f32 %v3289_v48, %v3288_v3  ;;  %v4733_v16 = vadd.f32 %v3401_v10, %v3400_v5  ;;  %v3291_v30 = vpop.f32.mrb[42].mxu0  ;;  %v3403_v33 = vpop.f32.mrb[42].mxu1 }
 0x155   : > { %v3292_v37 = vpop.f32.mrb[43].mxu0  ;;  %v3404_v41 = vpop.f32.mrb[43].mxu1 }
 0x156   : > { %v3293_v44 = vadd.f32 %v3292_v37, %v3291_v30  ;;  %v4735_v45 = vadd.f32 %v3404_v41, %v3403_v33 }
 0x15a   : > { %v3294_v26 = vpop.f32.mrb[44].mxu0  ;;  %v3406_v17 = vpop.f32.mrb[44].mxu1 }
 0x15b   : > { %v3295_v49 = vpop.f32.mrb[45].mxu0  ;;  %v3407_v50 = vpop.f32.mrb[45].mxu1 }
 0x15c   : > { %v3296_v52 = vadd.f32 %v3295_v49, %v3294_v26  ;;  %v4737_v56 = vadd.f32 %v3407_v50, %v3406_v17  ;;  %v3297_v57 = vpop.f32.mrb[46].mxu0  ;;  %v3409_v58 = vpop.f32.mrb[46].mxu1 }
 0x15d   : > { %v3298_v63 = vpop.f32.mrb[47].mxu0  ;;  %v3410_v2 = vpop.f32.mrb[47].mxu1 }
 0x15e   : > { %v3299_v4 = vadd.f32 %v3298_v63, %v3297_v57  ;;  %v4739_v6 = vadd.f32 %v3410_v2, %v3409_v58 }
 0x162   : > { %v3300_v29 = vpop.f32.mrb[48].mxu0  ;;  %v3412_v34 = vpop.f32.mrb[48].mxu1 }
 0x163   : > { %v3301_v39 = vpop.f32.mrb[49].mxu0  ;;  %v3413_v42 = vpop.f32.mrb[49].mxu1 }
 0x164   : > { %v4741_v28 = vadd.f32 %v3301_v39, %v3300_v29  ;;  %v3414_v32 = vadd.f32 %v3413_v42, %v3412_v34  ;;  %v3303_v55 = vpop.f32.mrb[50].mxu0  ;;  %v3415_v60 = vpop.f32.mrb[50].mxu1 }
 0x165   : > { %v3304_v3 = vpop.f32.mrb[51].mxu0  ;;  %v3416_v5 = vpop.f32.mrb[51].mxu1 }
 0x166   : > { %v4743_v48 = vadd.f32 %v3414_v32, %v3278_v59  ;;  %v4745_v10 = vadd.f32 %v3304_v3, %v3303_v55  ;;  %v3417_v30 = vadd.f32 %v3416_v5, %v3415_v60 }
 0x168   : > { %v4747_v33 = vadd.f32 %v3417_v30, %v3281_v7 }
 0x16a   : > { %v3306_v37 = vpop.f32.mrb[52].mxu0  ;;  %v3418_v41 = vpop.f32.mrb[52].mxu1 }
 0x16b   : > { %v3307_v26 = vpop.f32.mrb[53].mxu0  ;;  %v3419_v17 = vpop.f32.mrb[53].mxu1 }
 0x16c   : > { %v4749_v49 = vadd.f32 %v3307_v26, %v3306_v37  ;;  %v3420_v50 = vadd.f32 %v3419_v17, %v3418_v41  ;;  %v3309_v57 = vpop.f32.mrb[54].mxu0  ;;  %v3421_v58 = vpop.f32.mrb[54].mxu1 }
 0x16d   : > { %v3310_v63 = vpop.f32.mrb[55].mxu0  ;;  %v3422_v2 = vpop.f32.mrb[55].mxu1 }
 0x16e   : > { %v4751_v29 = vadd.f32 %v3420_v50, %v3284_v47  ;;  %v4753_v59 = vadd.f32 %v3310_v63, %v3309_v57  ;;  %v3423_v34 = vadd.f32 %v3422_v2, %v3421_v58 }
 0x170   : > { %v4755_v39 = vadd.f32 %v3423_v34, %v3287_v61 }
 0x172   : > { %4977 = vst [vmem:[#allocation2_spill] sm:$0xff] %v4755_v39  ;;  %v3312_v7 = vpop.f32.mrb[56].mxu0  ;;  %v3424_v42 = vpop.f32.mrb[56].mxu1 }
 0x173   : > { %v3313_v32 = vpop.f32.mrb[57].mxu0  ;;  %v3425_v55 = vpop.f32.mrb[57].mxu1 }
 0x174   : > { %v4757_v60 = vadd.f32 %v3313_v32, %v3312_v7  ;;  %v3426_v3 = vadd.f32 %v3425_v55, %v3424_v42  ;;  %v3315_v5 = vpop.f32.mrb[58].mxu0  ;;  %v3427_v30 = vpop.f32.mrb[58].mxu1 }
 0x175   : > { %v3316_v37 = vpop.f32.mrb[59].mxu0  ;;  %v3428_v41 = vpop.f32.mrb[59].mxu1 }
 0x176   : > { %v4759_v26 = vadd.f32 %v3426_v3, %v3290_v12  ;;  %v4761_v47 = vadd.f32 %v3316_v37, %v3315_v5  ;;  %v3429_v17 = vadd.f32 %v3428_v41, %v3427_v30 }
 0x178   : > { %v4763_v50 = vadd.f32 %v3429_v17, %v3293_v44 }
 0x17a   : > { %4978 = vst [vmem:[#allocation3_spill] sm:$0xff] %v4763_v50  ;;  %v3318_v61 = vpop.f32.mrb[60].mxu0  ;;  %v3430_v57 = vpop.f32.mrb[60].mxu1 }
 0x17b   : > { %v3319_v58 = vpop.f32.mrb[61].mxu0  ;;  %v3431_v63 = vpop.f32.mrb[61].mxu1 }
 0x17c   : > { %v4765_v2 = vadd.f32 %v3319_v58, %v3318_v61  ;;  %v3432_v34 = vadd.f32 %v3431_v63, %v3430_v57  ;;  %v3321_v7 = vpop.f32.mrb[62].mxu0  ;;  %v3433_v42 = vpop.f32.mrb[62].mxu1 }
 0x17d   : > { %v3322_v32 = vpop.f32.mrb[63].mxu0  ;;  %v3434_v55 = vpop.f32.mrb[63].mxu1 }
 0x17e   : > { %v4767_v39 = vadd.f32 %v3432_v34, %v3296_v52  ;;  %v4769_v12 = vadd.f32 %v3322_v32, %v3321_v7  ;;  %v3435_v3 = vadd.f32 %v3434_v55, %v3433_v42 }
 0x180   : > { %v4771_v5 = vadd.f32 %v3435_v3, %v3299_v4 }
 0x182   : > { %v3638_v44 = vpop.f32.mrb[64].mxu0  ;;  %v3436_v30 = vpop.f32.mrb[64].mxu1 }
 0x183   : > { %v952_v37 = vadd.f32 %v3638_v44, %v4652_v0  ;;  %v943_v41 = vpop.f32.mrb[65].mxu0  ;;  %v3437_v17 = vpop.f32.mrb[65].mxu1 }
 0x184   : > { %v944_v61 = vadd.f32 %v4643_v51, %v943_v41  ;;  %v3438_v57 = vadd.f32 %v3437_v17, %v3436_v30  ;;  %v3639_v58 = vpop.f32.mrb[66].mxu0  ;;  %v3439_v63 = vpop.f32.mrb[66].mxu1 }
 0x185   : > { %v4776_v50 = vadd.f32 %v4690_v11, %v952_v37  ;;  %v955_v52 = vadd.f32 %v3639_v58, %v4655_v9  ;;  %v946_v34 = vpop.f32.mrb[67].mxu0  ;;  %v3440_v7 = vpop.f32.mrb[67].mxu1 }
 0x186   : > { %v4780_v4 = vadd.f32 %v4678_v54, %v944_v61  ;;  %v4783_v42 = vadd.f32 %v3438_v57, %v4741_v28  ;;  %v947_v0 = vadd.f32 %v4646_v36, %v946_v34  ;;  %v3441_v32 = vadd.f32 %v3440_v7, %v3439_v63 }
 0x187   : > { %v4787_v51 = vadd.f32 %v4695_v22, %v955_v52 }
 0x188   : > { %v4790_v55 = vadd.f32 %v4683_v20, %v947_v0  ;;  %v4793_v11 = vadd.f32 %v3441_v32, %v4745_v10 }
 0x18a   : > { %v3642_v9 = vpop.f32.mrb[68].mxu0  ;;  %v3442_v3 = vpop.f32.mrb[68].mxu1 }
 0x18b   : > { %v968_v54 = vadd.f32 %v3642_v9, %v4668_v38  ;;  %v959_v44 = vpop.f32.mrb[69].mxu0  ;;  %v3443_v30 = vpop.f32.mrb[69].mxu1 }
 0x18c   : > { %v960_v28 = vadd.f32 %v4660_v13, %v959_v44  ;;  %v3444_v37 = vadd.f32 %v3443_v30, %v3442_v3  ;;  %v3643_v36 = vpop.f32.mrb[70].mxu0  ;;  %v3445_v41 = vpop.f32.mrb[70].mxu1 }
 0x18d   : > { %v4798_v22 = vadd.f32 %v4714_v15, %v968_v54  ;;  %v971_v20 = vadd.f32 %v3643_v36, %v4671_v46  ;;  %v962_v17 = vpop.f32.mrb[71].mxu0  ;;  %v3446_v61 = vpop.f32.mrb[71].mxu1 }
 0x18e   : > { %v4802_v10 = vadd.f32 %v4702_v43, %v960_v28  ;;  %v4805_v57 = vadd.f32 %v3444_v37, %v4749_v49  ;;  %v963_v38 = vadd.f32 %v4663_v35, %v962_v17  ;;  %v3447_v58 = vadd.f32 %v3446_v61, %v3445_v41 }
 0x18f   : > { %v4809_v13 = vadd.f32 %v4720_v27, %v971_v20 }
 0x190   : > { %v4812_v63 = vadd.f32 %v4707_v25, %v963_v38  ;;  %v4815_v15 = vadd.f32 %v3447_v58, %v4753_v59 }
 0x192   : > { %v3646_v46 = vpop.f32.mrb[72].mxu0  ;;  %v3448_v52 = vpop.f32.mrb[72].mxu1 }
 0x193   : > { %v984_v43 = vadd.f32 %v3646_v46, %v4688_v8  ;;  %v975_v34 = vpop.f32.mrb[73].mxu0  ;;  %v3449_v7 = vpop.f32.mrb[73].mxu1 }
 0x194   : > { %v976_v49 = vadd.f32 %v4676_v53, %v975_v34  ;;  %v3450_v0 = vadd.f32 %v3449_v7, %v3448_v52  ;;  %v3647_v35 = vpop.f32.mrb[74].mxu0  ;;  %v3451_v32 = vpop.f32.mrb[74].mxu1 }
 0x195   : > { %v4820_v27 = vadd.f32 %v4729_v24, %v984_v43  ;;  %v987_v25 = vadd.f32 %v3647_v35, %v4693_v21  ;;  %v978_v9 = vpop.f32.mrb[75].mxu0  ;;  %v3452_v3 = vpop.f32.mrb[75].mxu1 }
 0x196   : > { %v4824_v59 = vadd.f32 %v4725_v62, %v976_v49  ;;  %v4827_v54 = vadd.f32 %v3450_v0, %v4757_v60  ;;  %v979_v8 = vadd.f32 %v4681_v19, %v978_v9  ;;  %v3453_v44 = vadd.f32 %v3452_v3, %v3451_v32 }
 0x197   : > { %v4831_v53 = vadd.f32 %v4731_v1, %v987_v25 }
 0x198   : > { %v1300_v30 = vadd.f32 %v4727_v31, %v979_v8  ;;  %v4835_v24 = vadd.f32 %v3453_v44, %v4761_v47 }
 0x19a   : > { %v3650_v21 = vpop.f32.mrb[76].mxu0  ;;  %v3454_v28 = vpop.f32.mrb[76].mxu1 }
 0x19b   : > { %v1000_v37 = vadd.f32 %v3650_v21, %v4712_v14  ;;  %v991_v62 = vpop.f32.mrb[77].mxu0  ;;  %v3455_v36 = vpop.f32.mrb[77].mxu1 }
 0x19c   : > { %v992_v60 = vadd.f32 %v4700_v40, %v991_v62  ;;  %v3456_v41 = vadd.f32 %v3455_v36, %v3454_v28  ;;  %v3651_v20 = vpop.f32.mrb[78].mxu0  ;;  %v3457_v19 = vpop.f32.mrb[78].mxu1 }
 0x19d   : > { %v4840_v17 = vadd.f32 %v4737_v56, %v1000_v37  ;;  %v1003_v1 = vadd.f32 %v3651_v20, %v4718_v18  ;;  %v994_v31 = vpop.f32.mrb[79].mxu0  ;;  %v3458_v61 = vpop.f32.mrb[79].mxu1 }
 0x19e   : > { %v1313_v47 = vadd.f32 %v4733_v16, %v992_v60  ;;  %v4845_v38 = vadd.f32 %v3456_v41, %v4765_v2  ;;  %v995_v14 = vadd.f32 %v4705_v23, %v994_v31  ;;  %v3459_v58 = vadd.f32 %v3458_v61, %v3457_v19 }
 0x19f   : > { %v4849_v40 = vadd.f32 %v4739_v6, %v1003_v1 }
 0x1a0   : > { %v1316_v46 = vadd.f32 %v4735_v45, %v995_v14  ;;  %v4853_v56 = vadd.f32 %v3459_v58, %v4769_v12 }
 0x1a2   : > { %v3500_v52 = vpop.f32.mrb[80].mxu0 }
 0x1a3   : > { %v3501_v18 = vpop.f32.mrb[81].mxu0 }
 0x1a4   : > { %v3502_v43 = vadd.f32 %v3501_v18, %v3500_v52  ;;  %v3503_v34 = vpop.f32.mrb[82].mxu0 }
 0x1a5   : > { %v3504_v7 = vpop.f32.mrb[83].mxu0 }
 0x1a6   : > { %v3505_v16 = vadd.f32 %v3504_v7, %v3503_v34  ;;  %v4856_v2 = vadd.f32 %v3502_v43, %v4780_v4 }
 0x1a8   : > { %v4859_v23 = vadd.f32 %v3505_v16, %v4790_v55 }
 0x1aa   : > { %v3506_v49 = vpop.f32.mrb[84].mxu0 }
 0x1ab   : > { %v3507_v6 = vpop.f32.mrb[85].mxu0 }
 0x1ac   : > { %v3508_v0 = vadd.f32 %v3507_v6, %v3506_v49  ;;  %v3509_v35 = vpop.f32.mrb[86].mxu0 }
 0x1ad   : > { %v3510_v45 = vpop.f32.mrb[87].mxu0 }
 0x1ae   : > { %v3511_v32 = vadd.f32 %v3510_v45, %v3509_v35  ;;  %v3782_v12 = vadd.f32 %v3508_v0, %v4776_v50 }
 0x1b0   : > { %v3790_v25 = vadd.f32 %v3511_v32, %v4787_v51 }
 0x1b2   : > { %v3512_v9 = vpop.f32.mrb[88].mxu0 }
 0x1b3   : > { %v3513_v3 = vpop.f32.mrb[89].mxu0 }
 0x1b4   : > { %v3514_v8 = vadd.f32 %v3513_v3, %v3512_v9  ;;  %v3515_v44 = vpop.f32.mrb[90].mxu0 }
 0x1b5   : > { %v3516_v21 = vpop.f32.mrb[91].mxu0 }
 0x1b6   : > { %v3517_v4 = vadd.f32 %v3516_v21, %v3515_v44  ;;  %v4864_v28 = vadd.f32 %v3514_v8, %v4802_v10 }
 0x1b8   : > { %v4867_v55 = vadd.f32 %v3517_v4, %v4812_v63 }
 0x1ba   : > { %v3518_v37 = vpop.f32.mrb[92].mxu0 }
 0x1bb   : > { %v3519_v62 = vpop.f32.mrb[93].mxu0 }
 0x1bc   : > { %v3520_v36 = vadd.f32 %v3519_v62, %v3518_v37  ;;  %v3521_v60 = vpop.f32.mrb[94].mxu0 }
 0x1bd   : > { %v3522_v41 = vpop.f32.mrb[95].mxu0 }
 0x1be   : > { %v3523_v50 = vadd.f32 %v3522_v41, %v3521_v60  ;;  %v4870_v51 = vadd.f32 %v3520_v36, %v4798_v22 }
 0x1c0   : > { %v4873_v20 = vadd.f32 %v3523_v50, %v4809_v13 }
 0x1c2   : > { %v3524_v19 = vpop.f32.mrb[96].mxu0 }
 0x1c3   : > { %v3525_v1 = vpop.f32.mrb[97].mxu0 }
 0x1c4   : > { %v3526_v31 = vadd.f32 %v3525_v1, %v3524_v19  ;;  %v3527_v10 = vpop.f32.mrb[98].mxu0 }
 0x1c5   : > { %v3528_v61 = vpop.f32.mrb[99].mxu0 }
 0x1c6   : > { %v3529_v14 = vadd.f32 %v3528_v61, %v3527_v10  ;;  %v4876_v63 = vadd.f32 %v3526_v31, %v4824_v59 }
 0x1c8   : > { %v4878_v58 = vadd.f32 %v3529_v14, %v1300_v30 }
 0x1ca   : > { %v3530_v52 = vpop.f32.mrb[100].mxu0 }
 0x1cb   : > { %v3531_v18 = vpop.f32.mrb[101].mxu0 }
 0x1cc   : > { %v3532_v43 = vadd.f32 %v3531_v18, %v3530_v52  ;;  %v3533_v34 = vpop.f32.mrb[102].mxu0 }
 0x1cd   : > { %v3534_v22 = vpop.f32.mrb[103].mxu0 }
 0x1ce   : > { %v3535_v7 = vadd.f32 %v3534_v22, %v3533_v34  ;;  %v4881_v13 = vadd.f32 %v3532_v43, %v4820_v27 }
 0x1d0   : > { %v4884_v16 = vadd.f32 %v3535_v7, %v4831_v53 }
 0x1d2   : > { %v3536_v49 = vpop.f32.mrb[104].mxu0 }
 0x1d3   : > { %v3537_v6 = vpop.f32.mrb[105].mxu0 }
 0x1d4   : > { %v3538_v0 = vadd.f32 %v3537_v6, %v3536_v49  ;;  %v3539_v35 = vpop.f32.mrb[106].mxu0 }
 0x1d5   : > { %v3540_v59 = vpop.f32.mrb[107].mxu0 }
 0x1d6   : > { %v3541_v45 = vadd.f32 %v3540_v59, %v3539_v35  ;;  %v4886_v30 = vadd.f32 %v3538_v0, %v1313_v47 }
 0x1d8   : > { %v4888_v32 = vadd.f32 %v3541_v45, %v1316_v46 }
 0x1da   : > { %v3542_v9 = vpop.f32.mrb[108].mxu0 }
 0x1db   : > { %v3543_v3 = vpop.f32.mrb[109].mxu0 }
 0x1dc   : > { %v3544_v8 = vadd.f32 %v3543_v3, %v3542_v9  ;;  %v3545_v44 = vpop.f32.mrb[110].mxu0 }
 0x1dd   : > { %v3546_v27 = vpop.f32.mrb[111].mxu0 }
 0x1de   : > { %v3547_v21 = vadd.f32 %v3546_v27, %v3545_v44  ;;  %v4891_v53 = vadd.f32 %v3544_v8, %v4840_v17 }
 0x1e0   : > { %v4894_v4 = vadd.f32 %v3547_v21, %v4849_v40 }
 0x1e2   : > { %v3548_v37 = vpop.f32.mrb[112].mxu0  ;;  %v3734_v62 = vpop.f32.mrb[80].mxu1 }
 0x1e3   : > { %v3783_v36 = vadd.f32 %v3782_v12, %v3734_v62  ;;  %v3549_v60 = vpop.f32.mrb[113].mxu0  ;;  %v2260_v47 = vpop.f32.mrb[81].mxu1 }
 0x1e4   : > { %v3550_v46 = vadd.f32 %v3549_v60, %v3548_v37  ;;  %v3787_v41 = vadd.f32 %v4856_v2, %v2260_v47  ;;  %v3551_v50 = vpop.f32.mrb[114].mxu0  ;;  %v3735_v19 = vpop.f32.mrb[82].mxu1 }
 0x1e5   : > { %v3791_v1 = vadd.f32 %v3790_v25, %v3735_v19  ;;  %v3552_v31 = vpop.f32.mrb[115].mxu0  ;;  %v2263_v10 = vpop.f32.mrb[83].mxu1  ;;  %v2618_v43 = vmul.f32 %v3783_v36, %v3783_v36 }
 0x1e6   : > { %v3553_v17 = vadd.f32 %v3552_v31, %v3551_v50  ;;  %v3795_v40 = vadd.f32 %v4859_v23, %v2263_v10  ;;  %v4905_v12 = vadd.f32 %v4743_v48, %v3550_v46  ;;  %v2616_v61 = vmul.f32 %v3787_v41, %v3787_v41  ;;  %v4979_v46 = vld [vmem:[#allocation2_spill] sm:$0xff] }
 0x1e7   : > { %v3125_v2 = vpack.c.bf16 %v3791_v1, %v3783_v36  ;;  %v2619_v6 = vmul.f32 %v3791_v1, %v3791_v1 }
 0x1e8   : > { %v3120_v14 = vpack.c.bf16 %v3795_v40, %v3787_v41  ;;  %v2579_v52 = vadd.f32 %v3795_v40, %v3787_v41  ;;  %v2617_v25 = vmul.f32 %v3795_v40, %v3795_v40  ;;  %v4908_v18 = vadd.f32 %v4747_v33, %v3553_v17 }
 0x1e9   : > { %3197 = vst [vmem:[%s4901_s18 + $0x8] sm:$0xff] %v3125_v2  }
 0x1ea   : > { %3121 = vst [vmem:[%s4901_s18] sm:$0xff] %v3120_v14   ;;  %v2580_v34 = vadd.f32 %v3783_v36, %v2579_v52  ;;  %v2648_v22 = vadd.f32 %v2617_v25, %v2616_v61  ;;  %v3554_v7 = vpop.f32.mrb[116].mxu0  ;;  %v3738_v49 = vpop.f32.mrb[84].mxu1 }
 0x1eb   : > { %v3799_v23 = vadd.f32 %v4870_v51, %v3738_v49  ;;  %v3555_v48 = vpop.f32.mrb[117].mxu0  ;;  %v2276_v0 = vpop.f32.mrb[85].mxu1 }
 0x1ec   : > { %v2649_v35 = vadd.f32 %v2648_v22, %v2618_v43  ;;  %v3556_v59 = vadd.f32 %v3555_v48, %v3554_v7  ;;  %v3803_v45 = vadd.f32 %v4864_v28, %v2276_v0  ;;  %v2581_v9 = vadd.f32 %v3791_v1, %v2580_v34  ;;  %v3557_v33 = vpop.f32.mrb[118].mxu0  ;;  %v3739_v3 = vpop.f32.mrb[86].mxu1 }
 0x1ed   : > { %v3807_v8 = vadd.f32 %v4873_v20, %v3739_v3  ;;  %v3558_v44 = vpop.f32.mrb[119].mxu0  ;;  %v2279_v27 = vpop.f32.mrb[87].mxu1  ;;  %v2622_v10 = vmul.f32 %v3799_v23, %v3799_v23 }
 0x1ee   : > { %v2582_v21 = vadd.f32 %v3803_v45, %v2581_v9  ;;  %v2620_v37 = vmul.f32 %v3803_v45, %v3803_v45  ;;  %v2650_v62 = vadd.f32 %v2649_v35, %v2619_v6  ;;  %v3559_v36 = vadd.f32 %v3558_v44, %v3557_v33  ;;  %v4980_v33 = vld [vmem:[#allocation3_spill] sm:$0xff] }
 0x1ef   : > { %v3135_v51 = vpack.c.bf16 %v3807_v8, %v3799_v23  ;;  %v3811_v60 = vadd.f32 %v4867_v55, %v2279_v27  ;;  %v4917_v47 = vadd.f32 %v4751_v29, %v3556_v59  ;;  %v2623_v43 = vmul.f32 %v3807_v8, %v3807_v8 }
 0x1f0   : > { %v2651_v28 = vadd.f32 %v2650_v62, %v2620_v37  ;;  %v4920_v41 = vadd.f32 %v4979_v46, %v3559_v36 }
 0x1f1   : > { %3199 = vst [vmem:[%s4901_s18 + $0x18] sm:$0xff] %v3135_v51   ;;  %v3130_v50 = vpack.c.bf16 %v3811_v60, %v3803_v45  ;;  %v2583_v20 = vadd.f32 %v3811_v60, %v2582_v21  ;;  %v2621_v19 = vmul.f32 %v3811_v60, %v3811_v60 }
 0x1f2   : > { %v3560_v1 = vpop.f32.mrb[120].mxu0  ;;  %v3742_v31 = vpop.f32.mrb[88].mxu1 }
 0x1f3   : > { %3198 = vst [vmem:[%s4901_s18 + $0x10] sm:$0xff] %v3130_v50   ;;  %v2584_v17 = vadd.f32 %v3799_v23, %v2583_v20  ;;  %v2652_v40 = vadd.f32 %v2651_v28, %v2621_v19  ;;  %v3815_v61 = vadd.f32 %v4881_v13, %v3742_v31  ;;  %v3561_v55 = vpop.f32.mrb[121].mxu0  ;;  %v2292_v2 = vpop.f32.mrb[89].mxu1 }
 0x1f4   : > { %v3562_v29 = vadd.f32 %v3561_v55, %v3560_v1  ;;  %v3819_v14 = vadd.f32 %v4876_v63, %v2292_v2  ;;  %v3563_v52 = vpop.f32.mrb[122].mxu0  ;;  %v3743_v25 = vpop.f32.mrb[90].mxu1 }
 0x1f5   : > { %v2653_v34 = vadd.f32 %v2652_v40, %v2622_v10  ;;  %v2585_v22 = vadd.f32 %v3807_v8, %v2584_v17  ;;  %v3823_v7 = vadd.f32 %v4884_v16, %v3743_v25  ;;  %v3564_v49 = vpop.f32.mrb[123].mxu0  ;;  %v2295_v6 = vpop.f32.mrb[91].mxu1  ;;  %v2626_v21 = vmul.f32 %v3815_v61, %v3815_v61 }
 0x1f6   : > { %v2624_v23 = vmul.f32 %v3819_v14, %v3819_v14  ;;  %v3565_v48 = vadd.f32 %v3564_v49, %v3563_v52  ;;  %v3827_v13 = vadd.f32 %v4878_v58, %v2295_v6  ;;  %v4929_v0 = vadd.f32 %v4759_v26, %v3562_v29 }
 0x1f7   : > { %v2586_v35 = vadd.f32 %v3819_v14, %v2585_v22  ;;  %v2654_v63 = vadd.f32 %v2653_v34, %v2623_v43  ;;  %v3145_v59 = vpack.c.bf16 %v3823_v7, %v3815_v61  ;;  %v2627_v50 = vmul.f32 %v3823_v7, %v3823_v7 }
 0x1f8   : > { %v3140_v45 = vpack.c.bf16 %v3827_v13, %v3819_v14  ;;  %v2625_v9 = vmul.f32 %v3827_v13, %v3827_v13  ;;  %v4932_v3 = vadd.f32 %v4980_v33, %v3565_v48 }
 0x1f9   : > { %v2655_v8 = vadd.f32 %v2654_v63, %v2624_v23  ;;  %3201 = vst [vmem:[%s4901_s18 + $0x28] sm:$0xff] %v3145_v59   ;;  %v2587_v16 = vadd.f32 %v3827_v13, %v2586_v35 }
 0x1fa   : > { %3200 = vst [vmem:[%s4901_s18 + $0x20] sm:$0xff] %v3140_v45   ;;  %v3566_v44 = vpop.f32.mrb[124].mxu0  ;;  %v3746_v27 = vpop.f32.mrb[92].mxu1 }
 0x1fb   : > { %v2588_v37 = vadd.f32 %v3815_v61, %v2587_v16  ;;  %v2656_v58 = vadd.f32 %v2655_v8, %v2625_v9  ;;  %v3831_v26 = vadd.f32 %v4891_v53, %v3746_v27  ;;  %v3567_v62 = vpop.f32.mrb[125].mxu0  ;;  %v2308_v36 = vpop.f32.mrb[93].mxu1 }
 0x1fc   : > { %v3568_v51 = vadd.f32 %v3567_v62, %v3566_v44  ;;  %v3835_v60 = vadd.f32 %v4886_v30, %v2308_v36  ;;  %v3569_v28 = vpop.f32.mrb[126].mxu0  ;;  %v3747_v46 = vpop.f32.mrb[94].mxu1 }
 0x1fd   : > { %v2657_v20 = vadd.f32 %v2656_v58, %v2626_v21  ;;  %v2589_v19 = vadd.f32 %v3823_v7, %v2588_v37  ;;  %v3839_v1 = vadd.f32 %v4894_v4, %v3747_v46  ;;  %v3570_v31 = vpop.f32.mrb[127].mxu0  ;;  %v2311_v10 = vpop.f32.mrb[95].mxu1  ;;  %v2630_v22 = vmul.f32 %v3831_v26, %v3831_v26 }
 0x1fe   : > { %v2628_v17 = vmul.f32 %v3835_v60, %v3835_v60  ;;  %v3571_v40 = vadd.f32 %v3570_v31, %v3569_v28  ;;  %v3843_v53 = vadd.f32 %v4888_v32, %v2311_v10  ;;  %v3857_v61 = vadd.f32 %v4767_v39, %v3568_v51 }
 0x1ff   : > { %v2590_v55 = vadd.f32 %v3835_v60, %v2589_v19  ;;  %v2658_v2 = vadd.f32 %v2657_v20, %v2627_v50  ;;  %v3155_v30 = vpack.c.bf16 %v3839_v1, %v3831_v26  ;;  %v2631_v63 = vmul.f32 %v3839_v1, %v3839_v1 }
 0x200   : > { %v3150_v29 = vpack.c.bf16 %v3843_v53, %v3835_v60  ;;  %v2629_v14 = vmul.f32 %v3843_v53, %v3843_v53  ;;  %v3863_v52 = vadd.f32 %v4771_v5, %v3571_v40 }
 0x201   : > { %v2659_v25 = vadd.f32 %v2658_v2, %v2628_v17  ;;  %3203 = vst [vmem:[%s4901_s18 + $0x38] sm:$0xff] %v3155_v30   ;;  %v2591_v43 = vadd.f32 %v3843_v53, %v2590_v55 }
 0x202   : > { %3202 = vst [vmem:[%s4901_s18 + $0x30] sm:$0xff] %v3150_v29   ;;  %v3572_v4 = vpop.f32.mrb[128].mxu0  ;;  %v3750_v34 = vpop.f32.mrb[0].mxu1 }
 0x203   : > { %v2592_v7 = vadd.f32 %v3831_v26, %v2591_v43  ;;  %v2660_v49 = vadd.f32 %v2659_v25, %v2629_v14  ;;  %v3846_v32 = vadd.f32 %v4917_v47, %v3750_v34  ;;  %v3573_v6 = vpop.f32.mrb[129].mxu0  ;;  %v2324_v39 = vpop.f32.mrb[1].mxu1 }
 0x204   : > { %v3574_v23 = vadd.f32 %v3573_v6, %v3572_v4  ;;  %v3849_v48 = vadd.f32 %v4905_v12, %v2324_v39  ;;  %v3575_v13 = vpop.f32.mrb[130].mxu0  ;;  %v3751_v35 = vpop.f32.mrb[2].mxu1 }
 0x205   : > { %v2661_v5 = vadd.f32 %v2660_v49, %v2630_v22  ;;  %v2593_v59 = vadd.f32 %v3839_v1, %v2592_v7  ;;  %v3852_v45 = vadd.f32 %v4920_v41, %v3751_v35  ;;  %v3576_v9 = vpop.f32.mrb[131].mxu0  ;;  %v2327_v33 = vpop.f32.mrb[3].mxu1  ;;  %v2634_v60 = vmul.f32 %v3846_v32, %v3846_v32 }
 0x206   : > { %v2632_v8 = vmul.f32 %v3849_v48, %v3849_v48  ;;  %v3577_v16 = vadd.f32 %v3576_v9, %v3575_v13  ;;  %v3855_v47 = vadd.f32 %v4908_v18, %v2327_v33  ;;  %v3872_v44 = vadd.f32 %v4783_v42, %v3574_v23 }
 0x207   : > { %v2594_v27 = vadd.f32 %v3849_v48, %v2593_v59  ;;  %v2662_v21 = vadd.f32 %v2661_v5, %v2631_v63  ;;  %v3165_v12 = vpack.c.bf16 %v3852_v45, %v3846_v32  ;;  %v2635_v10 = vmul.f32 %v3852_v45, %v3852_v45 }
 0x208   : > { %v3160_v37 = vpack.c.bf16 %v3855_v47, %v3849_v48  ;;  %v2633_v58 = vmul.f32 %v3855_v47, %v3855_v47  ;;  %v3878_v26 = vadd.f32 %v4793_v11, %v3577_v16 }
 0x209   : > { %v2663_v62 = vadd.f32 %v2662_v21, %v2632_v8  ;;  %3205 = vst [vmem:[%s4901_s18 + $0x48] sm:$0xff] %v3165_v12   ;;  %v2595_v36 = vadd.f32 %v3855_v47, %v2594_v27 }
 0x20a   : > { %3204 = vst [vmem:[%s4901_s18 + $0x40] sm:$0xff] %v3160_v37   ;;  %v3578_v41 = vpop.f32.mrb[132].mxu0  ;;  %v3754_v51 = vpop.f32.mrb[4].mxu1 }
 0x20b   : > { %v2596_v28 = vadd.f32 %v3846_v32, %v2595_v36  ;;  %v2664_v46 = vadd.f32 %v2663_v62, %v2633_v58  ;;  %v3858_v50 = vadd.f32 %v3857_v61, %v3754_v51  ;;  %v3579_v18 = vpop.f32.mrb[133].mxu0  ;;  %v2340_v20 = vpop.f32.mrb[5].mxu1 }
 0x20c   : > { %v3580_v42 = vadd.f32 %v3579_v18, %v3578_v41  ;;  %v3861_v19 = vadd.f32 %v4929_v0, %v2340_v20  ;;  %v3581_v1 = vpop.f32.mrb[134].mxu0  ;;  %v3755_v31 = vpop.f32.mrb[6].mxu1 }
 0x20d   : > { %v2665_v17 = vadd.f32 %v2664_v46, %v2634_v60  ;;  %v2597_v11 = vadd.f32 %v3852_v45, %v2596_v28  ;;  %v3864_v40 = vadd.f32 %v3863_v52, %v3755_v31  ;;  %v3582_v53 = vpop.f32.mrb[135].mxu0  ;;  %v2343_v55 = vpop.f32.mrb[7].mxu1  ;;  %v2638_v32 = vmul.f32 %v3858_v50, %v3858_v50 }
 0x20e   : > { %v2636_v2 = vmul.f32 %v3861_v19, %v3861_v19  ;;  %v3583_v30 = vadd.f32 %v3582_v53, %v3581_v1  ;;  %v3867_v29 = vadd.f32 %v4932_v3, %v2343_v55  ;;  %v3869_v61 = vadd.f32 %v4805_v57, %v3580_v42 }
 0x20f   : > { %v2598_v14 = vadd.f32 %v3861_v19, %v2597_v11  ;;  %v2666_v25 = vadd.f32 %v2665_v17, %v2635_v10  ;;  %v3175_v43 = vpack.c.bf16 %v3864_v40, %v3858_v50  ;;  %v2639_v5 = vmul.f32 %v3864_v40, %v3864_v40 }
 0x210   : > { %v3170_v0 = vpack.c.bf16 %v3867_v29, %v3861_v19  ;;  %v2637_v4 = vmul.f32 %v3867_v29, %v3867_v29  ;;  %v3875_v34 = vadd.f32 %v4815_v15, %v3583_v30 }
 0x211   : > { %v2667_v22 = vadd.f32 %v2666_v25, %v2636_v2  ;;  %3207 = vst [vmem:[%s4901_s18 + $0x58] sm:$0xff] %v3175_v43   ;;  %v2599_v7 = vadd.f32 %v3867_v29, %v2598_v14 }
 0x212   : > { %3206 = vst [vmem:[%s4901_s18 + $0x50] sm:$0xff] %v3170_v0   ;;  %v3584_v52 = vpop.f32.mrb[136].mxu0  ;;  %v3758_v49 = vpop.f32.mrb[8].mxu1 }
 0x213   : > { %v2600_v6 = vadd.f32 %v3858_v50, %v2599_v7  ;;  %v2668_v39 = vadd.f32 %v2667_v22, %v2637_v4  ;;  %v3870_v23 = vadd.f32 %v3869_v61, %v3758_v49  ;;  %v3585_v3 = vpop.f32.mrb[137].mxu0  ;;  %v2356_v48 = vpop.f32.mrb[9].mxu1 }
 0x214   : > { %v3586_v57 = vadd.f32 %v3585_v3, %v3584_v52  ;;  %v3873_v13 = vadd.f32 %v3872_v44, %v2356_v48  ;;  %v3587_v35 = vpop.f32.mrb[138].mxu0  ;;  %v3759_v63 = vpop.f32.mrb[10].mxu1 }
 0x215   : > { %v2669_v59 = vadd.f32 %v2668_v39, %v2638_v32  ;;  %v2601_v15 = vadd.f32 %v3864_v40, %v2600_v6  ;;  %v3876_v45 = vadd.f32 %v3875_v34, %v3759_v63  ;;  %v3588_v9 = vpop.f32.mrb[139].mxu0  ;;  %v2359_v33 = vpop.f32.mrb[11].mxu1  ;;  %v2642_v28 = vmul.f32 %v3870_v23, %v3870_v23 }
 0x216   : > { %v2640_v8 = vmul.f32 %v3873_v13, %v3873_v13  ;;  %v3589_v16 = vadd.f32 %v3588_v9, %v3587_v35  ;;  %v3879_v47 = vadd.f32 %v3878_v26, %v2359_v33  ;;  %v3884_v27 = vadd.f32 %v4827_v54, %v3586_v57 }
 0x217   : > { %v2602_v21 = vadd.f32 %v3873_v13, %v2601_v15  ;;  %v2670_v12 = vadd.f32 %v2669_v59, %v2639_v5  ;;  %v3185_v37 = vpack.c.bf16 %v3876_v45, %v3870_v23  ;;  %v2643_v1 = vmul.f32 %v3876_v45, %v3876_v45 }
 0x218   : > { %v3180_v58 = vpack.c.bf16 %v3879_v47, %v3873_v13  ;;  %v2641_v44 = vmul.f32 %v3879_v47, %v3879_v47  ;;  %v3890_v62 = vadd.f32 %v4835_v24, %v3589_v16 }
 0x219   : > { %v2671_v36 = vadd.f32 %v2670_v12, %v2640_v8  ;;  %3209 = vst [vmem:[%s4901_s18 + $0x68] sm:$0xff] %v3185_v37   ;;  %v2603_v41 = vadd.f32 %v3879_v47, %v2602_v21 }
 0x21a   : > { %3208 = vst [vmem:[%s4901_s18 + $0x60] sm:$0xff] %v3180_v58   ;;  %v3590_v51 = vpop.f32.mrb[140].mxu0  ;;  %v3762_v60 = vpop.f32.mrb[12].mxu1 }
 0x21b   : > { %v2604_v46 = vadd.f32 %v3870_v23, %v2603_v41  ;;  %v2672_v50 = vadd.f32 %v2671_v36, %v2641_v44  ;;  %v3591_v18 = vpop.f32.mrb[141].mxu0  ;;  %v2372_v26 = vpop.f32.mrb[13].mxu1 }
 0x21c   : > { %v3592_v20 = vadd.f32 %v3591_v18, %v3590_v51  ;;  %v3885_v54 = vadd.f32 %v3884_v27, %v2372_v26  ;;  %v3593_v42 = vpop.f32.mrb[142].mxu0  ;;  %v3763_v19 = vpop.f32.mrb[14].mxu1 }
 0x21d   : > { %v2673_v31 = vadd.f32 %v2672_v50, %v2642_v28  ;;  %v2605_v10 = vadd.f32 %v3876_v45, %v2604_v46  ;;  %v3594_v17 = vpop.f32.mrb[143].mxu0  ;;  %v2375_v24 = vpop.f32.mrb[15].mxu1 }
 0x21e   : > { %v3881_v11 = vadd.f32 %v4845_v38, %v3592_v20  ;;  %v2644_v40 = vmul.f32 %v3885_v54, %v3885_v54  ;;  %v3595_v53 = vadd.f32 %v3594_v17, %v3593_v42  ;;  %v3891_v55 = vadd.f32 %v3890_v62, %v2375_v24 }
 0x21f   : > { %v2606_v2 = vadd.f32 %v3885_v54, %v2605_v10  ;;  %v2674_v30 = vadd.f32 %v2673_v31, %v2643_v1 }
 0x220   : > { %v3882_v29 = vadd.f32 %v3881_v11, %v3762_v60  ;;  %v3887_v61 = vadd.f32 %v4853_v56, %v3595_v53  ;;  %v3190_v14 = vpack.c.bf16 %v3891_v55, %v3885_v54  ;;  %v2645_v25 = vmul.f32 %v3891_v55, %v3891_v55 }
 0x221   : > { %v2675_v43 = vadd.f32 %v2674_v30, %v2644_v40  ;;  %v2607_v0 = vadd.f32 %v3891_v55, %v2606_v2 }
 0x222   : > { %v2646_v4 = vmul.f32 %v3882_v29, %v3882_v29  ;;  %v3888_v34 = vadd.f32 %v3887_v61, %v3763_v19  ;;  %3210 = vst [vmem:[%s4901_s18 + $0x70] sm:$0xff] %v3190_v14  }
 0x223   : > { %v2608_v22 = vadd.f32 %v3882_v29, %v2607_v0  ;;  %v2676_v7 = vadd.f32 %v2675_v43, %v2645_v25 }
 0x224   : > { %v3195_v38 = vpack.c.bf16 %v3888_v34, %v3882_v29  ;;  %v2647_v52 = vmul.f32 %v3888_v34, %v3888_v34 }
 0x225   : > { %v2609_v49 = vadd.f32 %v3888_v34, %v2608_v22  ;;  %v2677_v32 = vadd.f32 %v2676_v7, %v2646_v4 }
 0x226   : > { %3211 = vst [vmem:[%s4901_s18 + $0x78] sm:$0xff] %v3195_v38  }
 0x227   : > { %v2610_v6 = vrot.slane %v2609_v49, 4  ;;  %v2678_v39 = vadd.f32 %v2677_v32, %v2647_v52 }
 0x229   : > { %v2611_v23 = vadd.f32 %v2610_v6, %v2609_v49  ;;  %v2679_v3 = vrot.slane %v2678_v39, 4 }
 0x22b   : > { %v2612_v56 = vrot.slane %v2611_v23, 2  ;;  %v2680_v48 = vadd.f32 %v2679_v3, %v2678_v39 }
 0x22d   : > { %v2613_v57 = vadd.f32 %v2612_v56, %v2611_v23  ;;  %v2681_v13 = vrot.slane %v2680_v48, 2 }
 0x22f   : > { %v2614_v35 = vrot.slane %v2613_v57, 1  ;;  %v2682_v63 = vadd.f32 %v2681_v13, %v2680_v48 }
 0x231   : > { %v2683_v5 = vrot.slane %v2682_v63, 1  ;;  %v2615_v59 = vadd.f32 %v2614_v35, %v2613_v57 }
 0x233   : > { %v2684_v15 = vadd.f32 %v2683_v5, %v2682_v63 }
 0x235   : > { %v2686_v45 = vsel %vm2685_vm0, %v2615_v59, %v2684_v15 }
 0x236   : > { %2687 = vst [vmem:[%s181_s22] sm:$0x3] %v2686_v45 }
 0x237 PF: > { %s14_s12 = sadd.s32 1, %s4114_s12  }
 0x238   : > { %p11_p4 = scmp.ge.s32.totalorder %s14_s12, 4  }
 0x23a   :  { %13 = sbr.rel (!%p11_p4) target bundleno = 1 (0x1), region = 72 }

</bundles_post_ra>
